<compile_context>
chip_gen: v7x
topology: tpu7x:2x2x1
jax: 0.10.0
libtpu: 0.0.40
codegen_flags: <defaults>
</compile_context>

<pallas_src>
import functools

import jax
import jax.numpy as jnp
from jax.experimental import pallas as pl
from jax.experimental.pallas import tpu as pltpu

NEG_SLOPE = 0.2
LATENT_DIM = 80
N_C = 10
LIN2_PAD = 128  # lane-dense padded width for the 90-wide second linear


# ----------------------------- Pallas kernels --------------------------------
def _conv_mm_kernel(x_ref, w_ref, b_ref, o_ref, *, neg_slope):
    """Single-shot matmul + bias + LeakyReLU for the tiny conv-as-matmul stages."""
    acc = jnp.dot(x_ref[...], w_ref[...], preferred_element_type=jnp.float32)
    acc = acc + b_ref[...]
    acc = jnp.where(acc >= 0.0, acc, acc * neg_slope)
    o_ref[...] = acc.astype(o_ref.dtype)


def conv_matmul(patches, w_mat, bias2):
    """LeakyReLU(patches @ w_mat + bias).  Whole operands fit VMEM; no grid."""
    M, K = patches.shape
    K2, N = w_mat.shape
    assert K == K2
    return pl.pallas_call(
        functools.partial(_conv_mm_kernel, neg_slope=NEG_SLOPE),
        out_shape=jax.ShapeDtypeStruct((M, N), patches.dtype),
    )(patches, w_mat, bias2)


def _mlp_fused_kernel(x_ref, w1_ref, b1_ref, w2_ref, zp_ref, *, neg_slope):
    """One N-tile of lin1 fused with its partial lin2 contribution.

    x_ref : (M, 3200)    resident activations
    w1_ref: (3200, tn)   this tile's lin1 weight columns (streamed)
    b1_ref: (1, tn)      this tile's lin1 bias slice
    w2_ref: (tn, 128)    this tile's lin2 weight rows (90 padded to 128)
    zp_ref: (1, M, 128)  partial lin2 output for this tile
    """
    h = jnp.dot(x_ref[...], w1_ref[...], preferred_element_type=jnp.float32)
    h = h + b1_ref[...]
    h = jnp.where(h >= 0.0, h, h * neg_slope)
    zp = jnp.dot(h, w2_ref[...], preferred_element_type=jnp.float32)
    zp_ref[...] = zp[None, :, :].astype(zp_ref.dtype)


def mlp_fused(x, w1, b1_2d, w2_pad, *, tn=256):
    """Partial products of Linear(3200,1024)+LeakyReLU followed by Linear(1024,128pad).

    Returns (n_tiles, M, 128); caller sums over axis 0 and adds the lin2 bias.
    The N axis of lin1 is the (parallel) grid, so both v7x TensorCores share
    the 13 MB weight stream; x / bias / w2 tiles are small and stay resident.
    """
    M, K = x.shape              # (B, 3200)
    K2, N1 = w1.shape           # (3200, 1024)
    _, N2 = w2_pad.shape        # (1024, 128)
    assert K == K2 and N1 % tn == 0
    n_tiles = N1 // tn
    return pl.pallas_call(
        functools.partial(_mlp_fused_kernel, neg_slope=NEG_SLOPE),
        out_shape=jax.ShapeDtypeStruct((n_tiles, M, N2), jnp.float32),
        grid_spec=pltpu.PrefetchScalarGridSpec(
            num_scalar_prefetch=0,
            grid=(n_tiles,),
            in_specs=[
                pl.BlockSpec((M, K), lambda j: (0, 0)),    # x: resident, DMA'd once
                pl.BlockSpec((K, tn), lambda j: (0, j)),   # w_lin1 column stream
                pl.BlockSpec((1, tn), lambda j: (0, j)),   # b_lin1 slice
                pl.BlockSpec((tn, N2), lambda j: (j, 0)),  # w_lin2 row block
            ],
            out_specs=pl.BlockSpec((1, M, N2), lambda j: (j, 0, 0)),
        ),
        compiler_params=pltpu.CompilerParams(
            dimension_semantics=("parallel",),
            vmem_limit_bytes=32 << 20,
        ),
    )(x, w1, b1_2d, w2_pad)


# ------------------------------ glue (JAX) -----------------------------------
def _im2col(x_nhwc, kh, kw, stride):
    """Extract conv patches. Returns (B*OH*OW, kh*kw*Cin) in (kh,kw,ci) order."""
    B, H, W, C = x_nhwc.shape
    OH = (H - kh) // stride + 1
    OW = (W - kw) // stride + 1
    patches = []
    for i in range(kh):
        for j in range(kw):
            patches.append(
                x_nhwc[:, i : i + stride * OH : stride, j : j + stride * OW : stride, :]
            )
    p = jnp.stack(patches, axis=3)          # (B, OH, OW, kh*kw, C)
    return p.reshape(B * OH * OW, kh * kw * C), (B, OH, OW)


def init_params(key):
    """Raw parameters in PyTorch layouts."""
    ks = jax.random.split(key, 8)
    p = {}
    p["w_conv1"] = jax.random.normal(ks[0], (64, 1, 4, 4), jnp.float32) * 0.1
    p["b_conv1"] = jax.random.normal(ks[1], (64,), jnp.float32) * 0.01
    p["w_conv2"] = jax.random.normal(ks[2], (128, 64, 4, 4), jnp.float32) * 0.05
    p["b_conv2"] = jax.random.normal(ks[3], (128,), jnp.float32) * 0.01
    p["w_lin1"] = jax.random.normal(ks[4], (1024, 3200), jnp.float32) * 0.02  # (out,in)
    p["b_lin1"] = jax.random.normal(ks[5], (1024,), jnp.float32) * 0.01
    p["w_lin2"] = jax.random.normal(ks[6], (90, 1024), jnp.float32) * 0.02    # (out,in)
    p["b_lin2"] = jax.random.normal(ks[7], (90,), jnp.float32) * 0.01
    return p


def prepare_params(p):
    """One-time weight re-layout (hoisted out of the forward pass)."""
    prep = {}
    # Conv weights: (Cout,Cin,KH,KW) -> (KH*KW*Cin, Cout), matching _im2col order.
    prep["w_conv1_mat"] = jnp.transpose(p["w_conv1"], (2, 3, 1, 0)).reshape(16, 64)
    prep["b_conv1_2d"] = p["b_conv1"].reshape(1, 64).astype(jnp.float32)
    prep["w_conv2_mat"] = jnp.transpose(p["w_conv2"], (2, 3, 1, 0)).reshape(4 * 4 * 64, 128)
    prep["b_conv2_2d"] = p["b_conv2"].reshape(1, 128).astype(jnp.float32)
    # lin1: torch weight is (1024, 3200) applied to an NCHW (c,h,w) flatten.
    # Pre-permute rows to NHWC (h,w,c) order so the conv2 output's natural
    # NHWC flatten feeds lin1 directly (drops a per-call activation transpose).
    w1_t = p["w_lin1"].T.reshape(128, 5, 5, 1024)       # rows were c*25 + h*5 + w
    w1_t = jnp.transpose(w1_t, (1, 2, 0, 3))            # (h, w, c, out)
    prep["w_lin1_mat"] = w1_t.reshape(3200, 1024)       # rows h*640 + w*128 + c
    prep["b_lin1_2d"] = p["b_lin1"].reshape(1, 1024).astype(jnp.float32)
    # lin2: (90, 1024) -> (1024, 90) -> lane-dense zero-pad to (1024, 128).
    w2_t = p["w_lin2"].T
    prep["w_lin2_mat"] = jnp.pad(w2_t, ((0, 0), (0, LIN2_PAD - w2_t.shape[1])))
    prep["b_lin2_pad"] = jnp.pad(p["b_lin2"], (0, LIN2_PAD - p["b_lin2"].shape[0]))
    return prep


@jax.jit
def encoder_simclr_forward(prep, x_nchw):
    B = x_nchw.shape[0]
    x = jnp.transpose(x_nchw, (0, 2, 3, 1))                     # NCHW -> NHWC
    # conv1: (B,28,28,1) -> (B,13,13,64)
    p1, (_, oh1, ow1) = _im2col(x, 4, 4, 2)
    h1 = conv_matmul(p1, prep["w_conv1_mat"], prep["b_conv1_2d"])
    h1 = h1.reshape(B, oh1, ow1, 64)
    # conv2: (B,13,13,64) -> (B,5,5,128)
    p2, (_, oh2, ow2) = _im2col(h1, 4, 4, 2)
    h2 = conv_matmul(p2, prep["w_conv2_mat"], prep["b_conv2_2d"])
    # NHWC flatten feeds the NHWC-row-permuted lin1 weight directly (no transpose).
    h2 = h2.reshape(B, oh2 * ow2 * 128)                         # (B, 3200)
    # Fused Linear(3200,1024)+LeakyReLU and Linear(1024,90->128pad) partials.
    zp = mlp_fused(h2, prep["w_lin1_mat"], prep["b_lin1_2d"], prep["w_lin2_mat"])
    z = zp.sum(axis=0) + prep["b_lin2_pad"]                     # (B, 128)
    return z[:, :LATENT_DIM]                                    # (B, 80)


if __name__ == "__main__":
    key = jax.random.PRNGKey(0)
    kp, kx = jax.random.split(key)
    params = init_params(kp)
    prep = prepare_params(params)  # weight re-layouts hoisted out of the forward
    # batch=2, channels=1, 28x28 (spatial size fixed by the 3200-wide Linear)
    x = jax.random.normal(kx, (2, 1, 28, 28), jnp.float32)

    zn = encoder_simclr_forward(prep, x)
    zn = jax.block_until_ready(zn)
    assert zn.shape == (2, LATENT_DIM), zn.shape
    assert jnp.all(jnp.isfinite(zn))
    print("KERNEL_OK")
</pallas_src>

<mosaic_0001>
module attributes {stable_mosaic.version = 11 : i64} {
  func.func @_conv_mm_kernel(%arg0: memref<338x16xf32, #tpu.memory_space<vmem>>, %arg1: memref<16x64xf32, #tpu.memory_space<vmem>>, %arg2: memref<1x64xf32, #tpu.memory_space<vmem>>, %arg3: memref<338x64xf32, #tpu.memory_space<vmem>>) attributes {dimension_semantics = [], scalar_prefetch = 0 : i64, scratch_operands = 0 : i64, tpu.core_type = #tpu.core_type<tc>} {
    %c0 = arith.constant 0 : index
    %c0_0 = arith.constant 0 : index
    %0 = vector.load %arg0[%c0, %c0_0] : memref<338x16xf32, #tpu.memory_space<vmem>>, vector<338x16xf32>
    %c0_1 = arith.constant 0 : index
    %c0_2 = arith.constant 0 : index
    %1 = vector.load %arg1[%c0_1, %c0_2] : memref<16x64xf32, #tpu.memory_space<vmem>>, vector<16x64xf32>
    %cst = arith.constant dense<0.000000e+00> : vector<338x64xf32>
    %2 = tpu.matmul %0, %1, %cst {dimension_numbers = #tpu.dot_dimension_numbers<[1], [0], [0], [1], [0, 0, 1, 1], [], []>} : vector<338x16xf32>, vector<16x64xf32>, vector<338x64xf32> -> vector<338x64xf32>
    %c0_3 = arith.constant 0 : index
    %c0_4 = arith.constant 0 : index
    %3 = vector.load %arg2[%c0_3, %c0_4] : memref<1x64xf32, #tpu.memory_space<vmem>>, vector<1x64xf32>
    %4 = vector.broadcast %3 : vector<1x64xf32> to vector<338x64xf32>
    %5 = arith.addf %2, %4 : vector<338x64xf32>
    %cst_5 = arith.constant 0.000000e+00 : f32
    %6 = vector.broadcast %cst_5 : f32 to vector<338x64xf32>
    %7 = arith.cmpf oge, %5, %6 : vector<338x64xf32>
    %cst_6 = arith.constant 2.000000e-01 : f32
    %8 = vector.broadcast %cst_6 : f32 to vector<338x64xf32>
    %9 = arith.mulf %5, %8 : vector<338x64xf32>
    %10 = arith.select %7, %5, %9 : vector<338x64xi1>, vector<338x64xf32>
    %c0_7 = arith.constant 0 : index
    %c0_8 = arith.constant 0 : index
    %11 = vector.load %arg3[%c0_7, %c0_8] : memref<338x64xf32, #tpu.memory_space<vmem>>, vector<338x64xf32>
    tpu.vector_store %arg3[%c0_7, %c0_8], %10 {strides = array<i32>} : memref<338x64xf32, #tpu.memory_space<vmem>>, vector<338x64xf32>,
    return
  }
}

module attributes {stable_mosaic.version = 11 : i64} {
  func.func @_conv_mm_kernel(%arg0: memref<50x1024xf32, #tpu.memory_space<vmem>>, %arg1: memref<1024x128xf32, #tpu.memory_space<vmem>>, %arg2: memref<1x128xf32, #tpu.memory_space<vmem>>, %arg3: memref<50x128xf32, #tpu.memory_space<vmem>>) attributes {dimension_semantics = [], scalar_prefetch = 0 : i64, scratch_operands = 0 : i64, tpu.core_type = #tpu.core_type<tc>} {
    %c0 = arith.constant 0 : index
    %c0_0 = arith.constant 0 : index
    %0 = vector.load %arg0[%c0, %c0_0] : memref<50x1024xf32, #tpu.memory_space<vmem>>, vector<50x1024xf32>
    %c0_1 = arith.constant 0 : index
    %c0_2 = arith.constant 0 : index
    %1 = vector.load %arg1[%c0_1, %c0_2] : memref<1024x128xf32, #tpu.memory_space<vmem>>, vector<1024x128xf32>
    %cst = arith.constant dense<0.000000e+00> : vector<50x128xf32>
    %2 = tpu.matmul %0, %1, %cst {dimension_numbers = #tpu.dot_dimension_numbers<[1], [0], [0], [1], [0, 0, 1, 1], [], []>} : vector<50x1024xf32>, vector<1024x128xf32>, vector<50x128xf32> -> vector<50x128xf32>
    %c0_3 = arith.constant 0 : index
    %c0_4 = arith.constant 0 : index
    %3 = vector.load %arg2[%c0_3, %c0_4] : memref<1x128xf32, #tpu.memory_space<vmem>>, vector<1x128xf32>
    %4 = vector.broadcast %3 : vector<1x128xf32> to vector<50x128xf32>
    %5 = arith.addf %2, %4 : vector<50x128xf32>
    %cst_5 = arith.constant 0.000000e+00 : f32
    %6 = vector.broadcast %cst_5 : f32 to vector<50x128xf32>
    %7 = arith.cmpf oge, %5, %6 : vector<50x128xf32>
    %cst_6 = arith.constant 2.000000e-01 : f32
    %8 = vector.broadcast %cst_6 : f32 to vector<50x128xf32>
    %9 = arith.mulf %5, %8 : vector<50x128xf32>
    %10 = arith.select %7, %5, %9 : vector<50x128xi1>, vector<50x128xf32>
    %c0_7 = arith.constant 0 : index
    %c0_8 = arith.constant 0 : index
    %11 = vector.load %arg3[%c0_7, %c0_8] : memref<50x128xf32, #tpu.memory_space<vmem>>, vector<50x128xf32>
    tpu.vector_store %arg3[%c0_7, %c0_8], %10 {strides = array<i32>} : memref<50x128xf32, #tpu.memory_space<vmem>>, vector<50x128xf32>,
    return
  }
}

module attributes {stable_mosaic.version = 11 : i64} {
  func.func @_mlp_fused_kernel(%arg0: i32, %arg1: memref<2x3200xf32, #tpu.memory_space<vmem>>, %arg2: memref<3200x256xf32, #tpu.memory_space<vmem>>, %arg3: memref<1x256xf32, #tpu.memory_space<vmem>>, %arg4: memref<256x128xf32, #tpu.memory_space<vmem>>, %arg5: memref<1x2x128xf32, #tpu.memory_space<vmem>>) attributes {dimension_semantics = [#tpu.dimension_semantics<parallel>], iteration_bounds = array<i64: 4>, scalar_prefetch = 0 : i64, scratch_operands = 0 : i64, tpu.core_type = #tpu.core_type<tc>, window_params = [{pipeline_mode = #tpu.pipeline_mode<synchronous>, transform_indices = @transform_0, window_bounds = array<i64: 2, 3200>}, {transform_indices = @transform_1, window_bounds = array<i64: 3200, 256>}, {transform_indices = @transform_2, window_bounds = array<i64: 1, 256>}, {transform_indices = @transform_3, window_bounds = array<i64: 256, 128>}, {transform_indices = @transform_4, window_bounds = array<i64: 1, 2, 128>}]} {
    %c0 = arith.constant 0 : index
    %c0_0 = arith.constant 0 : index
    %0 = vector.load %arg1[%c0, %c0_0] : memref<2x3200xf32, #tpu.memory_space<vmem>>, vector<2x3200xf32>
    %c0_1 = arith.constant 0 : index
    %c0_2 = arith.constant 0 : index
    %1 = vector.load %arg2[%c0_1, %c0_2] : memref<3200x256xf32, #tpu.memory_space<vmem>>, vector<3200x256xf32>
    %cst = arith.constant dense<0.000000e+00> : vector<2x256xf32>
    %2 = tpu.matmul %0, %1, %cst {dimension_numbers = #tpu.dot_dimension_numbers<[1], [0], [0], [1], [0, 0, 1, 1], [], []>} : vector<2x3200xf32>, vector<3200x256xf32>, vector<2x256xf32> -> vector<2x256xf32>
    %c0_3 = arith.constant 0 : index
    %c0_4 = arith.constant 0 : index
    %3 = vector.load %arg3[%c0_3, %c0_4] : memref<1x256xf32, #tpu.memory_space<vmem>>, vector<1x256xf32>
    %4 = vector.broadcast %3 : vector<1x256xf32> to vector<2x256xf32>
    %5 = arith.addf %2, %4 : vector<2x256xf32>
    %cst_5 = arith.constant 0.000000e+00 : f32
    %6 = vector.broadcast %cst_5 : f32 to vector<2x256xf32>
    %7 = arith.cmpf oge, %5, %6 : vector<2x256xf32>
    %cst_6 = arith.constant 2.000000e-01 : f32
    %8 = vector.broadcast %cst_6 : f32 to vector<2x256xf32>
    %9 = arith.mulf %5, %8 : vector<2x256xf32>
    %10 = arith.select %7, %5, %9 : vector<2x256xi1>, vector<2x256xf32>
    %c0_7 = arith.constant 0 : index
    %c0_8 = arith.constant 0 : index
    %11 = vector.load %arg4[%c0_7, %c0_8] : memref<256x128xf32, #tpu.memory_space<vmem>>, vector<256x128xf32>
    %cst_9 = arith.constant dense<0.000000e+00> : vector<2x128xf32>
    %12 = tpu.matmul %10, %11, %cst_9 {dimension_numbers = #tpu.dot_dimension_numbers<[1], [0], [0], [1], [0, 0, 1, 1], [], []>} : vector<2x256xf32>, vector<256x128xf32>, vector<2x128xf32> -> vector<2x128xf32>
    %13 = vector.shape_cast %12 : vector<2x128xf32> to vector<1x2x128xf32>
    %c0_10 = arith.constant 0 : index
    %c0_11 = arith.constant 0 : index
    %c0_12 = arith.constant 0 : index
    %14 = vector.load %arg5[%c0_10, %c0_11, %c0_12] : memref<1x2x128xf32, #tpu.memory_space<vmem>>, vector<1x2x128xf32>
    tpu.vector_store %arg5[%c0_10, %c0_11, %c0_12], %13 {strides = array<i32>} : memref<1x2x128xf32, #tpu.memory_space<vmem>>, vector<1x2x128xf32>,
    return
  }
  func.func @transform_0(%arg0: i32) -> (i32, i32) {
    %c0_i32 = arith.constant 0 : i32
    %c0_i32_0 = arith.constant 0 : i32
    %c0_i32_1 = arith.constant 0 : i32
    return %c0_i32, %c0_i32_0 : i32, i32
  }
  func.func @transform_1(%arg0: i32) -> (i32, i32) {
    %c0_i32 = arith.constant 0 : i32
    %c0_i32_0 = arith.constant 0 : i32
    return %c0_i32, %arg0 : i32, i32
  }
  func.func @transform_2(%arg0: i32) -> (i32, i32) {
    %c0_i32 = arith.constant 0 : i32
    %c0_i32_0 = arith.constant 0 : i32
    return %c0_i32, %arg0 : i32, i32
  }
  func.func @transform_3(%arg0: i32) -> (i32, i32) {
    %c0_i32 = arith.constant 0 : i32
    %c0_i32_0 = arith.constant 0 : i32
    return %arg0, %c0_i32 : i32, i32
  }
  func.func @transform_4(%arg0: i32) -> (i32, i32, i32) {
    %c0_i32 = arith.constant 0 : i32
    %c0_i32_0 = arith.constant 0 : i32
    %c0_i32_1 = arith.constant 0 : i32
    return %arg0, %c0_i32, %c0_i32_0 : i32, i32, i32
  }
}

</mosaic_0001>

<bundles_post_ra>
// kernel: encoder_simclr_forward.3
= control target key start
LH: loop header
LB: loop body
LE: loop exit
PB: predicated region body
PF: predicated region fallthrough
CT: control target
= control target key end

     0   :  { %8 = vsyncpa [#allocation3], 0  ;;  %s1489_s0 = inlined_call_operand.vmem [shape: f32[338,16], index: 0, kind: input, shape index: {}]   ;;  %s1490_s1 = inlined_call_operand.hbm [shape: f32[16,64], index: 1, kind: input, shape index: {}]   ;;  %s1491_s2 = inlined_call_operand.hbm [shape: f32[1,64], index: 2, kind: input, shape index: {}]   ;;  %s1492_s3 = inlined_call_operand.vmem [shape: f32[338,64], index: 3, kind: output, shape index: {}]  }
   0x1   :  { %9 = vsyncpa [#allocation5], 0  ;;  %s964_s12 = smov [#allocation2]   ;;  %s916_s16 = scalar_lea.hbm %s1490_s1, 256 }
   0x2   :  { %s17_s13 = sshll.u32 %s964_s12, 4  ;;  %p917_p0 = scmp.ne.s32.totalorder %s1490_s1, %s916_s16  ;;  %s18_s13 = int_to_ptr.vmem [resolvable:$true] %s17_s13 }
   0x3   :  { %p920_p1 = scmp.lt.u32.totalorder %s916_s16, %s1490_s1 }
   0x5   :  { %p922_p2 = pnand %p920_p1, %p917_p0 }
   0x7   :  { %925 = shalt.err (!%p922_p2)
}
   0x8   :  { %s926_s21 = scalar_lea.vmem %s18_s13, 256  ;;  %p931_p4 = scmp.lt.s32.totalorder %s18_s13, %s18_s13 }
   0x9   :  { %p927_p3 = scmp.ne.s32.totalorder %s18_s13, %s926_s21  ;;  %p932_p5 = scmp.lt.s32.totalorder %s926_s21, %s926_s21 }
   0xb   :  { %p933_p6 = por %p932_p5, %p931_p4 }
   0xd   :  { %p934_p7 = pnand %p933_p6, %p927_p3 }
   0xf   :  { %937 = shalt.err (!%p934_p7)
}
  0x10   :  { %s965_s22 = smov 128   ;;  %s966_s23 = smov 8  }
  0x11   :  { %23 = dma.hbm_to_vmem [thread:$0]  %s1490_s1, 256, %s18_s13, [#allocation3], %s965_s22, %s965_s22, %s966_s23  }
  0x12   :  { %s967_s26 = smov [#allocation4]   ;;  %s938_s30 = scalar_lea.hbm %s1491_s2, 16 }
  0x13   :  { %s30_s27 = sshll.u32 %s967_s26, 4  ;;  %p939_p8 = scmp.ne.s32.totalorder %s1491_s2, %s938_s30  ;;  %s31_s27 = int_to_ptr.vmem [resolvable:$true] %s30_s27 }
  0x14   :  { %p942_p9 = scmp.lt.u32.totalorder %s938_s30, %s1491_s2 }
  0x16   :  { %p944_p10 = pnand %p942_p9, %p939_p8 }
  0x18   :  { %947 = shalt.err (!%p944_p10)
}
  0x19   :  { %s948_s8 = scalar_lea.vmem %s31_s27, 16  ;;  %s952_s1 = scalar_lea.vmem %s31_s27, 32 }
  0x1a   :  { %p949_p11 = scmp.ne.s32.totalorder %s31_s27, %s948_s8  ;;  %p953_p12 = scmp.lt.s32.totalorder %s31_s27, %s31_s27 }
  0x1b   :  { %p954_p13 = scmp.lt.s32.totalorder %s952_s1, %s948_s8 }
  0x1d   :  { %p955_p0 = por %p954_p13, %p953_p12 }
  0x1f   :  { %p956_p1 = pnand %p955_p0, %p949_p11 }
  0x21   :  { %959 = shalt.err (!%p956_p1)
}
  0x22   :  { %33 = dma.hbm_to_vmem [thread:$0]  %s1491_s2, 16, %s31_s27, [#allocation5]  }
  0x23   :  { %960 = dma.done.wait [#allocation3], 256  }
  0x24   :  { %961 = vsyncadd [#allocation3], 4294967040 }
  0x25   :  { %962 = dma.done.wait [#allocation5], 16  }
  0x26   :  { %963 = vsyncadd [#allocation5], 4294967280  ;;  %v968_v0 = vmov 0.0|0.0   ;;  %vm969_vm0 = vmmov 0   ;;  %v970_v1 = vmov 0.0   ;;  %v83_v2 = vld [vmem:[#allocation2] sm:$0xff] }
  0x27   :  { %904 = vmatprep.subr.bf16.mxu0 %v968_v0  ;;  %907 = vmatprep.subr.bf16.mxu1 %v968_v0  ;;  %v84_v3 = vld [vmem:[#allocation2 + $0x8] sm:$0xff]  ;;  %v40_v5 = vld [vmem:[%s1489_s0] sm:$0xff]  ;;  %vm92_vm1 = vcmask 130048   ;;  %v62_v6 = vld [vmem:[%s1489_s0 + $0xb0] sm:$0xff]  ;;  %vm631_vm2 = vcmask 523264  }
  0x28   :  { %775 = vmatprep.mubr.msk.f32.mxu0 %vm969_vm0, %v970_v1  ;;  %841 = vmatprep.mubr.msk.f32.mxu1 %vm969_vm0, %v970_v1  ;;  %v905_v4 = vpack.c.bf16 %v84_v3, %v83_v2  ;;  %v41_v7 = vld [vmem:[%s1489_s0 + $0x8] sm:$0xff]  ;;  %v63_v8 = vld [vmem:[%s1489_s0 + $0xb8] sm:$0xff]  ;;  %v42_v9 = vld [vmem:[%s1489_s0 + $0x10] sm:$0xff] }
  0x29   :  { %v64_v10 = vld [vmem:[%s1489_s0 + $0xc0] sm:$0xff]  ;;  %v43_v11 = vld [vmem:[%s1489_s0 + $0x18] sm:$0xff]  ;;  %v65_v12 = vld [vmem:[%s1489_s0 + $0xc8] sm:$0xff] }
  0x2a   :  { %906 = vmatpush3.bf16.msra.mxu0 %v905_v4  ;;  %908 = vmatpush3.bf16.msra.mxu1 %v905_v4  ;;  %v44_v13 = vld [vmem:[%s1489_s0 + $0x20] sm:$0xff]  ;;  %v66_v14 = vld [vmem:[%s1489_s0 + $0xd0] sm:$0xff]  ;;  %v45_v15 = vld [vmem:[%s1489_s0 + $0x28] sm:$0xff] }
  0x2b   :  { %v67_v16 = vld [vmem:[%s1489_s0 + $0xd8] sm:$0xff]  ;;  %v46_v17 = vld [vmem:[%s1489_s0 + $0x30] sm:$0xff]  ;;  %v68_v18 = vld [vmem:[%s1489_s0 + $0xe0] sm:$0xff] }
  0x2c   :  { %v47_v19 = vld [vmem:[%s1489_s0 + $0x38] sm:$0xff]  ;;  %v69_v20 = vld [vmem:[%s1489_s0 + $0xe8] sm:$0xff]  ;;  %v48_v21 = vld [vmem:[%s1489_s0 + $0x40] sm:$0xff] }
  0x2d   :  { %776 = vmatmul.mubr.msk.f32.vlgmr.msra.gmra.mrb[0].mxu0 %vm92_vm1, %v40_v5  ;;  %842 = vmatmul.mubr.msk.f32.vlgmr.msra.gmra.mrb[0].mxu1 %vm92_vm1, %v62_v6  ;;  %v70_v22 = vld [vmem:[%s1489_s0 + $0xf0] sm:$0xff]  ;;  %v49_v23 = vld [vmem:[%s1489_s0 + $0x48] sm:$0xff]  ;;  %v71_v24 = vld [vmem:[%s1489_s0 + $0xf8] sm:$0xff] }
  0x2e   :  { %778 = vmatprep.mubr.msk.f32.mxu0 %vm969_vm0, %v970_v1  ;;  %844 = vmatprep.mubr.msk.f32.mxu1 %vm969_vm0, %v970_v1  ;;  %v50_v25 = vld [vmem:[%s1489_s0 + $0x50] sm:$0xff]  ;;  %v72_v26 = vld [vmem:[%s1489_s0 + $0x100] sm:$0xff]  ;;  %v51_v27 = vld [vmem:[%s1489_s0 + $0x58] sm:$0xff] }
  0x2f   :  { %v73_v28 = vld [vmem:[%s1489_s0 + $0x108] sm:$0xff]  ;;  %v52_v29 = vld [vmem:[%s1489_s0 + $0x60] sm:$0xff]  ;;  %v74_v30 = vld [vmem:[%s1489_s0 + $0x110] sm:$0xff] }
  0x30   :  { %v53_v31 = vld [vmem:[%s1489_s0 + $0x68] sm:$0xff]  ;;  %v75_v32 = vld [vmem:[%s1489_s0 + $0x118] sm:$0xff]  ;;  %v54_v33 = vld [vmem:[%s1489_s0 + $0x70] sm:$0xff] }
  0x31   :  { %779 = vmatmul.mubr.msk.f32.gmra.mrb[2].mxu0 %vm92_vm1, %v41_v7  ;;  %845 = vmatmul.mubr.msk.f32.gmra.mrb[2].mxu1 %vm92_vm1, %v63_v8  ;;  %v76_v34 = vld [vmem:[%s1489_s0 + $0x120] sm:$0xff]  ;;  %v55_v35 = vld [vmem:[%s1489_s0 + $0x78] sm:$0xff]  ;;  %v77_v36 = vld [vmem:[%s1489_s0 + $0x128] sm:$0xff] }
  0x32   :  { %781 = vmatprep.mubr.msk.f32.mxu0 %vm969_vm0, %v970_v1  ;;  %847 = vmatprep.mubr.msk.f32.mxu1 %vm969_vm0, %v970_v1  ;;  %v56_v37 = vld [vmem:[%s1489_s0 + $0x80] sm:$0xff]  ;;  %v78_v38 = vld [vmem:[%s1489_s0 + $0x130] sm:$0xff]  ;;  %v57_v39 = vld [vmem:[%s1489_s0 + $0x88] sm:$0xff] }
  0x33   :  { %v79_v40 = vld [vmem:[%s1489_s0 + $0x138] sm:$0xff]  ;;  %v58_v41 = vld [vmem:[%s1489_s0 + $0x90] sm:$0xff]  ;;  %v80_v42 = vld [vmem:[%s1489_s0 + $0x140] sm:$0xff] }
  0x34   :  { %v59_v43 = vld [vmem:[%s1489_s0 + $0x98] sm:$0xff]  ;;  %v81_v44 = vld [vmem:[%s1489_s0 + $0x148] sm:$0xff]  ;;  %v60_v45 = vld [vmem:[%s1489_s0 + $0xa0] sm:$0xff] }
  0x35   :  { %782 = vmatmul.mubr.msk.f32.gmra.mrb[4].mxu0 %vm92_vm1, %v42_v9  ;;  %848 = vmatmul.mubr.msk.f32.gmra.mrb[4].mxu1 %vm92_vm1, %v64_v10  ;;  %v82_v46 = vld [vmem:[%s1489_s0 + $0x150] sm:$0x3]  ;;  %v61_v47 = vld [vmem:[%s1489_s0 + $0xa8] sm:$0xff] }
  0x36   :  { %784 = vmatprep.mubr.msk.f32.mxu0 %vm969_vm0, %v970_v1  ;;  %850 = vmatprep.mubr.msk.f32.mxu1 %vm969_vm0, %v970_v1  ;;  %v1273_v48 = vld [vmem:[#allocation4] ss:$0 sm:$0xff] }
  0x39   :  { %785 = vmatmul.mubr.msk.f32.gmra.mrb[6].mxu0 %vm92_vm1, %v43_v11  ;;  %851 = vmatmul.mubr.msk.f32.gmra.mrb[6].mxu1 %vm92_vm1, %v65_v12 }
  0x3a   :  { %787 = vmatprep.mubr.msk.f32.mxu0 %vm969_vm0, %v970_v1  ;;  %853 = vmatprep.mubr.msk.f32.mxu1 %vm969_vm0, %v970_v1 }
  0x3d   :  { %788 = vmatmul.mubr.msk.f32.gmra.mrb[8].mxu0 %vm92_vm1, %v44_v13  ;;  %854 = vmatmul.mubr.msk.f32.gmra.mrb[8].mxu1 %vm92_vm1, %v66_v14 }
  0x3e   :  { %790 = vmatprep.mubr.msk.f32.mxu0 %vm969_vm0, %v970_v1  ;;  %856 = vmatprep.mubr.msk.f32.mxu1 %vm969_vm0, %v970_v1 }
  0x41   :  { %791 = vmatmul.mubr.msk.f32.gmra.mrb[10].mxu0 %vm92_vm1, %v45_v15  ;;  %857 = vmatmul.mubr.msk.f32.gmra.mrb[10].mxu1 %vm92_vm1, %v67_v16 }
  0x42   :  { %793 = vmatprep.mubr.msk.f32.mxu0 %vm969_vm0, %v970_v1  ;;  %859 = vmatprep.mubr.msk.f32.mxu1 %vm969_vm0, %v970_v1 }
  0x45   :  { %794 = vmatmul.mubr.msk.f32.gmra.mrb[12].mxu0 %vm92_vm1, %v46_v17  ;;  %860 = vmatmul.mubr.msk.f32.gmra.mrb[12].mxu1 %vm92_vm1, %v68_v18 }
  0x46   :  { %796 = vmatprep.mubr.msk.f32.mxu0 %vm969_vm0, %v970_v1  ;;  %862 = vmatprep.mubr.msk.f32.mxu1 %vm969_vm0, %v970_v1 }
  0x49   :  { %797 = vmatmul.mubr.msk.f32.gmra.mrb[14].mxu0 %vm92_vm1, %v47_v19  ;;  %863 = vmatmul.mubr.msk.f32.gmra.mrb[14].mxu1 %vm92_vm1, %v69_v20 }
  0x4a   :  { %799 = vmatprep.mubr.msk.f32.mxu0 %vm969_vm0, %v970_v1  ;;  %865 = vmatprep.mubr.msk.f32.mxu1 %vm969_vm0, %v970_v1 }
  0x4d   :  { %800 = vmatmul.mubr.msk.f32.gmra.mrb[16].mxu0 %vm92_vm1, %v48_v21  ;;  %866 = vmatmul.mubr.msk.f32.gmra.mrb[16].mxu1 %vm92_vm1, %v70_v22 }
  0x4e   :  { %802 = vmatprep.mubr.msk.f32.mxu0 %vm969_vm0, %v970_v1  ;;  %868 = vmatprep.mubr.msk.f32.mxu1 %vm969_vm0, %v970_v1 }
  0x51   :  { %803 = vmatmul.mubr.msk.f32.gmra.mrb[18].mxu0 %vm92_vm1, %v49_v23  ;;  %869 = vmatmul.mubr.msk.f32.gmra.mrb[18].mxu1 %vm92_vm1, %v71_v24 }
  0x52   :  { %805 = vmatprep.mubr.msk.f32.mxu0 %vm969_vm0, %v970_v1  ;;  %871 = vmatprep.mubr.msk.f32.mxu1 %vm969_vm0, %v970_v1 }
  0x55   :  { %806 = vmatmul.mubr.msk.f32.gmra.mrb[20].mxu0 %vm92_vm1, %v50_v25  ;;  %872 = vmatmul.mubr.msk.f32.gmra.mrb[20].mxu1 %vm92_vm1, %v72_v26 }
  0x56   :  { %808 = vmatprep.mubr.msk.f32.mxu0 %vm969_vm0, %v970_v1  ;;  %874 = vmatprep.mubr.msk.f32.mxu1 %vm969_vm0, %v970_v1 }
  0x59   :  { %809 = vmatmul.mubr.msk.f32.gmra.mrb[22].mxu0 %vm92_vm1, %v51_v27  ;;  %875 = vmatmul.mubr.msk.f32.gmra.mrb[22].mxu1 %vm92_vm1, %v73_v28 }
  0x5a   :  { %811 = vmatprep.mubr.msk.f32.mxu0 %vm969_vm0, %v970_v1  ;;  %877 = vmatprep.mubr.msk.f32.mxu1 %vm969_vm0, %v970_v1 }
  0x5d   :  { %812 = vmatmul.mubr.msk.f32.gmra.mrb[24].mxu0 %vm92_vm1, %v52_v29  ;;  %878 = vmatmul.mubr.msk.f32.gmra.mrb[24].mxu1 %vm92_vm1, %v74_v30 }
  0x5e   :  { %814 = vmatprep.mubr.msk.f32.mxu0 %vm969_vm0, %v970_v1  ;;  %880 = vmatprep.mubr.msk.f32.mxu1 %vm969_vm0, %v970_v1 }
  0x61   :  { %815 = vmatmul.mubr.msk.f32.gmra.mrb[26].mxu0 %vm92_vm1, %v53_v31  ;;  %881 = vmatmul.mubr.msk.f32.gmra.mrb[26].mxu1 %vm92_vm1, %v75_v32 }
  0x62   :  { %817 = vmatprep.mubr.msk.f32.mxu0 %vm969_vm0, %v970_v1  ;;  %883 = vmatprep.mubr.msk.f32.mxu1 %vm969_vm0, %v970_v1 }
  0x65   :  { %818 = vmatmul.mubr.msk.f32.gmra.mrb[28].mxu0 %vm92_vm1, %v54_v33  ;;  %884 = vmatmul.mubr.msk.f32.gmra.mrb[28].mxu1 %vm92_vm1, %v76_v34 }
  0x66   :  { %820 = vmatprep.mubr.msk.f32.mxu0 %vm969_vm0, %v970_v1  ;;  %886 = vmatprep.mubr.msk.f32.mxu1 %vm969_vm0, %v970_v1 }
  0x69   :  { %821 = vmatmul.mubr.msk.f32.gmra.mrb[30].mxu0 %vm92_vm1, %v55_v35  ;;  %887 = vmatmul.mubr.msk.f32.gmra.mrb[30].mxu1 %vm92_vm1, %v77_v36 }
  0x6a   :  { %823 = vmatprep.mubr.msk.f32.mxu0 %vm969_vm0, %v970_v1  ;;  %889 = vmatprep.mubr.msk.f32.mxu1 %vm969_vm0, %v970_v1 }
  0x6d   :  { %824 = vmatmul.mubr.msk.f32.gmra.mrb[32].mxu0 %vm92_vm1, %v56_v37  ;;  %890 = vmatmul.mubr.msk.f32.gmra.mrb[32].mxu1 %vm92_vm1, %v78_v38 }
  0x6e   :  { %826 = vmatprep.mubr.msk.f32.mxu0 %vm969_vm0, %v970_v1  ;;  %892 = vmatprep.mubr.msk.f32.mxu1 %vm969_vm0, %v970_v1 }
  0x71   :  { %827 = vmatmul.mubr.msk.f32.gmra.mrb[34].mxu0 %vm92_vm1, %v57_v39  ;;  %893 = vmatmul.mubr.msk.f32.gmra.mrb[34].mxu1 %vm92_vm1, %v79_v40 }
  0x72   :  { %829 = vmatprep.mubr.msk.f32.mxu0 %vm969_vm0, %v970_v1  ;;  %895 = vmatprep.mubr.msk.f32.mxu1 %vm969_vm0, %v970_v1 }
  0x75   :  { %830 = vmatmul.mubr.msk.f32.gmra.mrb[36].mxu0 %vm92_vm1, %v58_v41  ;;  %896 = vmatmul.mubr.msk.f32.gmra.mrb[36].mxu1 %vm92_vm1, %v80_v42 }
  0x76   :  { %832 = vmatprep.mubr.msk.f32.mxu0 %vm969_vm0, %v970_v1  ;;  %898 = vmatprep.mubr.msk.f32.mxu1 %vm969_vm0, %v970_v1 }
  0x79   :  { %833 = vmatmul.mubr.msk.f32.gmra.mrb[38].mxu0 %vm92_vm1, %v59_v43  ;;  %899 = vmatmul.mubr.msk.f32.gmra.mrb[38].mxu1 %vm92_vm1, %v81_v44 }
  0x7a   :  { %835 = vmatprep.mubr.msk.f32.mxu0 %vm969_vm0, %v970_v1  ;;  %901 = vmatprep.mubr.msk.f32.mxu1 %vm969_vm0, %v970_v1 }
  0x7d   :  { %836 = vmatmul.mubr.msk.f32.gmra.mrb[40].mxu0 %vm92_vm1, %v60_v45  ;;  %902 = vmatmul.mubr.msk.f32.gmra.mrb[40].mxu1 %vm92_vm1, %v82_v46 }
  0x7e   :  { %838 = vmatprep.mubr.msk.f32.mxu0 %vm969_vm0, %v970_v1 }
  0x81   :  { %839 = vmatmul.mubr.msk.f32.gmra.mrb[42].mxu0 %vm92_vm1, %v61_v47 }
 0x100   :  { %v288_v49 = vpop.f32.mrb[0].mxu0  ;;  %v398_v50 = vpop.f32.mrb[0].mxu1 }
 0x101   :  { %v289_v51 = vadd.f32 %v1273_v48, %v288_v49  ;;  %v777_v52 = vpop.f32.mrb[1].mxu0  ;;  %v399_v53 = vadd.f32 %v1273_v48, %v398_v50  ;;  %v843_v54 = vpop.f32.mrb[1].mxu1 }
 0x103   :  { %vm502_vm3 = vcmp.ge.f32.partialorder %v289_v51, 0.0  ;;  %v545_v55 = vmul.f32 0.2, %v289_v51  ;;  %vm524_vm4 = vcmp.ge.f32.partialorder %v399_v53, 0.0  ;;  %v567_v56 = vmul.f32 0.2, %v399_v53 }
 0x104   :  { %v293_v57 = vpop.f32.mrb[2].mxu0  ;;  %v403_v58 = vpop.f32.mrb[2].mxu1 }
 0x105   :  { %v588_v59 = vsel %vm502_vm3, %v289_v51, %v545_v55  ;;  %v610_v60 = vsel %vm524_vm4, %v399_v53, %v567_v56  ;;  %v294_v61 = vadd.f32 %v1273_v48, %v293_v57  ;;  %v780_v62 = vpop.f32.mrb[3].mxu0  ;;  %v404_v63 = vadd.f32 %v1273_v48, %v403_v58  ;;  %v846_v0 = vpop.f32.mrb[3].mxu1 }
 0x106   :  { %632 = vst.msk [vmem:[%s1492_s3] sm:$0xff] %vm631_vm2, %v588_v59  ;;  %654 = vst.msk [vmem:[%s1492_s3 + $0xb0] sm:$0xff] %vm631_vm2, %v610_v60 }
 0x107   :  { %vm503_vm5 = vcmp.ge.f32.partialorder %v294_v61, 0.0  ;;  %v546_v1 = vmul.f32 0.2, %v294_v61  ;;  %vm525_vm6 = vcmp.ge.f32.partialorder %v404_v63, 0.0  ;;  %v568_v2 = vmul.f32 0.2, %v404_v63 }
 0x108   :  { %v298_v3 = vpop.f32.mrb[4].mxu0  ;;  %v408_v4 = vpop.f32.mrb[4].mxu1 }
 0x109   :  { %v589_v5 = vsel %vm503_vm5, %v294_v61, %v546_v1  ;;  %v611_v6 = vsel %vm525_vm6, %v404_v63, %v568_v2  ;;  %v299_v7 = vadd.f32 %v1273_v48, %v298_v3  ;;  %v783_v8 = vpop.f32.mrb[5].mxu0  ;;  %v409_v9 = vadd.f32 %v1273_v48, %v408_v4  ;;  %v849_v10 = vpop.f32.mrb[5].mxu1 }
 0x10a   :  { %633 = vst.msk [vmem:[%s1492_s3 + $0x8] sm:$0xff] %vm631_vm2, %v589_v5  ;;  %655 = vst.msk [vmem:[%s1492_s3 + $0xb8] sm:$0xff] %vm631_vm2, %v611_v6 }
 0x10b   :  { %vm504_vm7 = vcmp.ge.f32.partialorder %v299_v7, 0.0  ;;  %v547_v11 = vmul.f32 0.2, %v299_v7  ;;  %vm526_vm8 = vcmp.ge.f32.partialorder %v409_v9, 0.0  ;;  %v569_v12 = vmul.f32 0.2, %v409_v9 }
 0x10c   :  { %v303_v13 = vpop.f32.mrb[6].mxu0  ;;  %v413_v14 = vpop.f32.mrb[6].mxu1 }
 0x10d   :  { %v590_v15 = vsel %vm504_vm7, %v299_v7, %v547_v11  ;;  %v612_v16 = vsel %vm526_vm8, %v409_v9, %v569_v12  ;;  %v304_v17 = vadd.f32 %v1273_v48, %v303_v13  ;;  %v786_v18 = vpop.f32.mrb[7].mxu0  ;;  %v414_v19 = vadd.f32 %v1273_v48, %v413_v14  ;;  %v852_v20 = vpop.f32.mrb[7].mxu1 }
 0x10e   :  { %634 = vst.msk [vmem:[%s1492_s3 + $0x10] sm:$0xff] %vm631_vm2, %v590_v15  ;;  %656 = vst.msk [vmem:[%s1492_s3 + $0xc0] sm:$0xff] %vm631_vm2, %v612_v16 }
 0x10f   :  { %vm505_vm9 = vcmp.ge.f32.partialorder %v304_v17, 0.0  ;;  %v548_v21 = vmul.f32 0.2, %v304_v17  ;;  %vm527_vm10 = vcmp.ge.f32.partialorder %v414_v19, 0.0  ;;  %v570_v22 = vmul.f32 0.2, %v414_v19 }
 0x110   :  { %v308_v23 = vpop.f32.mrb[8].mxu0  ;;  %v418_v24 = vpop.f32.mrb[8].mxu1 }
 0x111   :  { %v591_v25 = vsel %vm505_vm9, %v304_v17, %v548_v21  ;;  %v613_v26 = vsel %vm527_vm10, %v414_v19, %v570_v22  ;;  %v309_v27 = vadd.f32 %v1273_v48, %v308_v23  ;;  %v789_v28 = vpop.f32.mrb[9].mxu0  ;;  %v419_v29 = vadd.f32 %v1273_v48, %v418_v24  ;;  %v855_v30 = vpop.f32.mrb[9].mxu1 }
 0x112   :  { %635 = vst.msk [vmem:[%s1492_s3 + $0x18] sm:$0xff] %vm631_vm2, %v591_v25  ;;  %657 = vst.msk [vmem:[%s1492_s3 + $0xc8] sm:$0xff] %vm631_vm2, %v613_v26 }
 0x113   :  { %vm506_vm11 = vcmp.ge.f32.partialorder %v309_v27, 0.0  ;;  %v549_v31 = vmul.f32 0.2, %v309_v27  ;;  %vm528_vm12 = vcmp.ge.f32.partialorder %v419_v29, 0.0  ;;  %v571_v32 = vmul.f32 0.2, %v419_v29 }
 0x114   :  { %v313_v33 = vpop.f32.mrb[10].mxu0  ;;  %v423_v34 = vpop.f32.mrb[10].mxu1 }
 0x115   :  { %v592_v35 = vsel %vm506_vm11, %v309_v27, %v549_v31  ;;  %v614_v36 = vsel %vm528_vm12, %v419_v29, %v571_v32  ;;  %v314_v37 = vadd.f32 %v1273_v48, %v313_v33  ;;  %v792_v38 = vpop.f32.mrb[11].mxu0  ;;  %v424_v39 = vadd.f32 %v1273_v48, %v423_v34  ;;  %v858_v40 = vpop.f32.mrb[11].mxu1 }
 0x116   :  { %636 = vst.msk [vmem:[%s1492_s3 + $0x20] sm:$0xff] %vm631_vm2, %v592_v35  ;;  %658 = vst.msk [vmem:[%s1492_s3 + $0xd0] sm:$0xff] %vm631_vm2, %v614_v36 }
 0x117   :  { %vm507_vm13 = vcmp.ge.f32.partialorder %v314_v37, 0.0  ;;  %v550_v41 = vmul.f32 0.2, %v314_v37  ;;  %vm529_vm14 = vcmp.ge.f32.partialorder %v424_v39, 0.0  ;;  %v572_v42 = vmul.f32 0.2, %v424_v39 }
 0x118   :  { %v318_v43 = vpop.f32.mrb[12].mxu0  ;;  %v428_v44 = vpop.f32.mrb[12].mxu1 }
 0x119   :  { %v593_v45 = vsel %vm507_vm13, %v314_v37, %v550_v41  ;;  %v615_v46 = vsel %vm529_vm14, %v424_v39, %v572_v42  ;;  %v319_v47 = vadd.f32 %v1273_v48, %v318_v43  ;;  %v795_v49 = vpop.f32.mrb[13].mxu0  ;;  %v429_v50 = vadd.f32 %v1273_v48, %v428_v44  ;;  %v861_v51 = vpop.f32.mrb[13].mxu1 }
 0x11a   :  { %637 = vst.msk [vmem:[%s1492_s3 + $0x28] sm:$0xff] %vm631_vm2, %v593_v45  ;;  %659 = vst.msk [vmem:[%s1492_s3 + $0xd8] sm:$0xff] %vm631_vm2, %v615_v46 }
 0x11b   :  { %vm508_vm15 = vcmp.ge.f32.partialorder %v319_v47, 0.0  ;;  %v551_v52 = vmul.f32 0.2, %v319_v47  ;;  %vm530_vm0 = vcmp.ge.f32.partialorder %v429_v50, 0.0  ;;  %v573_v53 = vmul.f32 0.2, %v429_v50 }
 0x11c   :  { %v323_v54 = vpop.f32.mrb[14].mxu0  ;;  %v433_v55 = vpop.f32.mrb[14].mxu1 }
 0x11d   :  { %v594_v56 = vsel %vm508_vm15, %v319_v47, %v551_v52  ;;  %v616_v57 = vsel %vm530_vm0, %v429_v50, %v573_v53  ;;  %v324_v58 = vadd.f32 %v1273_v48, %v323_v54  ;;  %v798_v59 = vpop.f32.mrb[15].mxu0  ;;  %v434_v60 = vadd.f32 %v1273_v48, %v433_v55  ;;  %v864_v61 = vpop.f32.mrb[15].mxu1 }
 0x11e   :  { %638 = vst.msk [vmem:[%s1492_s3 + $0x30] sm:$0xff] %vm631_vm2, %v594_v56  ;;  %660 = vst.msk [vmem:[%s1492_s3 + $0xe0] sm:$0xff] %vm631_vm2, %v616_v57 }
 0x11f   :  { %vm509_vm1 = vcmp.ge.f32.partialorder %v324_v58, 0.0  ;;  %v552_v62 = vmul.f32 0.2, %v324_v58  ;;  %vm531_vm3 = vcmp.ge.f32.partialorder %v434_v60, 0.0  ;;  %v574_v63 = vmul.f32 0.2, %v434_v60 }
 0x120   :  { %v328_v0 = vpop.f32.mrb[16].mxu0  ;;  %v438_v1 = vpop.f32.mrb[16].mxu1 }
 0x121   :  { %v595_v2 = vsel %vm509_vm1, %v324_v58, %v552_v62  ;;  %v617_v3 = vsel %vm531_vm3, %v434_v60, %v574_v63  ;;  %v329_v4 = vadd.f32 %v1273_v48, %v328_v0  ;;  %v801_v5 = vpop.f32.mrb[17].mxu0  ;;  %v439_v6 = vadd.f32 %v1273_v48, %v438_v1  ;;  %v867_v7 = vpop.f32.mrb[17].mxu1 }
 0x122   :  { %639 = vst.msk [vmem:[%s1492_s3 + $0x38] sm:$0xff] %vm631_vm2, %v595_v2  ;;  %661 = vst.msk [vmem:[%s1492_s3 + $0xe8] sm:$0xff] %vm631_vm2, %v617_v3 }
 0x123   :  { %vm510_vm4 = vcmp.ge.f32.partialorder %v329_v4, 0.0  ;;  %v553_v8 = vmul.f32 0.2, %v329_v4  ;;  %vm532_vm5 = vcmp.ge.f32.partialorder %v439_v6, 0.0  ;;  %v575_v9 = vmul.f32 0.2, %v439_v6 }
 0x124   :  { %v333_v10 = vpop.f32.mrb[18].mxu0  ;;  %v443_v11 = vpop.f32.mrb[18].mxu1 }
 0x125   :  { %v596_v12 = vsel %vm510_vm4, %v329_v4, %v553_v8  ;;  %v618_v13 = vsel %vm532_vm5, %v439_v6, %v575_v9  ;;  %v334_v14 = vadd.f32 %v1273_v48, %v333_v10  ;;  %v804_v15 = vpop.f32.mrb[19].mxu0  ;;  %v444_v16 = vadd.f32 %v1273_v48, %v443_v11  ;;  %v870_v17 = vpop.f32.mrb[19].mxu1 }
 0x126   :  { %640 = vst.msk [vmem:[%s1492_s3 + $0x40] sm:$0xff] %vm631_vm2, %v596_v12  ;;  %662 = vst.msk [vmem:[%s1492_s3 + $0xf0] sm:$0xff] %vm631_vm2, %v618_v13 }
 0x127   :  { %vm511_vm6 = vcmp.ge.f32.partialorder %v334_v14, 0.0  ;;  %v554_v18 = vmul.f32 0.2, %v334_v14  ;;  %vm533_vm7 = vcmp.ge.f32.partialorder %v444_v16, 0.0  ;;  %v576_v19 = vmul.f32 0.2, %v444_v16 }
 0x128   :  { %v338_v20 = vpop.f32.mrb[20].mxu0  ;;  %v448_v21 = vpop.f32.mrb[20].mxu1 }
 0x129   :  { %v597_v22 = vsel %vm511_vm6, %v334_v14, %v554_v18  ;;  %v619_v23 = vsel %vm533_vm7, %v444_v16, %v576_v19  ;;  %v339_v24 = vadd.f32 %v1273_v48, %v338_v20  ;;  %v807_v25 = vpop.f32.mrb[21].mxu0  ;;  %v449_v26 = vadd.f32 %v1273_v48, %v448_v21  ;;  %v873_v27 = vpop.f32.mrb[21].mxu1 }
 0x12a   :  { %641 = vst.msk [vmem:[%s1492_s3 + $0x48] sm:$0xff] %vm631_vm2, %v597_v22  ;;  %663 = vst.msk [vmem:[%s1492_s3 + $0xf8] sm:$0xff] %vm631_vm2, %v619_v23 }
 0x12b   :  { %vm512_vm8 = vcmp.ge.f32.partialorder %v339_v24, 0.0  ;;  %v555_v28 = vmul.f32 0.2, %v339_v24  ;;  %vm534_vm9 = vcmp.ge.f32.partialorder %v449_v26, 0.0  ;;  %v577_v29 = vmul.f32 0.2, %v449_v26 }
 0x12c   :  { %v343_v30 = vpop.f32.mrb[22].mxu0  ;;  %v453_v31 = vpop.f32.mrb[22].mxu1 }
 0x12d   :  { %v598_v32 = vsel %vm512_vm8, %v339_v24, %v555_v28  ;;  %v620_v33 = vsel %vm534_vm9, %v449_v26, %v577_v29  ;;  %v344_v34 = vadd.f32 %v1273_v48, %v343_v30  ;;  %v810_v35 = vpop.f32.mrb[23].mxu0  ;;  %v454_v36 = vadd.f32 %v1273_v48, %v453_v31  ;;  %v876_v37 = vpop.f32.mrb[23].mxu1 }
 0x12e   :  { %642 = vst.msk [vmem:[%s1492_s3 + $0x50] sm:$0xff] %vm631_vm2, %v598_v32  ;;  %664 = vst.msk [vmem:[%s1492_s3 + $0x100] sm:$0xff] %vm631_vm2, %v620_v33 }
 0x12f   :  { %vm513_vm10 = vcmp.ge.f32.partialorder %v344_v34, 0.0  ;;  %v556_v38 = vmul.f32 0.2, %v344_v34  ;;  %vm535_vm11 = vcmp.ge.f32.partialorder %v454_v36, 0.0  ;;  %v578_v39 = vmul.f32 0.2, %v454_v36 }
 0x130   :  { %v348_v40 = vpop.f32.mrb[24].mxu0  ;;  %v458_v41 = vpop.f32.mrb[24].mxu1 }
 0x131   :  { %v599_v42 = vsel %vm513_vm10, %v344_v34, %v556_v38  ;;  %v621_v43 = vsel %vm535_vm11, %v454_v36, %v578_v39  ;;  %v349_v44 = vadd.f32 %v1273_v48, %v348_v40  ;;  %v813_v45 = vpop.f32.mrb[25].mxu0  ;;  %v459_v46 = vadd.f32 %v1273_v48, %v458_v41  ;;  %v879_v47 = vpop.f32.mrb[25].mxu1 }
 0x132   :  { %643 = vst.msk [vmem:[%s1492_s3 + $0x58] sm:$0xff] %vm631_vm2, %v599_v42  ;;  %665 = vst.msk [vmem:[%s1492_s3 + $0x108] sm:$0xff] %vm631_vm2, %v621_v43 }
 0x133   :  { %vm514_vm12 = vcmp.ge.f32.partialorder %v349_v44, 0.0  ;;  %v557_v49 = vmul.f32 0.2, %v349_v44  ;;  %vm536_vm13 = vcmp.ge.f32.partialorder %v459_v46, 0.0  ;;  %v579_v50 = vmul.f32 0.2, %v459_v46 }
 0x134   :  { %v353_v51 = vpop.f32.mrb[26].mxu0  ;;  %v463_v52 = vpop.f32.mrb[26].mxu1 }
 0x135   :  { %v600_v53 = vsel %vm514_vm12, %v349_v44, %v557_v49  ;;  %v622_v54 = vsel %vm536_vm13, %v459_v46, %v579_v50  ;;  %v354_v55 = vadd.f32 %v1273_v48, %v353_v51  ;;  %v816_v56 = vpop.f32.mrb[27].mxu0  ;;  %v464_v57 = vadd.f32 %v1273_v48, %v463_v52  ;;  %v882_v58 = vpop.f32.mrb[27].mxu1 }
 0x136   :  { %644 = vst.msk [vmem:[%s1492_s3 + $0x60] sm:$0xff] %vm631_vm2, %v600_v53  ;;  %666 = vst.msk [vmem:[%s1492_s3 + $0x110] sm:$0xff] %vm631_vm2, %v622_v54  ;;  %vm674_vm13 = vcmask 517120  }
 0x137   :  { %vm515_vm14 = vcmp.ge.f32.partialorder %v354_v55, 0.0  ;;  %v558_v59 = vmul.f32 0.2, %v354_v55  ;;  %vm537_vm15 = vcmp.ge.f32.partialorder %v464_v57, 0.0  ;;  %v580_v60 = vmul.f32 0.2, %v464_v57 }
 0x138   :  { %v358_v61 = vpop.f32.mrb[28].mxu0  ;;  %v468_v62 = vpop.f32.mrb[28].mxu1 }
 0x139   :  { %v601_v63 = vsel %vm515_vm14, %v354_v55, %v558_v59  ;;  %v623_v0 = vsel %vm537_vm15, %v464_v57, %v580_v60  ;;  %v359_v1 = vadd.f32 %v1273_v48, %v358_v61  ;;  %v819_v2 = vpop.f32.mrb[29].mxu0  ;;  %v469_v3 = vadd.f32 %v1273_v48, %v468_v62  ;;  %v885_v4 = vpop.f32.mrb[29].mxu1 }
 0x13a   :  { %645 = vst.msk [vmem:[%s1492_s3 + $0x68] sm:$0xff] %vm631_vm2, %v601_v63  ;;  %667 = vst.msk [vmem:[%s1492_s3 + $0x118] sm:$0xff] %vm631_vm2, %v623_v0 }
 0x13b   :  { %vm516_vm0 = vcmp.ge.f32.partialorder %v359_v1, 0.0  ;;  %v559_v5 = vmul.f32 0.2, %v359_v1  ;;  %vm538_vm1 = vcmp.ge.f32.partialorder %v469_v3, 0.0  ;;  %v581_v6 = vmul.f32 0.2, %v469_v3 }
 0x13c   :  { %v363_v7 = vpop.f32.mrb[30].mxu0  ;;  %v473_v8 = vpop.f32.mrb[30].mxu1 }
 0x13d   :  { %v602_v9 = vsel %vm516_vm0, %v359_v1, %v559_v5  ;;  %v624_v10 = vsel %vm538_vm1, %v469_v3, %v581_v6  ;;  %v364_v11 = vadd.f32 %v1273_v48, %v363_v7  ;;  %v822_v12 = vpop.f32.mrb[31].mxu0  ;;  %v474_v13 = vadd.f32 %v1273_v48, %v473_v8  ;;  %v888_v14 = vpop.f32.mrb[31].mxu1 }
 0x13e   :  { %646 = vst.msk [vmem:[%s1492_s3 + $0x70] sm:$0xff] %vm631_vm2, %v602_v9  ;;  %668 = vst.msk [vmem:[%s1492_s3 + $0x120] sm:$0xff] %vm631_vm2, %v624_v10 }
 0x13f   :  { %vm517_vm3 = vcmp.ge.f32.partialorder %v364_v11, 0.0  ;;  %v560_v15 = vmul.f32 0.2, %v364_v11  ;;  %vm539_vm4 = vcmp.ge.f32.partialorder %v474_v13, 0.0  ;;  %v582_v16 = vmul.f32 0.2, %v474_v13 }
 0x140   :  { %v368_v17 = vpop.f32.mrb[32].mxu0  ;;  %v478_v18 = vpop.f32.mrb[32].mxu1 }
 0x141   :  { %v603_v19 = vsel %vm517_vm3, %v364_v11, %v560_v15  ;;  %v625_v20 = vsel %vm539_vm4, %v474_v13, %v582_v16  ;;  %v369_v21 = vadd.f32 %v1273_v48, %v368_v17  ;;  %v825_v22 = vpop.f32.mrb[33].mxu0  ;;  %v479_v23 = vadd.f32 %v1273_v48, %v478_v18  ;;  %v891_v24 = vpop.f32.mrb[33].mxu1 }
 0x142   :  { %647 = vst.msk [vmem:[%s1492_s3 + $0x78] sm:$0xff] %vm631_vm2, %v603_v19  ;;  %669 = vst.msk [vmem:[%s1492_s3 + $0x128] sm:$0xff] %vm631_vm2, %v625_v20 }
 0x143   :  { %vm518_vm5 = vcmp.ge.f32.partialorder %v369_v21, 0.0  ;;  %v561_v25 = vmul.f32 0.2, %v369_v21  ;;  %vm540_vm6 = vcmp.ge.f32.partialorder %v479_v23, 0.0  ;;  %v583_v26 = vmul.f32 0.2, %v479_v23 }
 0x144   :  { %v373_v27 = vpop.f32.mrb[34].mxu0  ;;  %v483_v28 = vpop.f32.mrb[34].mxu1 }
 0x145   :  { %v604_v29 = vsel %vm518_vm5, %v369_v21, %v561_v25  ;;  %v626_v30 = vsel %vm540_vm6, %v479_v23, %v583_v26  ;;  %v374_v31 = vadd.f32 %v1273_v48, %v373_v27  ;;  %v828_v32 = vpop.f32.mrb[35].mxu0  ;;  %v484_v33 = vadd.f32 %v1273_v48, %v483_v28  ;;  %v894_v34 = vpop.f32.mrb[35].mxu1 }
 0x146   :  { %648 = vst.msk [vmem:[%s1492_s3 + $0x80] sm:$0xff] %vm631_vm2, %v604_v29  ;;  %670 = vst.msk [vmem:[%s1492_s3 + $0x130] sm:$0xff] %vm631_vm2, %v626_v30 }
 0x147   :  { %vm519_vm7 = vcmp.ge.f32.partialorder %v374_v31, 0.0  ;;  %v562_v35 = vmul.f32 0.2, %v374_v31  ;;  %vm541_vm8 = vcmp.ge.f32.partialorder %v484_v33, 0.0  ;;  %v584_v36 = vmul.f32 0.2, %v484_v33 }
 0x148   :  { %v378_v37 = vpop.f32.mrb[36].mxu0  ;;  %v488_v38 = vpop.f32.mrb[36].mxu1 }
 0x149   :  { %v605_v39 = vsel %vm519_vm7, %v374_v31, %v562_v35  ;;  %v627_v40 = vsel %vm541_vm8, %v484_v33, %v584_v36  ;;  %v379_v41 = vadd.f32 %v1273_v48, %v378_v37  ;;  %v831_v42 = vpop.f32.mrb[37].mxu0  ;;  %v489_v43 = vadd.f32 %v1273_v48, %v488_v38  ;;  %v897_v44 = vpop.f32.mrb[37].mxu1 }
 0x14a   :  { %649 = vst.msk [vmem:[%s1492_s3 + $0x88] sm:$0xff] %vm631_vm2, %v605_v39  ;;  %671 = vst.msk [vmem:[%s1492_s3 + $0x138] sm:$0xff] %vm631_vm2, %v627_v40 }
 0x14b   :  { %vm520_vm9 = vcmp.ge.f32.partialorder %v379_v41, 0.0  ;;  %v563_v45 = vmul.f32 0.2, %v379_v41  ;;  %vm542_vm10 = vcmp.ge.f32.partialorder %v489_v43, 0.0  ;;  %v585_v46 = vmul.f32 0.2, %v489_v43 }
 0x14c   :  { %v383_v47 = vpop.f32.mrb[38].mxu0  ;;  %v493_v49 = vpop.f32.mrb[38].mxu1 }
 0x14d   :  { %v606_v50 = vsel %vm520_vm9, %v379_v41, %v563_v45  ;;  %v628_v51 = vsel %vm542_vm10, %v489_v43, %v585_v46  ;;  %v384_v52 = vadd.f32 %v1273_v48, %v383_v47  ;;  %v834_v53 = vpop.f32.mrb[39].mxu0  ;;  %v494_v54 = vadd.f32 %v1273_v48, %v493_v49  ;;  %v900_v55 = vpop.f32.mrb[39].mxu1 }
 0x14e   :  { %650 = vst.msk [vmem:[%s1492_s3 + $0x90] sm:$0xff] %vm631_vm2, %v606_v50  ;;  %672 = vst.msk [vmem:[%s1492_s3 + $0x140] sm:$0xff] %vm631_vm2, %v628_v51 }
 0x14f   :  { %vm521_vm11 = vcmp.ge.f32.partialorder %v384_v52, 0.0  ;;  %v564_v56 = vmul.f32 0.2, %v384_v52  ;;  %vm543_vm12 = vcmp.ge.f32.partialorder %v494_v54, 0.0  ;;  %v586_v57 = vmul.f32 0.2, %v494_v54 }
 0x150   :  { %v388_v58 = vpop.f32.mrb[40].mxu0  ;;  %v498_v59 = vpop.f32.mrb[40].mxu1 }
 0x151   :  { %v607_v60 = vsel %vm521_vm11, %v384_v52, %v564_v56  ;;  %v629_v61 = vsel %vm543_vm12, %v494_v54, %v586_v57  ;;  %v389_v62 = vadd.f32 %v1273_v48, %v388_v58  ;;  %v837_v63 = vpop.f32.mrb[41].mxu0  ;;  %v499_v0 = vadd.f32 %v1273_v48, %v498_v59  ;;  %v903_v1 = vpop.f32.mrb[41].mxu1 }
 0x152   :  { %651 = vst.msk [vmem:[%s1492_s3 + $0x98] sm:$0xff] %vm631_vm2, %v607_v60  ;;  %673 = vst.msk [vmem:[%s1492_s3 + $0x148] sm:$0xff] %vm631_vm2, %v629_v61 }
 0x153   :  { %vm522_vm14 = vcmp.ge.f32.partialorder %v389_v62, 0.0  ;;  %v565_v2 = vmul.f32 0.2, %v389_v62  ;;  %vm544_vm15 = vcmp.ge.f32.partialorder %v499_v0, 0.0  ;;  %v587_v3 = vmul.f32 0.2, %v499_v0 }
 0x154   :  { %v393_v4 = vpop.f32.mrb[42].mxu0 }
 0x155   :  { %v608_v5 = vsel %vm522_vm14, %v389_v62, %v565_v2  ;;  %v630_v6 = vsel %vm544_vm15, %v499_v0, %v587_v3  ;;  %v394_v7 = vadd.f32 %v1273_v48, %v393_v4  ;;  %v840_v8 = vpop.f32.mrb[43].mxu0 }
 0x156   :  { %652 = vst.msk [vmem:[%s1492_s3 + $0xa0] sm:$0xff] %vm631_vm2, %v608_v5 }
 0x157   :  { %675 = vst.msk [vmem:[%s1492_s3 + $0x150] sm:$0x3] %vm674_vm13, %v630_v6  ;;  %vm523_vm0 = vcmp.ge.f32.partialorder %v394_v7, 0.0  ;;  %v566_v9 = vmul.f32 0.2, %v394_v7 }
 0x159   :  { %v609_v10 = vsel %vm523_vm0, %v394_v7, %v566_v9 }
 0x15a   :  { %653 = vst.msk [vmem:[%s1492_s3 + $0xa8] sm:$0xff] %vm631_vm2, %v609_v10 }
 0x15b   :  { %680 = vsyncpa [#allocation3], 1 }
 0x15c   :  { %681 = vsyncpa [#allocation5], 1 }

// kernel: encoder_simclr_forward.4
= control target key start
LH: loop header
LB: loop body
LE: loop exit
PB: predicated region body
PF: predicated region fallthrough
CT: control target
= control target key end

     0   :  { %8 = vsyncpa [#allocation3], 0  ;;  %s1304_s0 = inlined_call_operand.vmem [shape: f32[50,1024], index: 0, kind: input, shape index: {}]   ;;  %s1305_s1 = inlined_call_operand.hbm [shape: f32[1024,128], index: 1, kind: input, shape index: {}]   ;;  %s1306_s2 = inlined_call_operand.hbm [shape: f32[1,128], index: 2, kind: input, shape index: {}]   ;;  %s1307_s3 = inlined_call_operand.vmem [shape: f32[50,128], index: 3, kind: output, shape index: {}]  }
   0x1   :  { %9 = vsyncpa [#allocation5], 0  ;;  %s1058_s12 = smov [#allocation2]   ;;  %s1010_s16 = scalar_lea.hbm %s1305_s1, 16384 }
   0x2   :  { %s17_s13 = sshll.u32 %s1058_s12, 4  ;;  %p1011_p0 = scmp.ne.s32.totalorder %s1305_s1, %s1010_s16  ;;  %s18_s13 = int_to_ptr.vmem [resolvable:$true] %s17_s13 }
   0x3   :  { %p1014_p1 = scmp.lt.u32.totalorder %s1010_s16, %s1305_s1 }
   0x5   :  { %p1016_p2 = pnand %p1014_p1, %p1011_p0 }
   0x7   :  { %1019 = shalt.err (!%p1016_p2)
}
   0x8   :  { %s1020_s21 = scalar_lea.vmem %s18_s13, 16384  ;;  %p1025_p4 = scmp.lt.s32.totalorder %s18_s13, %s18_s13 }
   0x9   :  { %p1021_p3 = scmp.ne.s32.totalorder %s18_s13, %s1020_s21  ;;  %p1026_p5 = scmp.lt.s32.totalorder %s1020_s21, %s1020_s21 }
   0xb   :  { %p1027_p6 = por %p1026_p5, %p1025_p4 }
   0xd   :  { %p1028_p7 = pnand %p1027_p6, %p1021_p3 }
   0xf   :  { %1031 = shalt.err (!%p1028_p7)
}
  0x10   :  { %s1059_s22 = smov 128   ;;  %s1060_s23 = smov 8  }
  0x11   :  { %23 = dma.hbm_to_vmem [thread:$0]  %s1305_s1, 16384, %s18_s13, [#allocation3], %s1059_s22, %s1059_s22, %s1060_s23  }
  0x12   :  { %s1061_s26 = smov [#allocation4]   ;;  %s1032_s30 = scalar_lea.hbm %s1306_s2, 16 }
  0x13   :  { %s30_s27 = sshll.u32 %s1061_s26, 4  ;;  %p1033_p8 = scmp.ne.s32.totalorder %s1306_s2, %s1032_s30  ;;  %s31_s27 = int_to_ptr.vmem [resolvable:$true] %s30_s27 }
  0x14   :  { %p1036_p9 = scmp.lt.u32.totalorder %s1032_s30, %s1306_s2 }
  0x16   :  { %p1038_p10 = pnand %p1036_p9, %p1033_p8 }
  0x18   :  { %1041 = shalt.err (!%p1038_p10)
}
  0x19   :  { %s1042_s8 = scalar_lea.vmem %s31_s27, 16  ;;  %s1046_s1 = scalar_lea.vmem %s31_s27, 32 }
  0x1a   :  { %p1043_p11 = scmp.ne.s32.totalorder %s31_s27, %s1042_s8  ;;  %p1047_p12 = scmp.lt.s32.totalorder %s31_s27, %s31_s27 }
  0x1b   :  { %p1048_p13 = scmp.lt.s32.totalorder %s1046_s1, %s1042_s8 }
  0x1d   :  { %p1049_p0 = por %p1048_p13, %p1047_p12 }
  0x1f   :  { %p1050_p1 = pnand %p1049_p0, %p1043_p11 }
  0x21   :  { %1053 = shalt.err (!%p1050_p1)
}
  0x22   :  { %33 = dma.hbm_to_vmem [thread:$0]  %s1306_s2, 16, %s31_s27, [#allocation5]  }
  0x23   :  { %1054 = dma.done.wait [#allocation3], 16384  }
  0x24   :  { %1055 = vsyncadd [#allocation3], 4294950912 }
  0x25   :  { %1056 = dma.done.wait [#allocation5], 16  }
  0x26   :  { %1057 = vsyncadd [#allocation5], 4294967280  ;;  %v112_v0 = vld [vmem:[#allocation2 + $0x80] sm:$0xff]  ;;  %v113_v1 = vld [vmem:[#allocation2 + $0x88] sm:$0xff] }
  0x27   :  { %v96_v2 = vld [vmem:[#allocation2] sm:$0xff]  ;;  %v878_v3 = vpack.c.bf16 %v113_v1, %v112_v0  ;;  %v97_v4 = vld [vmem:[#allocation2 + $0x8] sm:$0xff]  ;;  %v114_v11 = vld [vmem:[#allocation2 + $0x90] sm:$0xff] }
  0x28   :  { %v144_v5 = vld [vmem:[#allocation2 + $0x180] sm:$0xff]  ;;  %v145_v6 = vld [vmem:[#allocation2 + $0x188] sm:$0xff]  ;;  %v880_v7 = vpack.c.bf16 %v97_v4, %v96_v2  ;;  %v115_v13 = vld [vmem:[#allocation2 + $0x98] sm:$0xff] }
  0x29   :  { %v910_v8 = vpack.c.bf16 %v145_v6, %v144_v5  ;;  %v128_v9 = vld [vmem:[#allocation2 + $0x100] sm:$0xff]  ;;  %v129_v10 = vld [vmem:[#allocation2 + $0x108] sm:$0xff]  ;;  %879 = vmatprep.subr.bf16.mxu0 %v878_v3  ;;  %v98_v14 = vld [vmem:[#allocation2 + $0x10] sm:$0xff]  ;;  %v882_v16 = vpack.c.bf16 %v115_v13, %v114_v11 }
  0x2a   :  { %v912_v12 = vpack.c.bf16 %v129_v10, %v128_v9  ;;  %v99_v15 = vld [vmem:[#allocation2 + $0x18] sm:$0xff]  ;;  %881 = vmatpush3.bf16.msra.mxu0 %v880_v7  ;;  %v146_v18 = vld [vmem:[#allocation2 + $0x190] sm:$0xff]  ;;  %v116_v23 = vld [vmem:[#allocation2 + $0xa0] sm:$0xff] }
  0x2b   :  { %911 = vmatprep.subr.bf16.mxu1 %v910_v8  ;;  %v884_v17 = vpack.c.bf16 %v99_v15, %v98_v14  ;;  %v147_v19 = vld [vmem:[#allocation2 + $0x198] sm:$0xff]  ;;  %v130_v20 = vld [vmem:[#allocation2 + $0x110] sm:$0xff]  ;;  %v117_v24 = vld [vmem:[#allocation2 + $0xa8] sm:$0xff]  ;;  %883 = vmatprep.subr.bf16.mxu0 %v882_v16 }
  0x2c   :  { %913 = vmatpush3.bf16.msra.mxu1 %v912_v12  ;;  %v914_v21 = vpack.c.bf16 %v147_v19, %v146_v18  ;;  %v131_v22 = vld [vmem:[#allocation2 + $0x118] sm:$0xff]  ;;  %v886_v26 = vpack.c.bf16 %v117_v24, %v116_v23  ;;  %v100_v27 = vld [vmem:[#allocation2 + $0x20] sm:$0xff]  ;;  %v101_v28 = vld [vmem:[#allocation2 + $0x28] sm:$0xff] }
  0x2d   :  { %v916_v25 = vpack.c.bf16 %v131_v22, %v130_v20  ;;  %v148_v29 = vld [vmem:[#allocation2 + $0x1a0] sm:$0xff]  ;;  %v149_v30 = vld [vmem:[#allocation2 + $0x1a8] sm:$0xff]  ;;  %v888_v33 = vpack.c.bf16 %v101_v28, %v100_v27  ;;  %v118_v35 = vld [vmem:[#allocation2 + $0xb0] sm:$0xff] }
  0x2e   :  { %915 = vmatprep.subr.bf16.mxu1 %v914_v21  ;;  %v132_v31 = vld [vmem:[#allocation2 + $0x120] sm:$0xff]  ;;  %v133_v32 = vld [vmem:[#allocation2 + $0x128] sm:$0xff]  ;;  %885 = vmatpush3.bf16.msra.mxu0 %v884_v17  ;;  %v918_v34 = vpack.c.bf16 %v149_v30, %v148_v29  ;;  %v119_v36 = vld [vmem:[#allocation2 + $0xb8] sm:$0xff] }
  0x2f   :  { %v102_v37 = vld [vmem:[#allocation2 + $0x30] sm:$0xff]  ;;  %887 = vmatprep.subr.bf16.mxu0 %v886_v26  ;;  %v920_v38 = vpack.c.bf16 %v133_v32, %v132_v31  ;;  %v890_v39 = vpack.c.bf16 %v119_v36, %v118_v35  ;;  %v103_v40 = vld [vmem:[#allocation2 + $0x38] sm:$0xff]  ;;  %v120_v46 = vld [vmem:[#allocation2 + $0xc0] sm:$0xff] }
  0x30   :  { %917 = vmatpush3.bf16.msra.mxu1 %v916_v25  ;;  %v150_v41 = vld [vmem:[#allocation2 + $0x1b0] sm:$0xff]  ;;  %v151_v42 = vld [vmem:[#allocation2 + $0x1b8] sm:$0xff]  ;;  %v121_v47 = vld [vmem:[#allocation2 + $0xc8] sm:$0xff]  ;;  %v892_v48 = vpack.c.bf16 %v103_v40, %v102_v37 }
  0x31   :  { %919 = vmatprep.subr.bf16.mxu1 %v918_v34  ;;  %v922_v43 = vpack.c.bf16 %v151_v42, %v150_v41  ;;  %v134_v44 = vld [vmem:[#allocation2 + $0x130] sm:$0xff]  ;;  %v135_v45 = vld [vmem:[#allocation2 + $0x138] sm:$0xff]  ;;  %v152_v49 = vld [vmem:[#allocation2 + $0x1c0] sm:$0xff]  ;;  %v894_v52 = vpack.c.bf16 %v121_v47, %v120_v46 }
  0x32   :  { %889 = vmatpush3.bf16.msra.mxu0 %v888_v33  ;;  %v153_v50 = vld [vmem:[#allocation2 + $0x1c8] sm:$0xff]  ;;  %v924_v51 = vpack.c.bf16 %v135_v45, %v134_v44  ;;  %v104_v53 = vld [vmem:[#allocation2 + $0x40] sm:$0xff]  ;;  %v122_v58 = vld [vmem:[#allocation2 + $0xd0] sm:$0xff] }
  0x33   :  { %891 = vmatprep.subr.bf16.mxu0 %v890_v39  ;;  %v105_v54 = vld [vmem:[#allocation2 + $0x48] sm:$0xff]  ;;  %v136_v55 = vld [vmem:[#allocation2 + $0x140] sm:$0xff]  ;;  %v926_v56 = vpack.c.bf16 %v153_v50, %v152_v49  ;;  %v123_v59 = vld [vmem:[#allocation2 + $0xd8] sm:$0xff] }
  0x34   :  { %921 = vmatpush3.bf16.msra.mxu1 %v920_v38  ;;  %v137_v57 = vld [vmem:[#allocation2 + $0x148] sm:$0xff]  ;;  %v154_v60 = vld [vmem:[#allocation2 + $0x1d0] sm:$0xff]  ;;  %v155_v61 = vld [vmem:[#allocation2 + $0x1d8] sm:$0xff]  ;;  %v896_v62 = vpack.c.bf16 %v105_v54, %v104_v53  ;;  %v898_v0 = vpack.c.bf16 %v123_v59, %v122_v58 }
  0x35   :  { %923 = vmatprep.subr.bf16.mxu1 %v922_v43  ;;  %v928_v63 = vpack.c.bf16 %v137_v57, %v136_v55  ;;  %v106_v1 = vld [vmem:[#allocation2 + $0x50] sm:$0xff]  ;;  %v107_v2 = vld [vmem:[#allocation2 + $0x58] sm:$0xff]  ;;  %v930_v4 = vpack.c.bf16 %v155_v61, %v154_v60  ;;  %v124_v6 = vld [vmem:[#allocation2 + $0xe0] sm:$0xff] }
  0x36   :  { %893 = vmatpush3.bf16.msra.mxu0 %v892_v48  ;;  %v138_v3 = vld [vmem:[#allocation2 + $0x150] sm:$0xff]  ;;  %v139_v5 = vld [vmem:[#allocation2 + $0x158] sm:$0xff]  ;;  %v125_v7 = vld [vmem:[#allocation2 + $0xe8] sm:$0xff]  ;;  %v900_v10 = vpack.c.bf16 %v107_v2, %v106_v1 }
  0x37   :  { %895 = vmatprep.subr.bf16.mxu0 %v894_v52  ;;  %v156_v8 = vld [vmem:[#allocation2 + $0x1e0] sm:$0xff]  ;;  %v157_v9 = vld [vmem:[#allocation2 + $0x1e8] sm:$0xff]  ;;  %v932_v13 = vpack.c.bf16 %v139_v5, %v138_v3  ;;  %v902_v14 = vpack.c.bf16 %v125_v7, %v124_v6  ;;  %v126_v19 = vld [vmem:[#allocation2 + $0xf0] sm:$0xff] }
  0x38   :  { %925 = vmatpush3.bf16.msra.mxu1 %v924_v51  ;;  %v108_v11 = vld [vmem:[#allocation2 + $0x60] sm:$0xff]  ;;  %v109_v12 = vld [vmem:[#allocation2 + $0x68] sm:$0xff]  ;;  %v934_v18 = vpack.c.bf16 %v157_v9, %v156_v8  ;;  %v127_v20 = vld [vmem:[#allocation2 + $0xf8] sm:$0xff] }
  0x39   :  { %927 = vmatprep.subr.bf16.mxu1 %v926_v56  ;;  %v140_v15 = vld [vmem:[#allocation2 + $0x160] sm:$0xff]  ;;  %v141_v16 = vld [vmem:[#allocation2 + $0x168] sm:$0xff]  ;;  %v43_v21 = vld [vmem:[%s1304_s0 + $0x18] sm:$0xff]  ;;  %v904_v24 = vpack.c.bf16 %v109_v12, %v108_v11  ;;  %v906_v26 = vpack.c.bf16 %v127_v20, %v126_v19 }
  0x3a   :  { %897 = vmatpush3.bf16.msra.mxu0 %v896_v62  ;;  %v41_v17 = vld [vmem:[%s1304_s0 + $0x8] sm:$0xff]  ;;  %v158_v22 = vld [vmem:[#allocation2 + $0x1f0] sm:$0xff]  ;;  %v159_v23 = vld [vmem:[#allocation2 + $0x1f8] sm:$0xff]  ;;  %395 = vmatprep.mubr.f32.mxu1 %v43_v21  ;;  %v936_v25 = vpack.c.bf16 %v141_v16, %v140_v15 }
  0x3b   :  { %899 = vmatprep.subr.bf16.mxu0 %v898_v0  ;;  %295 = vmatprep.mubr.f32.mxu0 %v41_v17  ;;  %v110_v27 = vld [vmem:[#allocation2 + $0x70] sm:$0xff]  ;;  %v111_v28 = vld [vmem:[#allocation2 + $0x78] sm:$0xff]  ;;  %v938_v30 = vpack.c.bf16 %v159_v23, %v158_v22  ;;  %v176_v32 = vld [vmem:[#allocation2 + $0x280] sm:$0xff] }
  0x3c   :  { %929 = vmatpush3.bf16.msra.mxu1 %v928_v63  ;;  %v142_v29 = vld [vmem:[#allocation2 + $0x170] sm:$0xff]  ;;  %v143_v31 = vld [vmem:[#allocation2 + $0x178] sm:$0xff]  ;;  %v177_v33 = vld [vmem:[#allocation2 + $0x288] sm:$0xff]  ;;  %v908_v36 = vpack.c.bf16 %v111_v28, %v110_v27 }
  0x3d   :  { %931 = vmatprep.subr.bf16.mxu1 %v930_v4  ;;  %v208_v34 = vld [vmem:[#allocation2 + $0x380] sm:$0xff]  ;;  %v209_v35 = vld [vmem:[#allocation2 + $0x388] sm:$0xff]  ;;  %v940_v37 = vpack.c.bf16 %v143_v31, %v142_v29  ;;  %v942_v38 = vpack.c.bf16 %v177_v33, %v176_v32  ;;  %v178_v44 = vld [vmem:[#allocation2 + $0x290] sm:$0xff] }
  0x3e   :  { %901 = vmatpush3.bf16.msra.mxu0 %v900_v10  ;;  %v160_v39 = vld [vmem:[#allocation2 + $0x200] sm:$0xff]  ;;  %v161_v40 = vld [vmem:[#allocation2 + $0x208] sm:$0xff]  ;;  %v974_v42 = vpack.c.bf16 %v209_v35, %v208_v34  ;;  %v179_v45 = vld [vmem:[#allocation2 + $0x298] sm:$0xff] }
  0x3f   :  { %903 = vmatprep.subr.bf16.mxu0 %v902_v14  ;;  %v192_v41 = vld [vmem:[#allocation2 + $0x300] sm:$0xff]  ;;  %v193_v43 = vld [vmem:[#allocation2 + $0x308] sm:$0xff]  ;;  %v210_v46 = vld [vmem:[#allocation2 + $0x390] sm:$0xff]  ;;  %v944_v49 = vpack.c.bf16 %v161_v40, %v160_v39  ;;  %v946_v52 = vpack.c.bf16 %v179_v45, %v178_v44 }
  0x40   :  { %933 = vmatpush3.bf16.msra.mxu1 %v932_v13  ;;  %v211_v47 = vld [vmem:[#allocation2 + $0x398] sm:$0xff]  ;;  %v40_v48 = vld [vmem:[%s1304_s0] sm:$0xff]  ;;  %v42_v50 = vld [vmem:[%s1304_s0 + $0x10] sm:$0xff]  ;;  %v976_v51 = vpack.c.bf16 %v193_v43, %v192_v41 }
  0x41   :  { %935 = vmatprep.subr.bf16.mxu1 %v934_v18  ;;  %v162_v53 = vld [vmem:[#allocation2 + $0x210] sm:$0xff]  ;;  %v163_v54 = vld [vmem:[#allocation2 + $0x218] sm:$0xff]  ;;  %v978_v56 = vpack.c.bf16 %v211_v47, %v210_v46  ;;  %v180_v58 = vld [vmem:[#allocation2 + $0x2a0] sm:$0xff] }
  0x42   :  { %905 = vmatpush3.bf16.msra.mxu0 %v904_v24  ;;  %v194_v55 = vld [vmem:[#allocation2 + $0x310] sm:$0xff]  ;;  %v195_v57 = vld [vmem:[#allocation2 + $0x318] sm:$0xff]  ;;  %v181_v59 = vld [vmem:[#allocation2 + $0x2a8] sm:$0xff]  ;;  %v948_v63 = vpack.c.bf16 %v163_v54, %v162_v53 }
  0x43   :  { %907 = vmatprep.subr.bf16.mxu0 %v906_v26  ;;  %v49_v60 = vld [vmem:[%s1304_s0 + $0x48] sm:$0xff]  ;;  %v212_v61 = vld [vmem:[#allocation2 + $0x3a0] sm:$0xff]  ;;  %v51_v1 = vld [vmem:[%s1304_s0 + $0x58] sm:$0xff]  ;;  %v980_v3 = vpack.c.bf16 %v195_v57, %v194_v55  ;;  %v950_v4 = vpack.c.bf16 %v181_v59, %v180_v58 }
  0x44   :  { %937 = vmatpush3.bf16.msra.mxu1 %v936_v25  ;;  %v213_v62 = vld [vmem:[#allocation2 + $0x3a8] sm:$0xff]  ;;  %v48_v0 = vld [vmem:[%s1304_s0 + $0x40] sm:$0xff]  ;;  %v50_v2 = vld [vmem:[%s1304_s0 + $0x50] sm:$0xff] }
  0x45   :  { %939 = vmatprep.subr.bf16.mxu1 %v938_v30  ;;  %v164_v5 = vld [vmem:[#allocation2 + $0x220] sm:$0xff]  ;;  %v165_v6 = vld [vmem:[#allocation2 + $0x228] sm:$0xff]  ;;  %v982_v8 = vpack.c.bf16 %v213_v62, %v212_v61  ;;  %v182_v10 = vld [vmem:[#allocation2 + $0x2b0] sm:$0xff] }
  0x46   :  { %909 = vmatpush3.bf16.msra.mxu0 %v908_v36  ;;  %v196_v7 = vld [vmem:[#allocation2 + $0x320] sm:$0xff]  ;;  %v197_v9 = vld [vmem:[#allocation2 + $0x328] sm:$0xff]  ;;  %v183_v11 = vld [vmem:[#allocation2 + $0x2b8] sm:$0xff]  ;;  %v952_v15 = vpack.c.bf16 %v165_v6, %v164_v5 }
  0x47   :  { %943 = vmatprep.subr.bf16.mxu0 %v942_v38  ;;  %v57_v12 = vld [vmem:[%s1304_s0 + $0x88] sm:$0xff]  ;;  %v214_v13 = vld [vmem:[#allocation2 + $0x3b0] sm:$0xff]  ;;  %v215_v14 = vld [vmem:[#allocation2 + $0x3b8] sm:$0xff]  ;;  %v984_v19 = vpack.c.bf16 %v197_v9, %v196_v7  ;;  %v954_v20 = vpack.c.bf16 %v183_v11, %v182_v10 }
  0x48   :  { %941 = vmatpush3.bf16.msra.mxu1 %v940_v37  ;;  %v56_v16 = vld [vmem:[%s1304_s0 + $0x80] sm:$0xff]  ;;  %v59_v17 = vld [vmem:[%s1304_s0 + $0x98] sm:$0xff]  ;;  %v58_v18 = vld [vmem:[%s1304_s0 + $0x90] sm:$0xff]  ;;  %v986_v24 = vpack.c.bf16 %v215_v14, %v214_v13 }
  0x49   :  { %975 = vmatprep.subr.bf16.mxu1 %v974_v42  ;;  %296 = vmatmul.mubr.f32.vlgmr.msra.gmra.mrb[0].mxu0 %v40_v48  ;;  %v166_v21 = vld [vmem:[#allocation2 + $0x230] sm:$0xff]  ;;  %v167_v22 = vld [vmem:[#allocation2 + $0x238] sm:$0xff]  ;;  %v184_v26 = vld [vmem:[#allocation2 + $0x2c0] sm:$0xff] }
  0x4a   :  { %945 = vmatpush3.bf16.msra.mxu0 %v944_v49  ;;  %300 = vmatprep.mubr.f32.mxu0 %v49_v60  ;;  %v198_v23 = vld [vmem:[#allocation2 + $0x330] sm:$0xff]  ;;  %v199_v25 = vld [vmem:[#allocation2 + $0x338] sm:$0xff]  ;;  %v185_v27 = vld [vmem:[#allocation2 + $0x2c8] sm:$0xff]  ;;  %v956_v31 = vpack.c.bf16 %v167_v22, %v166_v21 }
  0x4b   :  { %396 = vmatmul.mubr.f32.vlgmr.msra.gmra.mrb[0].mxu1 %v42_v50  ;;  %947 = vmatprep.subr.bf16.mxu0 %v946_v52  ;;  %v65_v28 = vld [vmem:[%s1304_s0 + $0xc8] sm:$0xff]  ;;  %v216_v29 = vld [vmem:[#allocation2 + $0x3c0] sm:$0xff]  ;;  %v67_v33 = vld [vmem:[%s1304_s0 + $0xd8] sm:$0xff]  ;;  %v988_v35 = vpack.c.bf16 %v199_v25, %v198_v23  ;;  %v958_v36 = vpack.c.bf16 %v185_v27, %v184_v26 }
  0x4c   :  { %977 = vmatpush3.bf16.msra.mxu1 %v976_v51  ;;  %400 = vmatprep.mubr.f32.mxu1 %v51_v1  ;;  %v217_v30 = vld [vmem:[#allocation2 + $0x3c8] sm:$0xff]  ;;  %v64_v32 = vld [vmem:[%s1304_s0 + $0xc0] sm:$0xff]  ;;  %v66_v34 = vld [vmem:[%s1304_s0 + $0xd0] sm:$0xff] }
  0x4d   :  { %979 = vmatprep.subr.bf16.mxu1 %v978_v56  ;;  %301 = vmatmul.mubr.f32.gmra.mrb[2].mxu0 %v48_v0  ;;  %v168_v37 = vld [vmem:[#allocation2 + $0x240] sm:$0xff]  ;;  %v169_v38 = vld [vmem:[#allocation2 + $0x248] sm:$0xff]  ;;  %v990_v40 = vpack.c.bf16 %v217_v30, %v216_v29  ;;  %v186_v42 = vld [vmem:[#allocation2 + $0x2d0] sm:$0xff] }
  0x4e   :  { %949 = vmatpush3.bf16.msra.mxu0 %v948_v63  ;;  %305 = vmatprep.mubr.f32.mxu0 %v57_v12  ;;  %v200_v39 = vld [vmem:[#allocation2 + $0x340] sm:$0xff]  ;;  %v201_v41 = vld [vmem:[#allocation2 + $0x348] sm:$0xff]  ;;  %v187_v43 = vld [vmem:[#allocation2 + $0x2d8] sm:$0xff]  ;;  %v960_v47 = vpack.c.bf16 %v169_v38, %v168_v37 }
  0x4f   :  { %401 = vmatmul.mubr.f32.gmra.mrb[2].mxu1 %v50_v2  ;;  %951 = vmatprep.subr.bf16.mxu0 %v950_v4  ;;  %v73_v44 = vld [vmem:[%s1304_s0 + $0x108] sm:$0xff]  ;;  %v218_v45 = vld [vmem:[#allocation2 + $0x3d0] sm:$0xff]  ;;  %v219_v46 = vld [vmem:[#allocation2 + $0x3d8] sm:$0xff]  ;;  %v992_v51 = vpack.c.bf16 %v201_v41, %v200_v39  ;;  %v962_v52 = vpack.c.bf16 %v187_v43, %v186_v42 }
  0x50   :  { %981 = vmatpush3.bf16.msra.mxu1 %v980_v3  ;;  %405 = vmatprep.mubr.f32.mxu1 %v59_v17  ;;  %v72_v48 = vld [vmem:[%s1304_s0 + $0x100] sm:$0xff]  ;;  %v75_v49 = vld [vmem:[%s1304_s0 + $0x118] sm:$0xff]  ;;  %v74_v50 = vld [vmem:[%s1304_s0 + $0x110] sm:$0xff]  ;;  %v994_v56 = vpack.c.bf16 %v219_v46, %v218_v45 }
  0x51   :  { %983 = vmatprep.subr.bf16.mxu1 %v982_v8  ;;  %306 = vmatmul.mubr.f32.gmra.mrb[4].mxu0 %v56_v16  ;;  %v170_v53 = vld [vmem:[#allocation2 + $0x250] sm:$0xff]  ;;  %v171_v54 = vld [vmem:[#allocation2 + $0x258] sm:$0xff]  ;;  %v188_v58 = vld [vmem:[#allocation2 + $0x2e0] sm:$0xff] }
  0x52   :  { %953 = vmatpush3.bf16.msra.mxu0 %v952_v15  ;;  %310 = vmatprep.mubr.f32.mxu0 %v65_v28  ;;  %v202_v55 = vld [vmem:[#allocation2 + $0x350] sm:$0xff]  ;;  %v203_v57 = vld [vmem:[#allocation2 + $0x358] sm:$0xff]  ;;  %v189_v59 = vld [vmem:[#allocation2 + $0x2e8] sm:$0xff]  ;;  %v964_v63 = vpack.c.bf16 %v171_v54, %v170_v53 }
  0x53   :  { %406 = vmatmul.mubr.f32.gmra.mrb[4].mxu1 %v58_v18  ;;  %955 = vmatprep.subr.bf16.mxu0 %v954_v20  ;;  %v81_v60 = vld [vmem:[%s1304_s0 + $0x148] sm:$0xff]  ;;  %v220_v61 = vld [vmem:[#allocation2 + $0x3e0] sm:$0xff]  ;;  %v83_v1 = vld [vmem:[%s1304_s0 + $0x158] sm:$0xff]  ;;  %v996_v3 = vpack.c.bf16 %v203_v57, %v202_v55  ;;  %v966_v4 = vpack.c.bf16 %v189_v59, %v188_v58 }
  0x54   :  { %985 = vmatpush3.bf16.msra.mxu1 %v984_v19  ;;  %410 = vmatprep.mubr.f32.mxu1 %v67_v33  ;;  %v221_v62 = vld [vmem:[#allocation2 + $0x3e8] sm:$0xff]  ;;  %v80_v0 = vld [vmem:[%s1304_s0 + $0x140] sm:$0xff]  ;;  %v82_v2 = vld [vmem:[%s1304_s0 + $0x150] sm:$0xff] }
  0x55   :  { %987 = vmatprep.subr.bf16.mxu1 %v986_v24  ;;  %311 = vmatmul.mubr.f32.gmra.mrb[6].mxu0 %v64_v32  ;;  %v172_v5 = vld [vmem:[#allocation2 + $0x260] sm:$0xff]  ;;  %v173_v6 = vld [vmem:[#allocation2 + $0x268] sm:$0xff]  ;;  %v998_v8 = vpack.c.bf16 %v221_v62, %v220_v61  ;;  %v190_v10 = vld [vmem:[#allocation2 + $0x2f0] sm:$0xff] }
  0x56   :  { %957 = vmatpush3.bf16.msra.mxu0 %v956_v31  ;;  %315 = vmatprep.mubr.f32.mxu0 %v73_v44  ;;  %v204_v7 = vld [vmem:[#allocation2 + $0x360] sm:$0xff]  ;;  %v205_v9 = vld [vmem:[#allocation2 + $0x368] sm:$0xff]  ;;  %v191_v11 = vld [vmem:[#allocation2 + $0x2f8] sm:$0xff]  ;;  %v968_v15 = vpack.c.bf16 %v173_v6, %v172_v5 }
  0x57   :  { %411 = vmatmul.mubr.f32.gmra.mrb[6].mxu1 %v66_v34  ;;  %959 = vmatprep.subr.bf16.mxu0 %v958_v36  ;;  %v89_v12 = vld [vmem:[%s1304_s0 + $0x188] sm:$0x3]  ;;  %v222_v13 = vld [vmem:[#allocation2 + $0x3f0] sm:$0xff]  ;;  %v223_v14 = vld [vmem:[#allocation2 + $0x3f8] sm:$0xff]  ;;  %v1000_v18 = vpack.c.bf16 %v205_v9, %v204_v7  ;;  %v970_v19 = vpack.c.bf16 %v191_v11, %v190_v10 }
  0x58   :  { %989 = vmatpush3.bf16.msra.mxu1 %v988_v35  ;;  %415 = vmatprep.mubr.f32.mxu1 %v75_v49  ;;  %v88_v16 = vld [vmem:[%s1304_s0 + $0x180] sm:$0x3]  ;;  %v91_v17 = vld [vmem:[%s1304_s0 + $0x198] sm:$0x3]  ;;  %v90_v20 = vld [vmem:[%s1304_s0 + $0x190] sm:$0x3]  ;;  %v1002_v23 = vpack.c.bf16 %v223_v14, %v222_v13 }
  0x59   :  { %991 = vmatprep.subr.bf16.mxu1 %v990_v40  ;;  %316 = vmatmul.mubr.f32.gmra.mrb[8].mxu0 %v72_v48  ;;  %v174_v21 = vld [vmem:[#allocation2 + $0x270] sm:$0xff]  ;;  %v175_v22 = vld [vmem:[#allocation2 + $0x278] sm:$0xff]  ;;  %v45_v26 = vld [vmem:[%s1304_s0 + $0x28] sm:$0xff] }
  0x5a   :  { %961 = vmatpush3.bf16.msra.mxu0 %v960_v47  ;;  %320 = vmatprep.mubr.f32.mxu0 %v81_v60  ;;  %v206_v24 = vld [vmem:[#allocation2 + $0x370] sm:$0xff]  ;;  %v207_v25 = vld [vmem:[#allocation2 + $0x378] sm:$0xff]  ;;  %v972_v27 = vpack.c.bf16 %v175_v22, %v174_v21  ;;  %v44_v30 = vld [vmem:[%s1304_s0 + $0x20] sm:$0xff] }
  0x5b   :  { %416 = vmatmul.mubr.f32.gmra.mrb[8].mxu1 %v74_v50  ;;  %963 = vmatprep.subr.bf16.mxu0 %v962_v52  ;;  %v47_v28 = vld [vmem:[%s1304_s0 + $0x38] sm:$0xff]  ;;  %v1004_v29 = vpack.c.bf16 %v207_v25, %v206_v24  ;;  %v46_v31 = vld [vmem:[%s1304_s0 + $0x30] sm:$0xff]  ;;  %v53_v32 = vld [vmem:[%s1304_s0 + $0x68] sm:$0xff] }
  0x5c   :  { %993 = vmatpush3.bf16.msra.mxu1 %v992_v51  ;;  %420 = vmatprep.mubr.f32.mxu1 %v83_v1  ;;  %v55_v33 = vld [vmem:[%s1304_s0 + $0x78] sm:$0xff]  ;;  %v52_v34 = vld [vmem:[%s1304_s0 + $0x60] sm:$0xff]  ;;  %v54_v35 = vld [vmem:[%s1304_s0 + $0x70] sm:$0xff] }
  0x5d   :  { %995 = vmatprep.subr.bf16.mxu1 %v994_v56  ;;  %321 = vmatmul.mubr.f32.gmra.mrb[10].mxu0 %v80_v0  ;;  %v61_v36 = vld [vmem:[%s1304_s0 + $0xa8] sm:$0xff]  ;;  %v63_v37 = vld [vmem:[%s1304_s0 + $0xb8] sm:$0xff]  ;;  %v60_v38 = vld [vmem:[%s1304_s0 + $0xa0] sm:$0xff] }
  0x5e   :  { %965 = vmatpush3.bf16.msra.mxu0 %v964_v63  ;;  %325 = vmatprep.mubr.f32.mxu0 %v89_v12  ;;  %v62_v39 = vld [vmem:[%s1304_s0 + $0xb0] sm:$0xff]  ;;  %v69_v40 = vld [vmem:[%s1304_s0 + $0xe8] sm:$0xff]  ;;  %v71_v41 = vld [vmem:[%s1304_s0 + $0xf8] sm:$0xff] }
  0x5f   :  { %421 = vmatmul.mubr.f32.gmra.mrb[10].mxu1 %v82_v2  ;;  %967 = vmatprep.subr.bf16.mxu0 %v966_v4  ;;  %v68_v42 = vld [vmem:[%s1304_s0 + $0xe0] sm:$0xff]  ;;  %v70_v43 = vld [vmem:[%s1304_s0 + $0xf0] sm:$0xff]  ;;  %v77_v44 = vld [vmem:[%s1304_s0 + $0x128] sm:$0xff] }
  0x60   :  { %997 = vmatpush3.bf16.msra.mxu1 %v996_v3  ;;  %425 = vmatprep.mubr.f32.mxu1 %v91_v17  ;;  %v79_v45 = vld [vmem:[%s1304_s0 + $0x138] sm:$0xff]  ;;  %v76_v46 = vld [vmem:[%s1304_s0 + $0x120] sm:$0xff]  ;;  %v78_v47 = vld [vmem:[%s1304_s0 + $0x130] sm:$0xff] }
  0x61   :  { %999 = vmatprep.subr.bf16.mxu1 %v998_v8  ;;  %326 = vmatmul.mubr.f32.gmra.mrb[12].mxu0 %v88_v16  ;;  %v85_v48 = vld [vmem:[%s1304_s0 + $0x168] sm:$0xff]  ;;  %v87_v49 = vld [vmem:[%s1304_s0 + $0x178] sm:$0xff]  ;;  %v84_v50 = vld [vmem:[%s1304_s0 + $0x160] sm:$0xff] }
  0x62   :  { %969 = vmatpush3.bf16.msra.mxu0 %v968_v15  ;;  %495 = vmatprep.mubr.f32.mxu0 %v45_v26  ;;  %v86_v51 = vld [vmem:[%s1304_s0 + $0x170] sm:$0xff]  ;;  %v93_v52 = vld [vmem:[%s1304_s0 + $0x1a8] sm:$0x3]  ;;  %v95_v53 = vld [vmem:[%s1304_s0 + $0x1b8] sm:$0x3] }
  0x63   :  { %426 = vmatmul.mubr.f32.gmra.mrb[12].mxu1 %v90_v20  ;;  %971 = vmatprep.subr.bf16.mxu0 %v970_v19  ;;  %v92_v54 = vld [vmem:[%s1304_s0 + $0x1a0] sm:$0x3]  ;;  %v94_v55 = vld [vmem:[%s1304_s0 + $0x1b0] sm:$0x3] }
  0x64   :  { %1001 = vmatpush3.bf16.msra.mxu1 %v1000_v18  ;;  %595 = vmatprep.mubr.f32.mxu1 %v47_v28  ;;  %v665_v57 = vld [vmem:[#allocation4] ss:$0 sm:$0xff] }
  0x65   :  { %1003 = vmatprep.subr.bf16.mxu1 %v1002_v23 }
  0x66   :  { %973 = vmatpush3.bf16.msra.mxu0 %v972_v27 }
  0x68   :  { %1005 = vmatpush3.bf16.msra.mxu1 %v1004_v29 }
  0x69   :  { %496 = vmatmul.mubr.f32.vlgmr.msra.gmra.mrb[14].mxu0 %v44_v30 }
  0x6a   :  { %500 = vmatprep.mubr.f32.mxu0 %v53_v32 }
  0x6b   :  { %596 = vmatmul.mubr.f32.vlgmr.msra.gmra.mrb[14].mxu1 %v46_v31 }
  0x6c   :  { %600 = vmatprep.mubr.f32.mxu1 %v55_v33 }
  0x6d   :  { %501 = vmatmul.mubr.f32.gmra.mrb[16].mxu0 %v52_v34 }
  0x6e   :  { %505 = vmatprep.mubr.f32.mxu0 %v61_v36 }
  0x6f   :  { %601 = vmatmul.mubr.f32.gmra.mrb[16].mxu1 %v54_v35 }
  0x70   :  { %605 = vmatprep.mubr.f32.mxu1 %v63_v37 }
  0x71   :  { %506 = vmatmul.mubr.f32.gmra.mrb[18].mxu0 %v60_v38 }
  0x72   :  { %510 = vmatprep.mubr.f32.mxu0 %v69_v40 }
  0x73   :  { %606 = vmatmul.mubr.f32.gmra.mrb[18].mxu1 %v62_v39 }
  0x74   :  { %610 = vmatprep.mubr.f32.mxu1 %v71_v41 }
  0x75   :  { %511 = vmatmul.mubr.f32.gmra.mrb[20].mxu0 %v68_v42 }
  0x76   :  { %515 = vmatprep.mubr.f32.mxu0 %v77_v44 }
  0x77   :  { %611 = vmatmul.mubr.f32.gmra.mrb[20].mxu1 %v70_v43 }
  0x78   :  { %615 = vmatprep.mubr.f32.mxu1 %v79_v45 }
  0x79   :  { %516 = vmatmul.mubr.f32.gmra.mrb[22].mxu0 %v76_v46 }
  0x7a   :  { %520 = vmatprep.mubr.f32.mxu0 %v85_v48 }
  0x7b   :  { %616 = vmatmul.mubr.f32.gmra.mrb[22].mxu1 %v78_v47 }
  0x7c   :  { %620 = vmatprep.mubr.f32.mxu1 %v87_v49 }
  0x7d   :  { %521 = vmatmul.mubr.f32.gmra.mrb[24].mxu0 %v84_v50 }
  0x7e   :  { %525 = vmatprep.mubr.f32.mxu0 %v93_v52 }
  0x7f   :  { %621 = vmatmul.mubr.f32.gmra.mrb[24].mxu1 %v86_v51 }
  0x80   :  { %625 = vmatprep.mubr.f32.mxu1 %v95_v53 }
  0x81   :  { %526 = vmatmul.mubr.f32.gmra.mrb[26].mxu0 %v92_v54 }
  0x83   :  { %626 = vmatmul.mubr.f32.gmra.mrb[26].mxu1 %v94_v55 }
 0x11c   :  { %v698_v56 = vpop.f32.mrb[0].mxu0 }
 0x11d   :  { %v699_v58 = vpop.f32.mrb[1].mxu0 }
 0x11e   :  { %v751_v59 = vpop.f32.mrb[0].mxu1  ;;  %v700_v60 = vadd.f32 %v699_v58, %v698_v56 }
 0x11f   :  { %v752_v61 = vpop.f32.mrb[1].mxu1 }
 0x120   :  { %v753_v62 = vadd.f32 %v752_v61, %v751_v59  ;;  %v298_v63 = vadd.f32 %v700_v60, %v665_v57  ;;  %v701_v0 = vpop.f32.mrb[2].mxu0 }
 0x121   :  { %v702_v1 = vpop.f32.mrb[3].mxu0 }
 0x122   :  { %v754_v2 = vpop.f32.mrb[2].mxu1  ;;  %v398_v3 = vadd.f32 %v753_v62, %v298_v63  ;;  %v703_v4 = vadd.f32 %v702_v1, %v701_v0 }
 0x123   :  { %v755_v5 = vpop.f32.mrb[3].mxu1 }
 0x124   :  { %v756_v6 = vadd.f32 %v755_v5, %v754_v2  ;;  %v303_v7 = vadd.f32 %v703_v4, %v665_v57  ;;  %v704_v8 = vpop.f32.mrb[4].mxu0 }
 0x125   :  { %v705_v9 = vpop.f32.mrb[5].mxu0 }
 0x126   :  { %v757_v10 = vpop.f32.mrb[4].mxu1  ;;  %v403_v11 = vadd.f32 %v756_v6, %v303_v7  ;;  %v706_v12 = vadd.f32 %v705_v9, %v704_v8 }
 0x127   :  { %v758_v13 = vpop.f32.mrb[5].mxu1 }
 0x128   :  { %v759_v14 = vadd.f32 %v758_v13, %v757_v10  ;;  %v308_v15 = vadd.f32 %v706_v12, %v665_v57  ;;  %v707_v16 = vpop.f32.mrb[6].mxu0 }
 0x129   :  { %v708_v17 = vpop.f32.mrb[7].mxu0 }
 0x12a   :  { %v760_v18 = vpop.f32.mrb[6].mxu1  ;;  %v408_v19 = vadd.f32 %v759_v14, %v308_v15  ;;  %v709_v20 = vadd.f32 %v708_v17, %v707_v16 }
 0x12b   :  { %v761_v21 = vpop.f32.mrb[7].mxu1 }
 0x12c   :  { %v762_v22 = vadd.f32 %v761_v21, %v760_v18  ;;  %v313_v23 = vadd.f32 %v709_v20, %v665_v57  ;;  %v710_v24 = vpop.f32.mrb[8].mxu0 }
 0x12d   :  { %v711_v25 = vpop.f32.mrb[9].mxu0 }
 0x12e   :  { %v763_v26 = vpop.f32.mrb[8].mxu1  ;;  %v413_v27 = vadd.f32 %v762_v22, %v313_v23  ;;  %v712_v28 = vadd.f32 %v711_v25, %v710_v24 }
 0x12f   :  { %v764_v29 = vpop.f32.mrb[9].mxu1 }
 0x130   :  { %v765_v30 = vadd.f32 %v764_v29, %v763_v26  ;;  %v318_v31 = vadd.f32 %v712_v28, %v665_v57  ;;  %v713_v32 = vpop.f32.mrb[10].mxu0 }
 0x131   :  { %v714_v33 = vpop.f32.mrb[11].mxu0 }
 0x132   :  { %v766_v34 = vpop.f32.mrb[10].mxu1  ;;  %v1274_v35 = vadd.f32 %v765_v30, %v318_v31  ;;  %v715_v36 = vadd.f32 %v714_v33, %v713_v32 }
 0x133   :  { %v767_v37 = vpop.f32.mrb[11].mxu1 }
 0x134   :  { %v768_v38 = vadd.f32 %v767_v37, %v766_v34  ;;  %v323_v39 = vadd.f32 %v715_v36, %v665_v57  ;;  %v716_v40 = vpop.f32.mrb[12].mxu0 }
 0x135   :  { %v717_v41 = vpop.f32.mrb[13].mxu0 }
 0x136   :  { %v769_v42 = vpop.f32.mrb[12].mxu1  ;;  %v1276_v43 = vadd.f32 %v768_v38, %v323_v39  ;;  %v718_v44 = vadd.f32 %v717_v41, %v716_v40 }
 0x137   :  { %v770_v45 = vpop.f32.mrb[13].mxu1 }
 0x138   :  { %v771_v46 = vadd.f32 %v770_v45, %v769_v42  ;;  %v328_v47 = vadd.f32 %v718_v44, %v665_v57 }
 0x13a   :  { %v1278_v48 = vadd.f32 %v771_v46, %v328_v47 }
 0x13c   :  { %v804_v49 = vpop.f32.mrb[14].mxu0 }
 0x13d   :  { %v805_v50 = vpop.f32.mrb[15].mxu0 }
 0x13e   :  { %v857_v51 = vpop.f32.mrb[14].mxu1  ;;  %v806_v52 = vadd.f32 %v805_v50, %v804_v49 }
 0x13f   :  { %v858_v53 = vpop.f32.mrb[15].mxu1 }
 0x140   :  { %v859_v54 = vadd.f32 %v858_v53, %v857_v51  ;;  %v498_v55 = vadd.f32 %v806_v52, %v398_v3  ;;  %v807_v56 = vpop.f32.mrb[16].mxu0 }
 0x141   :  { %v808_v58 = vpop.f32.mrb[17].mxu0 }
 0x142   :  { %v860_v59 = vpop.f32.mrb[16].mxu1  ;;  %v598_v60 = vadd.f32 %v859_v54, %v498_v55  ;;  %v809_v61 = vadd.f32 %v808_v58, %v807_v56 }
 0x143   :  { %v861_v62 = vpop.f32.mrb[17].mxu1 }
 0x144   :  { %v862_v63 = vadd.f32 %v861_v62, %v860_v59  ;;  %vm631_vm0 = vcmp.ge.f32.partialorder %v598_v60, 0.0  ;;  %v638_v0 = vmul.f32 0.2, %v598_v60  ;;  %v503_v1 = vadd.f32 %v809_v61, %v403_v11  ;;  %v810_v57 = vpop.f32.mrb[18].mxu0 }
 0x145   :  { %v811_v2 = vpop.f32.mrb[19].mxu0 }
 0x146   :  { %v863_v4 = vpop.f32.mrb[18].mxu1  ;;  %v645_v5 = vsel %vm631_vm0, %v598_v60, %v638_v0  ;;  %v603_v6 = vadd.f32 %v862_v63, %v503_v1  ;;  %v812_v7 = vadd.f32 %v811_v2, %v810_v57 }
 0x147   :  { %v864_v8 = vpop.f32.mrb[19].mxu1  ;;  %652 = vst [vmem:[%s1307_s3] sm:$0xff] %v645_v5 }
 0x148   :  { %v865_v3 = vadd.f32 %v864_v8, %v863_v4  ;;  %vm632_vm1 = vcmp.ge.f32.partialorder %v603_v6, 0.0  ;;  %v639_v9 = vmul.f32 0.2, %v603_v6  ;;  %v508_v10 = vadd.f32 %v812_v7, %v408_v19  ;;  %v813_v12 = vpop.f32.mrb[20].mxu0 }
 0x149   :  { %v814_v13 = vpop.f32.mrb[21].mxu0 }
 0x14a   :  { %v866_v14 = vpop.f32.mrb[20].mxu1  ;;  %v646_v15 = vsel %vm632_vm1, %v603_v6, %v639_v9  ;;  %v608_v11 = vadd.f32 %v865_v3, %v508_v10  ;;  %v815_v16 = vadd.f32 %v814_v13, %v813_v12 }
 0x14b   :  { %v867_v17 = vpop.f32.mrb[21].mxu1  ;;  %653 = vst [vmem:[%s1307_s3 + $0x8] sm:$0xff] %v646_v15 }
 0x14c   :  { %v868_v18 = vadd.f32 %v867_v17, %v866_v14  ;;  %vm633_vm2 = vcmp.ge.f32.partialorder %v608_v11, 0.0  ;;  %v640_v20 = vmul.f32 0.2, %v608_v11  ;;  %v513_v21 = vadd.f32 %v815_v16, %v413_v27  ;;  %v816_v22 = vpop.f32.mrb[22].mxu0 }
 0x14d   :  { %v817_v23 = vpop.f32.mrb[23].mxu0 }
 0x14e   :  { %v869_v24 = vpop.f32.mrb[22].mxu1  ;;  %v647_v25 = vsel %vm633_vm2, %v608_v11, %v640_v20  ;;  %v613_v19 = vadd.f32 %v868_v18, %v513_v21  ;;  %v818_v26 = vadd.f32 %v817_v23, %v816_v22 }
 0x14f   :  { %v870_v28 = vpop.f32.mrb[23].mxu1  ;;  %654 = vst [vmem:[%s1307_s3 + $0x10] sm:$0xff] %v647_v25 }
 0x150   :  { %v871_v29 = vadd.f32 %v870_v28, %v869_v24  ;;  %vm634_vm3 = vcmp.ge.f32.partialorder %v613_v19, 0.0  ;;  %v641_v30 = vmul.f32 0.2, %v613_v19  ;;  %v518_v31 = vadd.f32 %v818_v26, %v1274_v35  ;;  %v819_v32 = vpop.f32.mrb[24].mxu0 }
 0x151   :  { %v820_v33 = vpop.f32.mrb[25].mxu0 }
 0x152   :  { %v872_v34 = vpop.f32.mrb[24].mxu1  ;;  %v648_v27 = vsel %vm634_vm3, %v613_v19, %v641_v30  ;;  %v618_v36 = vadd.f32 %v871_v29, %v518_v31  ;;  %v821_v37 = vadd.f32 %v820_v33, %v819_v32 }
 0x153   :  { %v873_v38 = vpop.f32.mrb[25].mxu1  ;;  %655 = vst [vmem:[%s1307_s3 + $0x18] sm:$0xff] %v648_v27 }
 0x154   :  { %v874_v39 = vadd.f32 %v873_v38, %v872_v34  ;;  %vm635_vm4 = vcmp.ge.f32.partialorder %v618_v36, 0.0  ;;  %v642_v40 = vmul.f32 0.2, %v618_v36  ;;  %v523_v41 = vadd.f32 %v821_v37, %v1276_v43  ;;  %v822_v42 = vpop.f32.mrb[26].mxu0 }
 0x155   :  { %v823_v44 = vpop.f32.mrb[27].mxu0 }
 0x156   :  { %v875_v45 = vpop.f32.mrb[26].mxu1  ;;  %v649_v35 = vsel %vm635_vm4, %v618_v36, %v642_v40  ;;  %v623_v46 = vadd.f32 %v874_v39, %v523_v41  ;;  %v824_v47 = vadd.f32 %v823_v44, %v822_v42 }
 0x157   :  { %v876_v49 = vpop.f32.mrb[27].mxu1  ;;  %656 = vst [vmem:[%s1307_s3 + $0x20] sm:$0xff] %v649_v35 }
 0x158   :  { %v877_v50 = vadd.f32 %v876_v49, %v875_v45  ;;  %vm636_vm5 = vcmp.ge.f32.partialorder %v623_v46, 0.0  ;;  %v643_v51 = vmul.f32 0.2, %v623_v46  ;;  %v528_v52 = vadd.f32 %v824_v47, %v1278_v48 }
 0x15a   :  { %v650_v53 = vsel %vm636_vm5, %v623_v46, %v643_v51  ;;  %v628_v54 = vadd.f32 %v877_v50, %v528_v52 }
 0x15b   :  { %657 = vst [vmem:[%s1307_s3 + $0x28] sm:$0xff] %v650_v53 }
 0x15c   :  { %vm637_vm6 = vcmp.ge.f32.partialorder %v628_v54, 0.0  ;;  %v644_v43 = vmul.f32 0.2, %v628_v54 }
 0x15e   :  { %v651_v55 = vsel %vm637_vm6, %v628_v54, %v644_v43 }
 0x15f   :  { %658 = vst [vmem:[%s1307_s3 + $0x30] sm:$0x3] %v651_v55 }
 0x160   :  { %663 = vsyncpa [#allocation3], 1 }
 0x161   :  { %664 = vsyncpa [#allocation5], 1 }

// kernel: encoder_simclr_forward.5
= control target key start
LH: loop header
LB: loop body
LE: loop exit
PB: predicated region body
PF: predicated region fallthrough
CT: control target
= control target key end

     0   :  { %9 = vsyncpa [#allocation3], 0  ;;  %s4703_s0 = inlined_call_operand.vmem [shape: f32[2,3200], index: 0, kind: input, shape index: {}]   ;;  %s4704_s1 = inlined_call_operand.hbm [shape: f32[3200,1024], index: 1, kind: input, shape index: {}]   ;;  %s4705_s2 = inlined_call_operand.hbm [shape: f32[1,1024], index: 2, kind: input, shape index: {}]   ;;  %s4706_s3 = inlined_call_operand.hbm [shape: f32[1024,128], index: 3, kind: input, shape index: {}]   ;;  %s4707_s4 = inlined_call_operand.vmem [shape: f32[4,2,128], index: 4, kind: output, shape index: {}]  }
   0x1   :  { %11 = vsyncpa [#allocation3 + $0x1], 0 }
   0x2   :  { %12 = vsyncpa [#allocation5], 0 }
   0x3   :  { %14 = vsyncpa [#allocation5 + $0x1], 0  ;;  %s3537_s15 = smov 0   ;;  %s3539_s16 = smov 0  }
   0x4   :  { %s3541_s17 = smov 0   ;;  %s3543_s18 = smov 0  }
   0x5 LB: > { %s3556_s19 = sadd.s32 4294967295, %s3500_s18   ;;  %s3559_s20 = sadd.s32 1, %s3500_s18   ;;  %s3500_s18 = sphi %s3543_s18, %s4718_s18   ;;  %s3496_s17 = sphi %s3541_s17, %s4717_s17   ;;  %s3492_s16 = sphi %s3539_s16, %s4716_s16   ;;  %s3488_s15 = sphi %s3537_s15, %s4715_s15  }
   0x6   : > { %s45_s21 = ssub.s32 %s3500_s18, %s3559_s20  ;;  %s48_s22 = sadd.s32 1, %s3496_s17 }
   0x7   : > { %p46_p0 = scmp.eq.s32.totalorder %s45_s21, 0  ;;  %p55_p1 = scmp.ne.s32.totalorder %s3496_s17, %s3492_s16 }
   0x8   : > { %p56_p2 = scmp.eq.s32.totalorder %s3500_s18, 0  ;;  %p61_p3 = scmp.ne.s32.totalorder %s3492_s16, %s3488_s15 }
   0x9   : > { %s3569_s23 = scalar_select %p46_p0, %s3496_s17, %s48_s22  }
   0xa   : > { %p57_p4 = por %p56_p2, %p55_p1  ;;  %p62_p5 = scmp.eq.s32.totalorder %s3556_s19, 0 }
   0xb   : > { %p3326_p6 = scmp.lt.s32.totalorder %s3500_s18, 4  ;;  %s3578_s25 = sand.u32 1, %s3496_s17  }
   0xc   : > { %p3573_p7 = por %p62_p5, %p61_p3  ;;  %s3308_s26 = smul.u32 6400, %s3578_s25 }
   0xd   : > { %p3581_p8 = pnand %p3326_p6, %p57_p4  ;;  %s187_s28 = sand.u32 1, %s3500_s18  }
   0xe   : > { %s4709_s24 = scalar_select %p3573_p7, 1, 0 }
   0xf   : > { %s2399_s29 = sshll.u32 %s3578_s25, 1  ;;  %s2413_s30 = sshll.u32 %s3500_s18, 5 }
  0x10   : > { %s3591_s7 = scalar_lea.hbm %s4705_s2, %s2413_s30  ;;  %s191_s8 = scalar_lea.vmem [#allocation4], %s2399_s29 }
  0x11   : > { %s199_s9 = sshll.u32 %s191_s8, 4  ;;  %s2402_s10 = sshll.u32 %s3578_s25, 8  ;;  %s3593_s9 = int_to_ptr.vmem [resolvable:$true] %s199_s9 }
  0x12   : > { %s3596_s11 = scalar_lea.sflag [#allocation5], %s187_s28  ;;  %s3372_s12 = scalar_lea.hbm %s3591_s7, 32 }
  0x13   : > { %p3373_p9 = scmp.ne.s32.totalorder %s3591_s7, %s3372_s12  ;;  %p3602_p10 = pneg %p3581_p8 }
  0x14   : > { %s3377_s21 = scalar_lea.hbm %s4705_s2, 128  ;;  %p3378_p13 = scmp.lt.u32.totalorder %s3591_s7, %s4705_s2 }
  0x15   : > { %p3375_p11 = pnand %p3602_p10, %p3373_p9  ;;  %p3379_p0 = scmp.lt.u32.totalorder %s3377_s21, %s3372_s12 }
  0x16   : > { %p3381_p2 = scmp.lt.u32.totalorder %s3372_s12, %s3591_s7 }
  0x17   : > { %p3376_p12 = pneg %p3375_p11  ;;  %p3380_p1 = por %p3379_p0, %p3378_p13 }
  0x19   : > { %p3382_p3 = por %p3381_p2, %p3380_p1 }
  0x1b   : > { %p3383_p4 = pnand %p3382_p3, %p3376_p12 }
  0x1d   : > { %3386 = shalt.err (!%p3383_p4)
}
  0x1e   : > { %s3387_s28 = scalar_lea.vmem %s3593_s9, 32  ;;  %s3502_s30 = smov [#allocation4]  }
  0x1f   : > { %p3388_p5 = scmp.ne.s32.totalorder %s3593_s9, %s3387_s28  ;;  %s3392_s5 = sshll.u32 %s3502_s30, 4  ;;  %s3393_s5 = int_to_ptr.vmem [resolvable:$false] %s3392_s5 }
  0x20   : > { %s3394_s6 = scalar_lea.vmem %s3393_s5, 64  ;;  %p3395_p11 = scmp.lt.s32.totalorder %s3593_s9, %s3393_s5 }
  0x21   : > { %p3390_p6 = pnand %p3388_p5, %p3602_p10  ;;  %p3396_p7 = scmp.lt.s32.totalorder %s3394_s6, %s3387_s28 }
  0x23   : > { %p3391_p9 = pneg %p3390_p6  ;;  %p3397_p13 = por %p3396_p7, %p3395_p11 }
  0x25   : > { %p3398_p0 = pnand %p3397_p13, %p3391_p9 }
  0x27   : > { %3401 = shalt.err (!%p3398_p0)
}
  0x28   : > { %3322 = dma.hbm_to_vmem [thread:$0]  (!%p3581_p8), %s3591_s7, 32, %s3593_s9, %s3596_s11  }
  0x29   : > { %p2405_p12 = scmp.ge.s32.totalorder %s3500_s18, 1  ;;  %p225_p1 = scmp.lt.s32.totalorder %s3500_s18, 5 }
  0x2a   : > { %s2412_s12 = sshll.u32 %s3500_s18, 8  ;;  %s170_s22 = scalar_lea.vmem [#allocation2], %s3308_s26 }
  0x2b   : > { %p3628_p2 = pnand %p2405_p12, %p225_p1  ;;  %s3636_s21 = scalar_lea.hbm %s4704_s1, %s2412_s12 }
  0x2c   : > { %s177_s29 = sshll.u32 %s170_s22, 4  ;;  %s167_s7 = scalar_lea.sflag [#allocation3], %s3578_s25  ;;  %s3640_s29 = int_to_ptr.vmem [resolvable:$true] %s177_s29 }
  0x2d   : > { %s4712_s8 = scalar_select %p3628_p2, 1, 0 }
  0x2e   : > { %s3402_s9 = scalar_lea.hbm %s3636_s21, 102400  ;;  %s3407_s5 = scalar_lea.hbm %s4704_s1, 409600 }
  0x2f   : > { %p3403_p7 = scmp.ne.s32.totalorder %s3636_s21, %s3402_s9  ;;  %p3408_p5 = scmp.lt.u32.totalorder %s3636_s21, %s4704_s1 }
  0x30   : > { %p3409_p6 = scmp.lt.u32.totalorder %s3407_s5, %s3402_s9  ;;  %p3411_p11 = scmp.lt.u32.totalorder %s3402_s9, %s3636_s21 }
  0x31   : > { %p3405_p3 = pnand %p3403_p7, %p3602_p10 }
  0x32   : > { %p3410_p9 = por %p3409_p6, %p3408_p5 }
  0x33   : > { %p3406_p4 = pneg %p3405_p3 }
  0x34   : > { %p3412_p13 = por %p3411_p11, %p3410_p9 }
  0x36   : > { %p3413_p0 = pnand %p3412_p13, %p3406_p4 }
  0x38   : > { %3416 = shalt.err (!%p3413_p0)
}
  0x39   : > { %s3417_s26 = scalar_lea.vmem %s3640_s29, 102400  ;;  %s3503_s14 = smov [#allocation2]  }
  0x3a   : > { %p3418_p12 = scmp.ne.s32.totalorder %s3640_s29, %s3417_s26  ;;  %s3422_s15 = sshll.u32 %s3503_s14, 4  ;;  %s3423_s15 = int_to_ptr.vmem [resolvable:$false] %s3422_s15 }
  0x3b   : > { %s3424_s22 = scalar_lea.vmem %s3423_s15, 204800  ;;  %p3425_p3 = scmp.lt.s32.totalorder %s3640_s29, %s3423_s15 }
  0x3c   : > { %p3420_p1 = pnand %p3418_p12, %p3602_p10  ;;  %p3426_p2 = scmp.lt.s32.totalorder %s3424_s22, %s3417_s26 }
  0x3e   : > { %p3421_p7 = pneg %p3420_p1  ;;  %p3427_p5 = por %p3426_p2, %p3425_p3 }
  0x40   : > { %p3428_p6 = pnand %p3427_p5, %p3421_p7 }
  0x42   : > { %3431 = shalt.err (!%p3428_p6)
}
  0x43   : > { %s3504_s9 = smov 1024   ;;  %s3505_s28 = smov 256  }
  0x44   : > { %s3506_s30 = smov 16   ;;  %s2414_s5 = sshll.u32 %s3500_s18, 12 }
  0x45   : > { %3319 = dma.hbm_to_vmem [thread:$0]  (!%p3581_p8), %s3636_s21, 102400, %s3640_s29, %s167_s7, %s3504_s9, %s3505_s28, %s3506_s30  }
  0x46   : > { %s3670_s26 = scalar_lea.hbm %s4706_s3, %s2414_s5  ;;  %s210_s14 = scalar_lea.vmem [#allocation6], %s2402_s10 }
  0x47   : > { %s217_s15 = sshll.u32 %s210_s14, 4  ;;  %s3432_s22 = scalar_lea.hbm %s3670_s26, 4096  ;;  %s3674_s15 = int_to_ptr.vmem [resolvable:$true] %s217_s15 }
  0x48   : > { %p3433_p2 = scmp.ne.s32.totalorder %s3670_s26, %s3432_s22  ;;  %s3437_s29 = scalar_lea.hbm %s4706_s3, 16384 }
  0x49   : > { %p3438_p11 = scmp.lt.u32.totalorder %s3670_s26, %s4706_s3  ;;  %p3439_p13 = scmp.lt.u32.totalorder %s3437_s29, %s3432_s22 }
  0x4a   : > { %p3435_p4 = pnand %p3433_p2, %p3602_p10  ;;  %p3441_p12 = scmp.lt.u32.totalorder %s3432_s22, %s3670_s26 }
  0x4b   : > { %p3440_p0 = por %p3439_p13, %p3438_p11 }
  0x4c   : > { %p3436_p9 = pneg %p3435_p4 }
  0x4d   : > { %p3442_p1 = por %p3441_p12, %p3440_p0 }
  0x4f   : > { %p3443_p7 = pnand %p3442_p1, %p3436_p9 }
  0x51   : > { %3446 = shalt.err (!%p3443_p7)
}
  0x52   : > { %s3447_s25 = scalar_lea.vmem %s3674_s15, 4096  ;;  %s3507_s10 = smov [#allocation6]  }
  0x53   : > { %p3448_p3 = scmp.ne.s32.totalorder %s3674_s15, %s3447_s25  ;;  %s3452_s28 = sshll.u32 %s3507_s10, 4  ;;  %s3453_s28 = int_to_ptr.vmem [resolvable:$false] %s3452_s28 }
  0x54   : > { %s3454_s30 = scalar_lea.vmem %s3453_s28, 8192  ;;  %p3455_p2 = scmp.lt.s32.totalorder %s3674_s15, %s3453_s28 }
  0x55   : > { %p3450_p5 = pnand %p3448_p3, %p3602_p10  ;;  %p3456_p4 = scmp.lt.s32.totalorder %s3454_s30, %s3447_s25 }
  0x57   : > { %p3451_p6 = pneg %p3450_p5  ;;  %p3457_p11 = por %p3456_p4, %p3455_p2 }
  0x59   : > { %p3458_p13 = pnand %p3457_p11, %p3451_p6 }
  0x5b   : > { %3461 = shalt.err (!%p3458_p13)
}
  0x5c   : > { %s3508_s5 = smov 128   ;;  %s3509_s6 = smov 8  }
  0x5d   : > { %3325 = dma.hbm_to_vmem [thread:$0]  (!%p3581_p8), %s3670_s26, 4096, %s3674_s15, %s3596_s11, %s3508_s5, %s3508_s5, %s3509_s6  }
  0x5e   : > { %p4713_p10 = scmp.ne.s32.totalorder %s4712_s8, 0 }
  0x5f   : > { %s3701_s13 = sand.u32 (!%p4713_p10), 1, %s3492_s16   ;;  %p4714_p9 = scmp.ne.s32.totalorder (!%p4713_p10), %s4709_s24, 0 }
  0x60   : > { %229 = sbr.rel (%p4713_p10) target bundleno = 963 (0x3c3), region = 36  ;;  %s232_s14 = scalar_lea.sflag (!%p4713_p10), [#allocation3], %s3701_s13 }
  0x61   : > { %s3309_s12 = smul.u32 (!%p4713_p10), 6400, %s3701_s13 }
  0x63   : > { %s3705_s22 = scalar_lea.vmem (!%p4713_p10), [#allocation2], %s3309_s12 }
  0x67   : > { %3479 = dma.done.wait (%p4714_p9), %s232_s14, 102400  }
  0x68   : > { %3481 = vsyncadd (%p4714_p9), %s232_s14, 4294864896  ;;  %s240_s27 = sand.u32 1, %s3556_s19   ;;  %s2406_s11 = sshll.u32 %s3701_s13, 1 }
  0x69   : > { %s241_s8 = scalar_lea.sflag [#allocation5], %s240_s27  ;;  %s3713_s26 = scalar_lea.vmem [#allocation4], %s2406_s11 }
  0x6a   : > { %3483 = dma.done.wait (%p4714_p9), %s241_s8, 4128  }
  0x6b   : > { %3485 = vsyncadd (%p4714_p9), %s241_s8, 4294963168  ;;  %v302_v0 = vld [vmem:[%s3705_s22 + $0x8] sm:$0xff]  ;;  %v304_v1 = vld [vmem:[%s3705_s22 + $0x18] sm:$0xff]  ;;  %s2407_s14 = sshll.u32 %s3701_s13, 8  ;;  %p290_p8 = scmp.lt.s32.totalorder %s3556_s19, 3 }
  0x6c   : > { %v686_v2 = vld [vmem:[%s3705_s22 + $0xc08] sm:$0xff]  ;;  %v2450_v3 = vpack.c.bf16 %v304_v1, %v302_v0  ;;  %v688_v4 = vld [vmem:[%s3705_s22 + $0xc18] sm:$0xff]  ;;  %v301_v5 = vld [vmem:[%s3705_s22] sm:$0xff]  ;;  %s4648_s27 = scalar_lea.vmem [#allocation6], %s2407_s14 }
  0x6d   : > { %v303_v6 = vld [vmem:[%s3705_s22 + $0x10] sm:$0xff]  ;;  %v2834_v7 = vpack.c.bf16 %v688_v4, %v686_v2  ;;  %v685_v9 = vld [vmem:[%s3705_s22 + $0xc00] sm:$0xff]  ;;  %v306_v11 = vld [vmem:[%s3705_s22 + $0x28] sm:$0xff]  ;;  %s4720_s19 = smov (!%p290_p8, %s3556_s19), 3 }
  0x6e   : > { %v2452_v8 = vpack.c.bf16 %v303_v6, %v301_v5  ;;  %v687_v10 = vld [vmem:[%s3705_s22 + $0xc10] sm:$0xff]  ;;  %2451 = vmatprep.subr.bf16.mxu1 %v2450_v3  ;;  %v308_v13 = vld [vmem:[%s3705_s22 + $0x38] sm:$0xff]  ;;  %v690_v14 = vld [vmem:[%s3705_s22 + $0xc28] sm:$0xff]  ;;  %s2408_s13 = sshll.u32 %s4720_s19, 1 }
  0x6f   : > { %v2836_v12 = vpack.c.bf16 %v687_v10, %v685_v9  ;;  %v692_v15 = vld [vmem:[%s3705_s22 + $0xc38] sm:$0xff]  ;;  %2835 = vmatprep.subr.bf16.mxu0 %v2834_v7  ;;  %v2454_v16 = vpack.c.bf16 %v308_v13, %v306_v11  ;;  %v305_v18 = vld [vmem:[%s3705_s22 + $0x20] sm:$0xff]  ;;  %v307_v19 = vld [vmem:[%s3705_s22 + $0x30] sm:$0xff]  ;;  %s293_s8 = scalar_lea.vmem %s4707_s4, %s2408_s13 }
  0x70   : > { %2453 = vmatpush1.bf16.msra.mxu1 %v2452_v8  ;;  %v2838_v17 = vpack.c.bf16 %v692_v15, %v690_v14  ;;  %v689_v20 = vld [vmem:[%s3705_s22 + $0xc20] sm:$0xff]  ;;  %v2456_v21 = vpack.c.bf16 %v307_v19, %v305_v18  ;;  %v691_v22 = vld [vmem:[%s3705_s22 + $0xc30] sm:$0xff]  ;;  %v310_v23 = vld [vmem:[%s3705_s22 + $0x48] sm:$0xff] }
  0x71   : > { %2837 = vmatpush1.bf16.msra.mxu0 %v2836_v12  ;;  %v312_v24 = vld [vmem:[%s3705_s22 + $0x58] sm:$0xff]  ;;  %2455 = vmatprep.subr.bf16.mxu1 %v2454_v16  ;;  %v2840_v25 = vpack.c.bf16 %v691_v22, %v689_v20  ;;  %v694_v27 = vld [vmem:[%s3705_s22 + $0xc48] sm:$0xff]  ;;  %v309_v29 = vld [vmem:[%s3705_s22 + $0x40] sm:$0xff] }
  0x72   : > { %2839 = vmatprep.subr.bf16.mxu0 %v2838_v17  ;;  %v2458_v26 = vpack.c.bf16 %v312_v24, %v310_v23  ;;  %v696_v28 = vld [vmem:[%s3705_s22 + $0xc58] sm:$0xff]  ;;  %v311_v31 = vld [vmem:[%s3705_s22 + $0x50] sm:$0xff]  ;;  %v693_v32 = vld [vmem:[%s3705_s22 + $0xc40] sm:$0xff] }
  0x73   : > { %v2842_v30 = vpack.c.bf16 %v696_v28, %v694_v27  ;;  %v695_v33 = vld [vmem:[%s3705_s22 + $0xc50] sm:$0xff]  ;;  %v2460_v34 = vpack.c.bf16 %v311_v31, %v309_v29  ;;  %v314_v35 = vld [vmem:[%s3705_s22 + $0x68] sm:$0xff]  ;;  %v316_v36 = vld [vmem:[%s3705_s22 + $0x78] sm:$0xff] }
  0x74   : > { %2457 = vmatpush1.bf16.msra.mxu1 %v2456_v21  ;;  %v698_v37 = vld [vmem:[%s3705_s22 + $0xc68] sm:$0xff]  ;;  %v2844_v38 = vpack.c.bf16 %v695_v33, %v693_v32  ;;  %v2462_v39 = vpack.c.bf16 %v316_v36, %v314_v35  ;;  %v700_v40 = vld [vmem:[%s3705_s22 + $0xc78] sm:$0xff]  ;;  %v313_v41 = vld [vmem:[%s3705_s22 + $0x60] sm:$0xff] }
  0x75   : > { %2841 = vmatpush1.bf16.msra.mxu0 %v2840_v25  ;;  %2459 = vmatprep.subr.bf16.mxu1 %v2458_v26  ;;  %v315_v42 = vld [vmem:[%s3705_s22 + $0x70] sm:$0xff]  ;;  %v2846_v43 = vpack.c.bf16 %v700_v40, %v698_v37  ;;  %v697_v44 = vld [vmem:[%s3705_s22 + $0xc60] sm:$0xff]  ;;  %v318_v46 = vld [vmem:[%s3705_s22 + $0x88] sm:$0xff] }
  0x76   : > { %2843 = vmatprep.subr.bf16.mxu0 %v2842_v30  ;;  %v699_v45 = vld [vmem:[%s3705_s22 + $0xc70] sm:$0xff]  ;;  %v320_v47 = vld [vmem:[%s3705_s22 + $0x98] sm:$0xff]  ;;  %v702_v48 = vld [vmem:[%s3705_s22 + $0xc88] sm:$0xff]  ;;  %v2464_v50 = vpack.c.bf16 %v315_v42, %v313_v41 }
  0x77   : > { %v704_v49 = vld [vmem:[%s3705_s22 + $0xc98] sm:$0xff]  ;;  %v2848_v51 = vpack.c.bf16 %v699_v45, %v697_v44  ;;  %v2466_v52 = vpack.c.bf16 %v320_v47, %v318_v46  ;;  %v317_v53 = vld [vmem:[%s3705_s22 + $0x80] sm:$0xff]  ;;  %v319_v54 = vld [vmem:[%s3705_s22 + $0x90] sm:$0xff]  ;;  %v1103_v46 = vlaneseq  ;;  %v3510_v47 = vmov 1983009808  }
  0x78   : > { %2461 = vmatpush1.bf16.msra.mxu1 %v2460_v34  ;;  %v701_v55 = vld [vmem:[%s3705_s22 + $0xc80] sm:$0xff]  ;;  %v2850_v56 = vpack.c.bf16 %v704_v49, %v702_v48  ;;  %v703_v57 = vld [vmem:[%s3705_s22 + $0xc90] sm:$0xff]  ;;  %v322_v58 = vld [vmem:[%s3705_s22 + $0xa8] sm:$0xff]  ;;  %v2468_v62 = vpack.c.bf16 %v319_v54, %v317_v53  ;;  %v1122_v48 = vunpack.c.l.s4 %v3510_v47 }
  0x79   : > { %2845 = vmatpush1.bf16.msra.mxu0 %v2844_v38  ;;  %2463 = vmatprep.subr.bf16.mxu1 %v2462_v39  ;;  %v324_v59 = vld [vmem:[%s3705_s22 + $0xb8] sm:$0xff]  ;;  %v706_v60 = vld [vmem:[%s3705_s22 + $0xca8] sm:$0xff]  ;;  %v2852_v63 = vpack.c.bf16 %v703_v57, %v701_v55  ;;  %v321_v1 = vld [vmem:[%s3705_s22 + $0xa0] sm:$0xff] }
  0x7a   : > { %2847 = vmatprep.subr.bf16.mxu0 %v2846_v43  ;;  %v708_v61 = vld [vmem:[%s3705_s22 + $0xcb8] sm:$0xff]  ;;  %v2470_v0 = vpack.c.bf16 %v324_v59, %v322_v58  ;;  %v323_v2 = vld [vmem:[%s3705_s22 + $0xb0] sm:$0xff]  ;;  %v705_v3 = vld [vmem:[%s3705_s22 + $0xca0] sm:$0xff] }
  0x7b   : > { %v2854_v4 = vpack.c.bf16 %v708_v61, %v706_v60  ;;  %v707_v5 = vld [vmem:[%s3705_s22 + $0xcb0] sm:$0xff]  ;;  %v326_v6 = vld [vmem:[%s3705_s22 + $0xc8] sm:$0xff]  ;;  %v328_v7 = vld [vmem:[%s3705_s22 + $0xd8] sm:$0xff]  ;;  %v2472_v10 = vpack.c.bf16 %v323_v2, %v321_v1  ;;  %v3803_v61 = vshrl.u32 %v1103_v46, 7 }
  0x7c   : > { %2465 = vmatpush1.bf16.msra.mxu1 %v2464_v50  ;;  %v710_v8 = vld [vmem:[%s3705_s22 + $0xcc8] sm:$0xff]  ;;  %v712_v9 = vld [vmem:[%s3705_s22 + $0xcd8] sm:$0xff]  ;;  %v2856_v11 = vpack.c.bf16 %v707_v5, %v705_v3  ;;  %v2474_v12 = vpack.c.bf16 %v328_v7, %v326_v6  ;;  %v325_v13 = vld [vmem:[%s3705_s22 + $0xc0] sm:$0xff] }
  0x7d   : > { %2849 = vmatpush1.bf16.msra.mxu0 %v2848_v51  ;;  %2467 = vmatprep.subr.bf16.mxu1 %v2466_v52  ;;  %v327_v14 = vld [vmem:[%s3705_s22 + $0xd0] sm:$0xff]  ;;  %v709_v15 = vld [vmem:[%s3705_s22 + $0xcc0] sm:$0xff]  ;;  %v2858_v16 = vpack.c.bf16 %v712_v9, %v710_v8  ;;  %v330_v18 = vld [vmem:[%s3705_s22 + $0xe8] sm:$0xff] }
  0x7e   : > { %2851 = vmatprep.subr.bf16.mxu0 %v2850_v56  ;;  %v711_v17 = vld [vmem:[%s3705_s22 + $0xcd0] sm:$0xff]  ;;  %v332_v19 = vld [vmem:[%s3705_s22 + $0xf8] sm:$0xff]  ;;  %v714_v20 = vld [vmem:[%s3705_s22 + $0xce8] sm:$0xff]  ;;  %v2476_v22 = vpack.c.bf16 %v327_v14, %v325_v13 }
  0x7f   : > { %v716_v21 = vld [vmem:[%s3705_s22 + $0xcf8] sm:$0xff]  ;;  %v2860_v23 = vpack.c.bf16 %v711_v17, %v709_v15  ;;  %v2478_v24 = vpack.c.bf16 %v332_v19, %v330_v18  ;;  %v329_v25 = vld [vmem:[%s3705_s22 + $0xe0] sm:$0xff]  ;;  %v331_v26 = vld [vmem:[%s3705_s22 + $0xf0] sm:$0xff] }
  0x80   : > { %2469 = vmatpush1.bf16.msra.mxu1 %v2468_v62  ;;  %v713_v27 = vld [vmem:[%s3705_s22 + $0xce0] sm:$0xff]  ;;  %v2862_v28 = vpack.c.bf16 %v716_v21, %v714_v20  ;;  %v715_v29 = vld [vmem:[%s3705_s22 + $0xcf0] sm:$0xff]  ;;  %v334_v30 = vld [vmem:[%s3705_s22 + $0x108] sm:$0xff]  ;;  %v2480_v34 = vpack.c.bf16 %v331_v26, %v329_v25  ;;  %v1123_v62 = vunpack.c.0.s8 %v1122_v48 }
  0x81   : > { %2853 = vmatpush1.bf16.msra.mxu0 %v2852_v63  ;;  %2471 = vmatprep.subr.bf16.mxu1 %v2470_v0  ;;  %v336_v31 = vld [vmem:[%s3705_s22 + $0x118] sm:$0xff]  ;;  %v718_v32 = vld [vmem:[%s3705_s22 + $0xd08] sm:$0xff]  ;;  %v2864_v35 = vpack.c.bf16 %v715_v29, %v713_v27  ;;  %v333_v37 = vld [vmem:[%s3705_s22 + $0x100] sm:$0xff] }
  0x82   : > { %2855 = vmatprep.subr.bf16.mxu0 %v2854_v4  ;;  %v720_v33 = vld [vmem:[%s3705_s22 + $0xd18] sm:$0xff]  ;;  %v2482_v36 = vpack.c.bf16 %v336_v31, %v334_v30  ;;  %v335_v38 = vld [vmem:[%s3705_s22 + $0x110] sm:$0xff]  ;;  %v717_v39 = vld [vmem:[%s3705_s22 + $0xd00] sm:$0xff] }
  0x83   : > { %v2866_v40 = vpack.c.bf16 %v720_v33, %v718_v32  ;;  %v719_v41 = vld [vmem:[%s3705_s22 + $0xd10] sm:$0xff]  ;;  %v338_v42 = vld [vmem:[%s3705_s22 + $0x128] sm:$0xff]  ;;  %v340_v43 = vld [vmem:[%s3705_s22 + $0x138] sm:$0xff]  ;;  %v2484_v49 = vpack.c.bf16 %v335_v38, %v333_v37 }
  0x84   : > { %2473 = vmatpush1.bf16.msra.mxu1 %v2472_v10  ;;  %v722_v44 = vld [vmem:[%s3705_s22 + $0xd28] sm:$0xff]  ;;  %v724_v45 = vld [vmem:[%s3705_s22 + $0xd38] sm:$0xff]  ;;  %v2868_v50 = vpack.c.bf16 %v719_v41, %v717_v39  ;;  %v2486_v51 = vpack.c.bf16 %v340_v43, %v338_v42  ;;  %v337_v52 = vld [vmem:[%s3705_s22 + $0x120] sm:$0xff] }
  0x85   : > { %2857 = vmatpush1.bf16.msra.mxu0 %v2856_v11  ;;  %2475 = vmatprep.subr.bf16.mxu1 %v2474_v12  ;;  %v339_v53 = vld [vmem:[%s3705_s22 + $0x130] sm:$0xff]  ;;  %v721_v54 = vld [vmem:[%s3705_s22 + $0xd20] sm:$0xff]  ;;  %v2870_v55 = vpack.c.bf16 %v724_v45, %v722_v44  ;;  %v342_v57 = vld [vmem:[%s3705_s22 + $0x148] sm:$0xff]  ;;  %v3814_v11 = vsub.s32 %v1123_v62, %v3803_v61 }
  0x86   : > { %2859 = vmatprep.subr.bf16.mxu0 %v2858_v16  ;;  %v723_v56 = vld [vmem:[%s3705_s22 + $0xd30] sm:$0xff]  ;;  %v344_v58 = vld [vmem:[%s3705_s22 + $0x158] sm:$0xff]  ;;  %v726_v59 = vld [vmem:[%s3705_s22 + $0xd48] sm:$0xff]  ;;  %v2488_v63 = vpack.c.bf16 %v339_v53, %v337_v52 }
  0x87   : > { %v728_v60 = vld [vmem:[%s3705_s22 + $0xd58] sm:$0xff]  ;;  %v2872_v0 = vpack.c.bf16 %v723_v56, %v721_v54  ;;  %v2490_v1 = vpack.c.bf16 %v344_v58, %v342_v57  ;;  %v341_v2 = vld [vmem:[%s3705_s22 + $0x140] sm:$0xff]  ;;  %v343_v3 = vld [vmem:[%s3705_s22 + $0x150] sm:$0xff] }
  0x88   : > { %2477 = vmatpush1.bf16.msra.mxu1 %v2476_v22  ;;  %v725_v4 = vld [vmem:[%s3705_s22 + $0xd40] sm:$0xff]  ;;  %v2874_v5 = vpack.c.bf16 %v728_v60, %v726_v59  ;;  %v727_v6 = vld [vmem:[%s3705_s22 + $0xd50] sm:$0xff]  ;;  %v346_v7 = vld [vmem:[%s3705_s22 + $0x168] sm:$0xff]  ;;  %v2492_v12 = vpack.c.bf16 %v343_v3, %v341_v2 }
  0x89   : > { %2861 = vmatpush1.bf16.msra.mxu0 %v2860_v23  ;;  %2479 = vmatprep.subr.bf16.mxu1 %v2478_v24  ;;  %v348_v8 = vld [vmem:[%s3705_s22 + $0x178] sm:$0xff]  ;;  %v730_v9 = vld [vmem:[%s3705_s22 + $0xd68] sm:$0xff]  ;;  %v345_v13 = vld [vmem:[%s3705_s22 + $0x160] sm:$0xff]  ;;  %v2876_v14 = vpack.c.bf16 %v727_v6, %v725_v4 }
  0x8a   : > { %2863 = vmatprep.subr.bf16.mxu0 %v2862_v28  ;;  %v732_v10 = vld [vmem:[%s3705_s22 + $0xd78] sm:$0xff]  ;;  %v2494_v15 = vpack.c.bf16 %v348_v8, %v346_v7  ;;  %v347_v16 = vld [vmem:[%s3705_s22 + $0x170] sm:$0xff]  ;;  %v729_v17 = vld [vmem:[%s3705_s22 + $0xd60] sm:$0xff] }
  0x8b   : > { %v731_v18 = vld [vmem:[%s3705_s22 + $0xd70] sm:$0xff]  ;;  %v2878_v19 = vpack.c.bf16 %v732_v10, %v730_v9  ;;  %v350_v20 = vld [vmem:[%s3705_s22 + $0x188] sm:$0xff]  ;;  %v352_v21 = vld [vmem:[%s3705_s22 + $0x198] sm:$0xff]  ;;  %v2496_v27 = vpack.c.bf16 %v347_v16, %v345_v13 }
  0x8c   : > { %2481 = vmatpush1.bf16.msra.mxu1 %v2480_v34  ;;  %v3825_v22 = vld [vmem:[%s4703_s0] sm:$0xff]  ;;  %v734_v23 = vld [vmem:[%s3705_s22 + $0xd88] sm:$0xff]  ;;  %v736_v24 = vld [vmem:[%s3705_s22 + $0xd98] sm:$0xff]  ;;  %v2880_v29 = vpack.c.bf16 %v731_v18, %v729_v17  ;;  %v2498_v30 = vpack.c.bf16 %v352_v21, %v350_v20 }
  0x8d   : > { %2865 = vmatpush1.bf16.msra.mxu0 %v2864_v35  ;;  %2483 = vmatprep.subr.bf16.mxu1 %v2482_v36  ;;  %v3831_v25 = vrot.slane %v3825_v22, %v3814_v11  ;;  %v3836_v26 = vld [vmem:[%s4703_s0 + $0x18] sm:$0xff]  ;;  %v349_v31 = vld [vmem:[%s3705_s22 + $0x180] sm:$0xff]  ;;  %v351_v32 = vld [vmem:[%s3705_s22 + $0x190] sm:$0xff]  ;;  %v2882_v35 = vpack.c.bf16 %v736_v24, %v734_v23 }
  0x8e   : > { %2867 = vmatprep.subr.bf16.mxu0 %v2866_v40  ;;  %v3840_v28 = vrot.slane %v3836_v26, %v3814_v11  ;;  %v733_v33 = vld [vmem:[%s3705_s22 + $0xd80] sm:$0xff]  ;;  %v735_v36 = vld [vmem:[%s3705_s22 + $0xd90] sm:$0xff]  ;;  %v354_v37 = vld [vmem:[%s3705_s22 + $0x1a8] sm:$0xff]  ;;  %v2500_v42 = vpack.c.bf16 %v351_v32, %v349_v31 }
  0x8f   : > { %v1135_v34 = vcombine.high %v3831_v25, %v3831_v25  ;;  %v356_v38 = vld [vmem:[%s3705_s22 + $0x1b8] sm:$0xff]  ;;  %v738_v40 = vld [vmem:[%s3705_s22 + $0xda8] sm:$0xff]  ;;  %v2884_v43 = vpack.c.bf16 %v735_v36, %v733_v33  ;;  %v353_v45 = vld [vmem:[%s3705_s22 + $0x1a0] sm:$0xff] }
  0x90   : > { %2485 = vmatpush1.bf16.msra.mxu1 %v2484_v49  ;;  %v1186_v39 = vcombine.high %v3840_v28, %v3840_v28  ;;  %v740_v41 = vld [vmem:[%s3705_s22 + $0xdb8] sm:$0xff]  ;;  %v2502_v44 = vpack.c.bf16 %v356_v38, %v354_v37  ;;  %v355_v46 = vld [vmem:[%s3705_s22 + $0x1b0] sm:$0xff]  ;;  %v737_v47 = vld [vmem:[%s3705_s22 + $0xda0] sm:$0xff] }
  0x91   : > { %2869 = vmatpush1.bf16.msra.mxu0 %v2868_v50  ;;  %2487 = vmatprep.subr.bf16.mxu1 %v2486_v51  ;;  %v2886_v48 = vpack.c.bf16 %v740_v41, %v738_v40  ;;  %v739_v49 = vld [vmem:[%s3705_s22 + $0xdb0] sm:$0xff]  ;;  %v358_v50 = vld [vmem:[%s3705_s22 + $0x1c8] sm:$0xff]  ;;  %v360_v51 = vld [vmem:[%s3705_s22 + $0x1d8] sm:$0xff]  ;;  %v2504_v54 = vpack.c.bf16 %v355_v46, %v353_v45 }
  0x92   : > { %2871 = vmatprep.subr.bf16.mxu0 %v2870_v55  ;;  %1318 = vmatprep.mubr.f32.mxu1 %v1135_v34  ;;  %v742_v52 = vld [vmem:[%s3705_s22 + $0xdc8] sm:$0xff]  ;;  %v744_v53 = vld [vmem:[%s3705_s22 + $0xdd8] sm:$0xff]  ;;  %v2888_v55 = vpack.c.bf16 %v739_v49, %v737_v47  ;;  %v2506_v56 = vpack.c.bf16 %v360_v51, %v358_v50  ;;  %v357_v57 = vld [vmem:[%s3705_s22 + $0x1c0] sm:$0xff] }
  0x93   : > { %1744 = vmatprep.mubr.f32.mxu0 %v1186_v39  ;;  %v359_v58 = vld [vmem:[%s3705_s22 + $0x1d0] sm:$0xff]  ;;  %v741_v59 = vld [vmem:[%s3705_s22 + $0xdc0] sm:$0xff]  ;;  %v2890_v60 = vpack.c.bf16 %v744_v53, %v742_v52  ;;  %v748_v2 = vld [vmem:[%s3705_s22 + $0xdf8] sm:$0xff] }
  0x94   : > { %2489 = vmatpush1.bf16.msra.mxu1 %v2488_v63  ;;  %v743_v62 = vld [vmem:[%s3705_s22 + $0xdd0] sm:$0xff]  ;;  %v362_v63 = vld [vmem:[%s3705_s22 + $0x1e8] sm:$0xff]  ;;  %v2508_v3 = vpack.c.bf16 %v359_v58, %v357_v57  ;;  %v361_v6 = vld [vmem:[%s3705_s22 + $0x1e0] sm:$0xff] }
  0x95   : > { %2873 = vmatpush1.bf16.msra.mxu0 %v2872_v0  ;;  %2491 = vmatprep.subr.bf16.mxu1 %v2490_v1  ;;  %v364_v0 = vld [vmem:[%s3705_s22 + $0x1f8] sm:$0xff]  ;;  %v746_v1 = vld [vmem:[%s3705_s22 + $0xde8] sm:$0xff]  ;;  %v2892_v4 = vpack.c.bf16 %v743_v62, %v741_v59  ;;  %v363_v7 = vld [vmem:[%s3705_s22 + $0x1f0] sm:$0xff] }
  0x96   : > { %2875 = vmatprep.subr.bf16.mxu0 %v2874_v5  ;;  %v2510_v5 = vpack.c.bf16 %v364_v0, %v362_v63  ;;  %v745_v8 = vld [vmem:[%s3705_s22 + $0xde0] sm:$0xff]  ;;  %v2894_v9 = vpack.c.bf16 %v748_v2, %v746_v1  ;;  %v747_v10 = vld [vmem:[%s3705_s22 + $0xdf0] sm:$0xff]  ;;  %v366_v13 = vld [vmem:[%s3705_s22 + $0x208] sm:$0xff]  ;;  %v2512_v18 = vpack.c.bf16 %v363_v7, %v361_v6 }
  0x97   : > { %v750_v16 = vld [vmem:[%s3705_s22 + $0xe08] sm:$0xff]  ;;  %v752_v17 = vld [vmem:[%s3705_s22 + $0xe18] sm:$0xff]  ;;  %v365_v21 = vld [vmem:[%s3705_s22 + $0x200] sm:$0xff] }
  0x98   : > { %2493 = vmatpush1.bf16.msra.mxu1 %v2492_v12  ;;  %v1120_v12 = vcombine.high %v3825_v22, %v3825_v22  ;;  %v367_v22 = vld [vmem:[%s3705_s22 + $0x210] sm:$0xff]  ;;  %v749_v23 = vld [vmem:[%s3705_s22 + $0xe00] sm:$0xff]  ;;  %v2898_v24 = vpack.c.bf16 %v752_v17, %v750_v16  ;;  %v754_v31 = vld [vmem:[%s3705_s22 + $0xe28] sm:$0xff] }
  0x99   : > { %2877 = vmatpush1.bf16.msra.mxu0 %v2876_v14  ;;  %2495 = vmatprep.subr.bf16.mxu1 %v2494_v15  ;;  %v368_v14 = vld [vmem:[%s3705_s22 + $0x218] sm:$0xff]  ;;  %v1171_v15 = vcombine.high %v3836_v26, %v3836_v26  ;;  %v751_v26 = vld [vmem:[%s3705_s22 + $0xe10] sm:$0xff]  ;;  %v2516_v34 = vpack.c.bf16 %v367_v22, %v365_v21  ;;  %v369_v37 = vld [vmem:[%s3705_s22 + $0x220] sm:$0xff] }
  0x9a   : > { %2879 = vmatprep.subr.bf16.mxu0 %v2878_v19  ;;  %v2896_v19 = vpack.c.bf16 %v747_v10, %v745_v8  ;;  %v2514_v20 = vpack.c.bf16 %v368_v14, %v366_v13  ;;  %v756_v32 = vld [vmem:[%s3705_s22 + $0xe38] sm:$0xff]  ;;  %v371_v38 = vld [vmem:[%s3705_s22 + $0x230] sm:$0xff]  ;;  %v753_v39 = vld [vmem:[%s3705_s22 + $0xe20] sm:$0xff] }
  0x9b   : > { %v3894_v33 = vrot.slane %v1171_v15, %v3814_v11  ;;  %v2902_v40 = vpack.c.bf16 %v756_v32, %v754_v31  ;;  %v755_v41 = vld [vmem:[%s3705_s22 + $0xe30] sm:$0xff]  ;;  %v758_v45 = vld [vmem:[%s3705_s22 + $0xe48] sm:$0xff]  ;;  %v760_v46 = vld [vmem:[%s3705_s22 + $0xe58] sm:$0xff] }
  0x9c   : > { %2497 = vmatpush1.bf16.msra.mxu1 %v2496_v27  ;;  %v370_v27 = vld [vmem:[%s3705_s22 + $0x228] sm:$0xff]  ;;  %v2904_v49 = vpack.c.bf16 %v755_v41, %v753_v39  ;;  %v373_v51 = vld [vmem:[%s3705_s22 + $0x240] sm:$0xff]  ;;  %v2906_v53 = vpack.c.bf16 %v760_v46, %v758_v45  ;;  %v764_v57 = vld [vmem:[%s3705_s22 + $0xe78] sm:$0xff] }
  0x9d   : > { %2881 = vmatpush1.bf16.msra.mxu0 %v2880_v29  ;;  %2499 = vmatprep.subr.bf16.mxu1 %v2498_v30  ;;  %v372_v29 = vld [vmem:[%s3705_s22 + $0x238] sm:$0xff]  ;;  %v3889_v30 = vrot.slane %v1120_v12, %v3814_v11  ;;  %v1187_v47 = vcombine.high %v3894_v33, %v3894_v33  ;;  %v757_v52 = vld [vmem:[%s3705_s22 + $0xe40] sm:$0xff]  ;;  %v379_v63 = vld [vmem:[%s3705_s22 + $0x270] sm:$0xff] }
  0x9e   : > { %2883 = vmatprep.subr.bf16.mxu0 %v2882_v35  ;;  %v2900_v35 = vpack.c.bf16 %v751_v26, %v749_v23  ;;  %v2518_v36 = vpack.c.bf16 %v372_v29, %v370_v27  ;;  %v377_v62 = vld [vmem:[%s3705_s22 + $0x260] sm:$0xff]  ;;  %v763_v2 = vld [vmem:[%s3705_s22 + $0xe70] sm:$0xff]  ;;  %v768_v6 = vld [vmem:[%s3705_s22 + $0xe98] sm:$0xff] }
  0x9f   : > { %v761_v0 = vld [vmem:[%s3705_s22 + $0xe60] sm:$0xff]  ;;  %v2528_v7 = vpack.c.bf16 %v379_v63, %v377_v62  ;;  %v383_v12 = vld [vmem:[%s3705_s22 + $0x290] sm:$0xff]  ;;  %v386_v16 = vld [vmem:[%s3705_s22 + $0x2a8] sm:$0xff] }
  0xa0   : > { %2501 = vmatpush1.bf16.msra.mxu1 %v2500_v42  ;;  %v374_v42 = vld [vmem:[%s3705_s22 + $0x248] sm:$0xff]  ;;  %v2912_v8 = vpack.c.bf16 %v763_v2, %v761_v0  ;;  %v381_v10 = vld [vmem:[%s3705_s22 + $0x280] sm:$0xff]  ;;  %v767_v15 = vld [vmem:[%s3705_s22 + $0xe90] sm:$0xff] }
  0xa1   : > { %2885 = vmatpush1.bf16.msra.mxu0 %v2884_v43  ;;  %2503 = vmatprep.subr.bf16.mxu1 %v2502_v44  ;;  %v376_v43 = vld [vmem:[%s3705_s22 + $0x258] sm:$0xff]  ;;  %v1136_v44 = vcombine.high %v3889_v30, %v3889_v30  ;;  %v765_v13 = vld [vmem:[%s3705_s22 + $0xe80] sm:$0xff]  ;;  %v771_v29 = vld [vmem:[%s3705_s22 + $0xeb0] sm:$0xff] }
  0xa2   : > { %2887 = vmatprep.subr.bf16.mxu0 %v2886_v48  ;;  %v2520_v48 = vpack.c.bf16 %v371_v38, %v369_v37  ;;  %v2522_v50 = vpack.c.bf16 %v376_v43, %v374_v42  ;;  %v388_v17 = vld [vmem:[%s3705_s22 + $0x2b8] sm:$0xff]  ;;  %v2916_v21 = vpack.c.bf16 %v767_v15, %v765_v13  ;;  %v385_v23 = vld [vmem:[%s3705_s22 + $0x2a0] sm:$0xff]  ;;  %v390_v31 = vld [vmem:[%s3705_s22 + $0x2c8] sm:$0xff] }
  0xa3   : > { %v2534_v22 = vpack.c.bf16 %v388_v17, %v386_v16  ;;  %v769_v26 = vld [vmem:[%s3705_s22 + $0xea0] sm:$0xff]  ;;  %v392_v32 = vld [vmem:[%s3705_s22 + $0x2d8] sm:$0xff]  ;;  %v775_v43 = vld [vmem:[%s3705_s22 + $0xed0] sm:$0xff] }
  0xa4   : > { %2505 = vmatpush1.bf16.msra.mxu1 %v2504_v54  ;;  %v759_v54 = vld [vmem:[%s3705_s22 + $0xe50] sm:$0xff]  ;;  %v2920_v37 = vpack.c.bf16 %v771_v29, %v769_v26  ;;  %v2538_v38 = vpack.c.bf16 %v392_v32, %v390_v31  ;;  %v389_v39 = vld [vmem:[%s3705_s22 + $0x2c0] sm:$0xff]  ;;  %v396_v45 = vld [vmem:[%s3705_s22 + $0x2f8] sm:$0xff] }
  0xa5   : > { %2889 = vmatpush1.bf16.msra.mxu0 %v2888_v55  ;;  %2507 = vmatprep.subr.bf16.mxu1 %v2506_v56  ;;  %v378_v55 = vld [vmem:[%s3705_s22 + $0x268] sm:$0xff]  ;;  %v380_v56 = vld [vmem:[%s3705_s22 + $0x278] sm:$0xff]  ;;  %v2908_v59 = vpack.c.bf16 %v759_v54, %v757_v52  ;;  %v773_v41 = vld [vmem:[%s3705_s22 + $0xec0] sm:$0xff] }
  0xa6   : > { %2891 = vmatprep.subr.bf16.mxu0 %v2890_v60  ;;  %v2526_v60 = vpack.c.bf16 %v380_v56, %v378_v55  ;;  %v778_v46 = vld [vmem:[%s3705_s22 + $0xee8] sm:$0xff]  ;;  %v777_v52 = vld [vmem:[%s3705_s22 + $0xee0] sm:$0xff]  ;;  %v779_v54 = vld [vmem:[%s3705_s22 + $0xef0] sm:$0xff] }
  0xa7   : > { %v398_v55 = vld [vmem:[%s3705_s22 + $0x308] sm:$0xff]  ;;  %v400_v56 = vld [vmem:[%s3705_s22 + $0x318] sm:$0xff]  ;;  %v397_v62 = vld [vmem:[%s3705_s22 + $0x300] sm:$0xff] }
  0xa8   : > { %2509 = vmatpush1.bf16.msra.mxu1 %v2508_v3  ;;  %v382_v3 = vld [vmem:[%s3705_s22 + $0x288] sm:$0xff]  ;;  %v399_v63 = vld [vmem:[%s3705_s22 + $0x310] sm:$0xff]  ;;  %v781_v0 = vld [vmem:[%s3705_s22 + $0xf00] sm:$0xff] }
  0xa9   : > { %2893 = vmatpush1.bf16.msra.mxu0 %v2892_v4  ;;  %2511 = vmatprep.subr.bf16.mxu1 %v2510_v5  ;;  %v384_v4 = vld [vmem:[%s3705_s22 + $0x298] sm:$0xff]  ;;  %v766_v5 = vld [vmem:[%s3705_s22 + $0xe88] sm:$0xff]  ;;  %v783_v2 = vld [vmem:[%s3705_s22 + $0xf10] sm:$0xff] }
  0xaa   : > { %2895 = vmatprep.subr.bf16.mxu0 %v2894_v9  ;;  %v2530_v9 = vpack.c.bf16 %v384_v4, %v382_v3  ;;  %v2914_v14 = vpack.c.bf16 %v768_v6, %v766_v5  ;;  %v402_v3 = vld [vmem:[%s3705_s22 + $0x328] sm:$0xff]  ;;  %v404_v4 = vld [vmem:[%s3705_s22 + $0x338] sm:$0xff]  ;;  %v785_v13 = vld [vmem:[%s3705_s22 + $0xf20] sm:$0xff] }
  0xab   : > { %v786_v5 = vld [vmem:[%s3705_s22 + $0xf28] sm:$0xff]  ;;  %v788_v6 = vld [vmem:[%s3705_s22 + $0xf38] sm:$0xff]  ;;  %v787_v15 = vld [vmem:[%s3705_s22 + $0xf30] sm:$0xff] }
  0xac   : > { %2513 = vmatpush1.bf16.msra.mxu1 %v2512_v18  ;;  %v770_v18 = vld [vmem:[%s3705_s22 + $0xea8] sm:$0xff]  ;;  %v408_v17 = vld [vmem:[%s3705_s22 + $0x358] sm:$0xff]  ;;  %v789_v26 = vld [vmem:[%s3705_s22 + $0xf40] sm:$0xff] }
  0xad   : > { %2897 = vmatpush1.bf16.msra.mxu0 %v2896_v19  ;;  %2515 = vmatprep.subr.bf16.mxu1 %v2514_v20  ;;  %v772_v19 = vld [vmem:[%s3705_s22 + $0xeb8] sm:$0xff]  ;;  %v2532_v20 = vpack.c.bf16 %v383_v12, %v381_v10  ;;  %v401_v10 = vld [vmem:[%s3705_s22 + $0x320] sm:$0xff]  ;;  %v403_v12 = vld [vmem:[%s3705_s22 + $0x330] sm:$0xff] }
  0xae   : > { %2899 = vmatprep.subr.bf16.mxu0 %v2898_v24  ;;  %v387_v24 = vld [vmem:[%s3705_s22 + $0x2b0] sm:$0xff]  ;;  %v2918_v27 = vpack.c.bf16 %v772_v19, %v770_v18  ;;  %v406_v16 = vld [vmem:[%s3705_s22 + $0x348] sm:$0xff]  ;;  %v792_v19 = vld [vmem:[%s3705_s22 + $0xf58] sm:$0xff] }
  0xaf   : > { %1319 = vmatmul.mubr.f32.vlgmr.msra.gmra.mrb[0].mxu1 %v3831_v25  ;;  %v375_v25 = vld [vmem:[%s3705_s22 + $0x250] sm:$0xff]  ;;  %v790_v18 = vld [vmem:[%s3705_s22 + $0xf48] sm:$0xff]  ;;  %v412_v32 = vld [vmem:[%s3705_s22 + $0x378] sm:$0xff] }
  0xb0   : > { %2517 = vmatpush1.bf16.msra.mxu1 %v2516_v34  ;;  %1745 = vmatmul.mubr.f32.vlgmr.msra.gmra.mrb[0].mxu0 %v3840_v28  ;;  %v762_v28 = vld [vmem:[%s3705_s22 + $0xe68] sm:$0xff]  ;;  %v2524_v58 = vpack.c.bf16 %v375_v25, %v373_v51  ;;  %v393_v51 = vld [vmem:[%s3705_s22 + $0x2e0] sm:$0xff]  ;;  %v395_v25 = vld [vmem:[%s3705_s22 + $0x2f0] sm:$0xff] }
  0xb1   : > { %2901 = vmatpush1.bf16.msra.mxu0 %v2900_v35  ;;  %2519 = vmatprep.subr.bf16.mxu1 %v2518_v36  ;;  %v2910_v1 = vpack.c.bf16 %v764_v57, %v762_v28  ;;  %v774_v34 = vld [vmem:[%s3705_s22 + $0xec8] sm:$0xff]  ;;  %v776_v35 = vld [vmem:[%s3705_s22 + $0xed8] sm:$0xff]  ;;  %v2536_v36 = vpack.c.bf16 %v387_v24, %v385_v23  ;;  %v405_v23 = vld [vmem:[%s3705_s22 + $0x340] sm:$0xff] }
  0xb2   : > { %2903 = vmatprep.subr.bf16.mxu0 %v2902_v40  ;;  %1389 = vmatprep.mubr.f32.mxu1 %v1136_v44  ;;  %v391_v40 = vld [vmem:[%s3705_s22 + $0x2d0] sm:$0xff]  ;;  %v2922_v42 = vpack.c.bf16 %v776_v35, %v774_v34  ;;  %v394_v44 = vld [vmem:[%s3705_s22 + $0x2e8] sm:$0xff]  ;;  %v784_v57 = vld [vmem:[%s3705_s22 + $0xf18] sm:$0xff] }
  0xb3   : > { %1815 = vmatprep.mubr.f32.mxu0 %v1187_v47  ;;  %v780_v47 = vld [vmem:[%s3705_s22 + $0xef8] sm:$0xff]  ;;  %v782_v28 = vld [vmem:[%s3705_s22 + $0xf08] sm:$0xff]  ;;  %v407_v24 = vld [vmem:[%s3705_s22 + $0x350] sm:$0xff] }
  0xb4   : > { %2521 = vmatpush1.bf16.msra.mxu1 %v2520_v48  ;;  %v2540_v48 = vpack.c.bf16 %v391_v40, %v389_v39  ;;  %v791_v29 = vld [vmem:[%s3705_s22 + $0xf50] sm:$0xff]  ;;  %v410_v31 = vld [vmem:[%s3705_s22 + $0x368] sm:$0xff]  ;;  %v796_v35 = vld [vmem:[%s3705_s22 + $0xf78] sm:$0xff] }
  0xb5   : > { %2905 = vmatpush1.bf16.msra.mxu0 %v2904_v49  ;;  %2523 = vmatprep.subr.bf16.mxu1 %v2522_v50  ;;  %v2924_v49 = vpack.c.bf16 %v775_v43, %v773_v41  ;;  %v2542_v50 = vpack.c.bf16 %v396_v45, %v394_v44  ;;  %v794_v34 = vld [vmem:[%s3705_s22 + $0xf68] sm:$0xff]  ;;  %v409_v39 = vld [vmem:[%s3705_s22 + $0x360] sm:$0xff]  ;;  %v411_v40 = vld [vmem:[%s3705_s22 + $0x370] sm:$0xff] }
  0xb6   : > { %2907 = vmatprep.subr.bf16.mxu0 %v2906_v53  ;;  %v2926_v53 = vpack.c.bf16 %v780_v47, %v778_v46  ;;  %v793_v41 = vld [vmem:[%s3705_s22 + $0xf60] sm:$0xff]  ;;  %v795_v43 = vld [vmem:[%s3705_s22 + $0xf70] sm:$0xff]  ;;  %v414_v44 = vld [vmem:[%s3705_s22 + $0x388] sm:$0xff] }
  0xb7   : > { %v416_v45 = vld [vmem:[%s3705_s22 + $0x398] sm:$0xff]  ;;  %v798_v46 = vld [vmem:[%s3705_s22 + $0xf88] sm:$0xff] }
  0xb8   : > { %2525 = vmatpush1.bf16.msra.mxu1 %v2524_v58  ;;  %v2544_v58 = vpack.c.bf16 %v395_v25, %v393_v51  ;;  %v800_v47 = vld [vmem:[%s3705_s22 + $0xf98] sm:$0xff]  ;;  %v413_v51 = vld [vmem:[%s3705_s22 + $0x380] sm:$0xff]  ;;  %v415_v25 = vld [vmem:[%s3705_s22 + $0x390] sm:$0xff] }
  0xb9   : > { %2909 = vmatpush1.bf16.msra.mxu0 %v2908_v59  ;;  %2527 = vmatprep.subr.bf16.mxu1 %v2526_v60  ;;  %v2928_v59 = vpack.c.bf16 %v779_v54, %v777_v52  ;;  %v2546_v60 = vpack.c.bf16 %v400_v56, %v398_v55  ;;  %v797_v52 = vld [vmem:[%s3705_s22 + $0xf80] sm:$0xff]  ;;  %v799_v54 = vld [vmem:[%s3705_s22 + $0xf90] sm:$0xff]  ;;  %v418_v55 = vld [vmem:[%s3705_s22 + $0x3a8] sm:$0xff] }
  0xba   : > { %2911 = vmatprep.subr.bf16.mxu0 %v2910_v1  ;;  %v2930_v1 = vpack.c.bf16 %v784_v57, %v782_v28  ;;  %v420_v56 = vld [vmem:[%s3705_s22 + $0x3b8] sm:$0xff]  ;;  %v802_v28 = vld [vmem:[%s3705_s22 + $0xfa8] sm:$0xff] }
  0xbb   : > { %v804_v57 = vld [vmem:[%s3705_s22 + $0xfb8] sm:$0xff] }
  0xbc   : > { %2529 = vmatpush1.bf16.msra.mxu1 %v2528_v7  ;;  %v2548_v7 = vpack.c.bf16 %v399_v63, %v397_v62  ;;  %v417_v62 = vld [vmem:[%s3705_s22 + $0x3a0] sm:$0xff]  ;;  %v419_v63 = vld [vmem:[%s3705_s22 + $0x3b0] sm:$0xff] }
  0xbd   : > { %2913 = vmatpush1.bf16.msra.mxu0 %v2912_v8  ;;  %2531 = vmatprep.subr.bf16.mxu1 %v2530_v9  ;;  %v2932_v8 = vpack.c.bf16 %v783_v2, %v781_v0  ;;  %v2550_v9 = vpack.c.bf16 %v404_v4, %v402_v3  ;;  %v801_v0 = vld [vmem:[%s3705_s22 + $0xfa0] sm:$0xff]  ;;  %v803_v2 = vld [vmem:[%s3705_s22 + $0xfb0] sm:$0xff]  ;;  %v422_v3 = vld [vmem:[%s3705_s22 + $0x3c8] sm:$0xff] }
  0xbe   : > { %2915 = vmatprep.subr.bf16.mxu0 %v2914_v14  ;;  %v2934_v14 = vpack.c.bf16 %v788_v6, %v786_v5  ;;  %v424_v4 = vld [vmem:[%s3705_s22 + $0x3d8] sm:$0xff]  ;;  %v806_v5 = vld [vmem:[%s3705_s22 + $0xfc8] sm:$0xff] }
  0xbf   : > { %v808_v6 = vld [vmem:[%s3705_s22 + $0xfd8] sm:$0xff] }
  0xc0   : > { %2533 = vmatpush1.bf16.msra.mxu1 %v2532_v20  ;;  %v2552_v20 = vpack.c.bf16 %v403_v12, %v401_v10  ;;  %v421_v10 = vld [vmem:[%s3705_s22 + $0x3c0] sm:$0xff]  ;;  %v423_v12 = vld [vmem:[%s3705_s22 + $0x3d0] sm:$0xff] }
  0xc1   : > { %2917 = vmatpush1.bf16.msra.mxu0 %v2916_v21  ;;  %2535 = vmatprep.subr.bf16.mxu1 %v2534_v22  ;;  %v2936_v21 = vpack.c.bf16 %v787_v15, %v785_v13  ;;  %v2554_v22 = vpack.c.bf16 %v408_v17, %v406_v16  ;;  %v805_v13 = vld [vmem:[%s3705_s22 + $0xfc0] sm:$0xff]  ;;  %v807_v15 = vld [vmem:[%s3705_s22 + $0xfd0] sm:$0xff]  ;;  %v426_v16 = vld [vmem:[%s3705_s22 + $0x3e8] sm:$0xff] }
  0xc2   : > { %2919 = vmatprep.subr.bf16.mxu0 %v2918_v27  ;;  %v2938_v27 = vpack.c.bf16 %v792_v19, %v790_v18  ;;  %v428_v17 = vld [vmem:[%s3705_s22 + $0x3f8] sm:$0xff]  ;;  %v810_v18 = vld [vmem:[%s3705_s22 + $0xfe8] sm:$0xff] }
  0xc3   : > { %v812_v19 = vld [vmem:[%s3705_s22 + $0xff8] sm:$0xff] }
  0xc4   : > { %2537 = vmatpush1.bf16.msra.mxu1 %v2536_v36  ;;  %v2556_v36 = vpack.c.bf16 %v407_v24, %v405_v23  ;;  %v425_v23 = vld [vmem:[%s3705_s22 + $0x3e0] sm:$0xff]  ;;  %v427_v24 = vld [vmem:[%s3705_s22 + $0x3f0] sm:$0xff] }
  0xc5   : > { %2921 = vmatpush1.bf16.msra.mxu0 %v2920_v37  ;;  %2539 = vmatprep.subr.bf16.mxu1 %v2538_v38  ;;  %v2940_v37 = vpack.c.bf16 %v791_v29, %v789_v26  ;;  %v2558_v38 = vpack.c.bf16 %v412_v32, %v410_v31  ;;  %v809_v26 = vld [vmem:[%s3705_s22 + $0xfe0] sm:$0xff]  ;;  %v811_v29 = vld [vmem:[%s3705_s22 + $0xff0] sm:$0xff]  ;;  %v430_v31 = vld [vmem:[%s3705_s22 + $0x408] sm:$0xff] }
  0xc6   : > { %2923 = vmatprep.subr.bf16.mxu0 %v2922_v42  ;;  %v2942_v42 = vpack.c.bf16 %v796_v35, %v794_v34  ;;  %v432_v32 = vld [vmem:[%s3705_s22 + $0x418] sm:$0xff]  ;;  %v814_v34 = vld [vmem:[%s3705_s22 + $0x1008] sm:$0xff] }
  0xc7   : > { %v816_v35 = vld [vmem:[%s3705_s22 + $0x1018] sm:$0xff] }
  0xc8   : > { %2541 = vmatpush1.bf16.msra.mxu1 %v2540_v48  ;;  %v2560_v48 = vpack.c.bf16 %v411_v40, %v409_v39  ;;  %v429_v39 = vld [vmem:[%s3705_s22 + $0x400] sm:$0xff]  ;;  %v431_v40 = vld [vmem:[%s3705_s22 + $0x410] sm:$0xff] }
  0xc9   : > { %2925 = vmatpush1.bf16.msra.mxu0 %v2924_v49  ;;  %2543 = vmatprep.subr.bf16.mxu1 %v2542_v50  ;;  %v2944_v49 = vpack.c.bf16 %v795_v43, %v793_v41  ;;  %v2562_v50 = vpack.c.bf16 %v416_v45, %v414_v44  ;;  %v813_v41 = vld [vmem:[%s3705_s22 + $0x1000] sm:$0xff]  ;;  %v815_v43 = vld [vmem:[%s3705_s22 + $0x1010] sm:$0xff]  ;;  %v434_v44 = vld [vmem:[%s3705_s22 + $0x428] sm:$0xff] }
  0xca   : > { %2927 = vmatprep.subr.bf16.mxu0 %v2926_v53  ;;  %v2946_v53 = vpack.c.bf16 %v800_v47, %v798_v46  ;;  %v436_v45 = vld [vmem:[%s3705_s22 + $0x438] sm:$0xff]  ;;  %v818_v46 = vld [vmem:[%s3705_s22 + $0x1028] sm:$0xff] }
  0xcb   : > { %v820_v47 = vld [vmem:[%s3705_s22 + $0x1038] sm:$0xff] }
  0xcc   : > { %2545 = vmatpush1.bf16.msra.mxu1 %v2544_v58  ;;  %v2564_v58 = vpack.c.bf16 %v415_v25, %v413_v51  ;;  %v2964_v51 = vpack.c.bf16 %v815_v43, %v813_v41  ;;  %v2582_v25 = vpack.c.bf16 %v436_v45, %v434_v44  ;;  %v449_v43 = vld [vmem:[%s3705_s22 + $0x4a0] sm:$0xff]  ;;  %v451_v44 = vld [vmem:[%s3705_s22 + $0x4b0] sm:$0xff] }
  0xcd   : > { %2929 = vmatpush1.bf16.msra.mxu0 %v2928_v59  ;;  %2547 = vmatprep.subr.bf16.mxu1 %v2546_v60  ;;  %v2948_v59 = vpack.c.bf16 %v799_v54, %v797_v52  ;;  %v2566_v60 = vpack.c.bf16 %v420_v56, %v418_v55  ;;  %v435_v52 = vld [vmem:[%s3705_s22 + $0x430] sm:$0xff]  ;;  %v4045_v55 = vld [vmem:[%s4703_s0 + $0x20] sm:$0xff]  ;;  %v2966_v56 = vpack.c.bf16 %v820_v47, %v818_v46 }
  0xce   : > { %2931 = vmatprep.subr.bf16.mxu0 %v2930_v1  ;;  %v2950_v1 = vpack.c.bf16 %v804_v57, %v802_v28  ;;  %v819_v28 = vld [vmem:[%s3705_s22 + $0x1030] sm:$0xff]  ;;  %v438_v57 = vld [vmem:[%s3705_s22 + $0x448] sm:$0xff]  ;;  %v833_v45 = vld [vmem:[%s3705_s22 + $0x10a0] sm:$0xff] }
  0xcf   : > { %v835_v47 = vld [vmem:[%s3705_s22 + $0x10b0] sm:$0xff] }
  0xd0   : > { %2549 = vmatpush1.bf16.msra.mxu1 %v2548_v7  ;;  %v2568_v7 = vpack.c.bf16 %v419_v63, %v417_v62  ;;  %v824_v62 = vld [vmem:[%s3705_s22 + $0x1058] sm:$0xff] }
  0xd1   : > { %2933 = vmatpush1.bf16.msra.mxu0 %v2932_v8  ;;  %2551 = vmatprep.subr.bf16.mxu1 %v2550_v9  ;;  %v2952_v8 = vpack.c.bf16 %v803_v2, %v801_v0  ;;  %v2570_v9 = vpack.c.bf16 %v424_v4, %v422_v3  ;;  %v437_v3 = vld [vmem:[%s3705_s22 + $0x440] sm:$0xff]  ;;  %v439_v4 = vld [vmem:[%s3705_s22 + $0x450] sm:$0xff] }
  0xd2   : > { %2935 = vmatprep.subr.bf16.mxu0 %v2934_v14  ;;  %v2954_v14 = vpack.c.bf16 %v808_v6, %v806_v5  ;;  %v821_v5 = vld [vmem:[%s3705_s22 + $0x1040] sm:$0xff] }
  0xd4   : > { %2553 = vmatpush1.bf16.msra.mxu1 %v2552_v20  ;;  %v2572_v20 = vpack.c.bf16 %v423_v12, %v421_v10  ;;  %v828_v10 = vld [vmem:[%s3705_s22 + $0x1078] sm:$0xff]  ;;  %v2588_v12 = vpack.c.bf16 %v439_v4, %v437_v3 }
  0xd5   : > { %2937 = vmatpush1.bf16.msra.mxu0 %v2936_v21  ;;  %2555 = vmatprep.subr.bf16.mxu1 %v2554_v22  ;;  %v2956_v21 = vpack.c.bf16 %v807_v15, %v805_v13  ;;  %v2574_v22 = vpack.c.bf16 %v428_v17, %v426_v16  ;;  %v441_v15 = vld [vmem:[%s3705_s22 + $0x460] sm:$0xff]  ;;  %v443_v16 = vld [vmem:[%s3705_s22 + $0x470] sm:$0xff] }
  0xd6   : > { %2939 = vmatprep.subr.bf16.mxu0 %v2938_v27  ;;  %v2958_v27 = vpack.c.bf16 %v812_v19, %v810_v18  ;;  %v825_v17 = vld [vmem:[%s3705_s22 + $0x1060] sm:$0xff]  ;;  %v827_v19 = vld [vmem:[%s3705_s22 + $0x1070] sm:$0xff] }
  0xd8   : > { %2557 = vmatpush1.bf16.msra.mxu1 %v2556_v36  ;;  %v2576_v36 = vpack.c.bf16 %v427_v24, %v425_v23  ;;  %v832_v23 = vld [vmem:[%s3705_s22 + $0x1098] sm:$0xff]  ;;  %v2592_v24 = vpack.c.bf16 %v443_v16, %v441_v15 }
  0xd9   : > { %2941 = vmatpush1.bf16.msra.mxu0 %v2940_v37  ;;  %2559 = vmatprep.subr.bf16.mxu1 %v2558_v38  ;;  %v2960_v37 = vpack.c.bf16 %v811_v29, %v809_v26  ;;  %v2578_v38 = vpack.c.bf16 %v432_v32, %v430_v31  ;;  %v2976_v26 = vpack.c.bf16 %v827_v19, %v825_v17  ;;  %v445_v29 = vld [vmem:[%s3705_s22 + $0x480] sm:$0xff]  ;;  %v447_v31 = vld [vmem:[%s3705_s22 + $0x490] sm:$0xff] }
  0xda   : > { %2943 = vmatprep.subr.bf16.mxu0 %v2942_v42  ;;  %v2962_v42 = vpack.c.bf16 %v816_v35, %v814_v34  ;;  %v829_v32 = vld [vmem:[%s3705_s22 + $0x1080] sm:$0xff]  ;;  %v831_v35 = vld [vmem:[%s3705_s22 + $0x1090] sm:$0xff] }
  0xdb   : > { %v2980_v41 = vpack.c.bf16 %v831_v35, %v829_v32  ;;  %v461_v17 = vld [vmem:[%s3705_s22 + $0x500] sm:$0xff] }
  0xdc   : > { %2561 = vmatpush1.bf16.msra.mxu1 %v2560_v48  ;;  %v2580_v48 = vpack.c.bf16 %v431_v40, %v429_v39  ;;  %v836_v39 = vld [vmem:[%s3705_s22 + $0x10b8] sm:$0xff]  ;;  %v2596_v40 = vpack.c.bf16 %v447_v31, %v445_v29  ;;  %v845_v19 = vld [vmem:[%s3705_s22 + $0x1100] sm:$0xff] }
  0xdd   : > { %2945 = vmatpush1.bf16.msra.mxu0 %v2944_v49  ;;  %2563 = vmatprep.subr.bf16.mxu1 %v2562_v50  ;;  %v433_v49 = vld [vmem:[%s3705_s22 + $0x420] sm:$0xff]  ;;  %v4034_v50 = vld [vmem:[%s4703_s0 + $0x8] sm:$0xff] }
  0xde   : > { %2947 = vmatprep.subr.bf16.mxu0 %v2946_v53  ;;  %v817_v53 = vld [vmem:[%s3705_s22 + $0x1020] sm:$0xff]  ;;  %v4040_v54 = vrot.slane %v4034_v50, %v3814_v11  ;;  %v2584_v0 = vpack.c.bf16 %v435_v52, %v433_v49  ;;  %v456_v49 = vld [vmem:[%s3705_s22 + $0x4d8] sm:$0xff]  ;;  %v2600_v52 = vpack.c.bf16 %v451_v44, %v449_v43 }
  0xdf   : > { %v465_v32 = vld [vmem:[%s3705_s22 + $0x520] sm:$0xff] }
  0xe0   : > { %2565 = vmatpush1.bf16.msra.mxu1 %v2564_v58  ;;  %v440_v58 = vld [vmem:[%s3705_s22 + $0x458] sm:$0xff]  ;;  %v1152_v63 = vcombine.high %v4040_v54, %v4040_v54  ;;  %v849_v35 = vld [vmem:[%s3705_s22 + $0x1120] sm:$0xff] }
  0xe1   : > { %2949 = vmatpush1.bf16.msra.mxu0 %v2948_v59  ;;  %2567 = vmatprep.subr.bf16.mxu1 %v2566_v60  ;;  %v4052_v59 = vrot.slane %v4045_v55, %v3814_v11  ;;  %v822_v60 = vld [vmem:[%s3705_s22 + $0x1048] sm:$0xff]  ;;  %v2586_v2 = vpack.c.bf16 %v440_v58, %v438_v57  ;;  %v455_v57 = vld [vmem:[%s3705_s22 + $0x4d0] sm:$0xff]  ;;  %v837_v58 = vld [vmem:[%s3705_s22 + $0x10c0] sm:$0xff] }
  0xe2   : > { %2951 = vmatprep.subr.bf16.mxu0 %v2950_v1  ;;  %v2970_v6 = vpack.c.bf16 %v824_v62, %v822_v60  ;;  %v839_v62 = vld [vmem:[%s3705_s22 + $0x10d0] sm:$0xff] }
  0xe3   : > { %v1203_v1 = vcombine.high %v4052_v59, %v4052_v59  ;;  %v2988_v3 = vpack.c.bf16 %v839_v62, %v837_v58  ;;  %v473_v58 = vld [vmem:[%s3705_s22 + $0x560] sm:$0xff] }
  0xe4   : > { %2569 = vmatpush1.bf16.msra.mxu1 %v2568_v7  ;;  %v823_v7 = vld [vmem:[%s3705_s22 + $0x1050] sm:$0xff]  ;;  %v857_v62 = vld [vmem:[%s3705_s22 + $0x1160] sm:$0xff] }
  0xe5   : > { %2953 = vmatpush1.bf16.msra.mxu0 %v2952_v8  ;;  %2571 = vmatprep.subr.bf16.mxu1 %v2570_v9  ;;  %v444_v8 = vld [vmem:[%s3705_s22 + $0x478] sm:$0xff]  ;;  %v826_v9 = vld [vmem:[%s3705_s22 + $0x1068] sm:$0xff]  ;;  %v2972_v13 = vpack.c.bf16 %v823_v7, %v821_v5  ;;  %v457_v5 = vld [vmem:[%s3705_s22 + $0x4e0] sm:$0xff] }
  0xe6   : > { %2955 = vmatprep.subr.bf16.mxu0 %v2954_v14  ;;  %v2974_v18 = vpack.c.bf16 %v828_v10, %v826_v9  ;;  %v841_v7 = vld [vmem:[%s3705_s22 + $0x10e0] sm:$0xff]  ;;  %v462_v9 = vld [vmem:[%s3705_s22 + $0x508] sm:$0xff]  ;;  %v464_v10 = vld [vmem:[%s3705_s22 + $0x518] sm:$0xff] }
  0xe7   : > { %v2610_v16 = vpack.c.bf16 %v464_v10, %v462_v9  ;;  %v863_v10 = vld [vmem:[%s3705_s22 + $0x1190] sm:$0xff] }
  0xe8   : > { %2573 = vmatpush1.bf16.msra.mxu1 %v2572_v20  ;;  %v446_v20 = vld [vmem:[%s3705_s22 + $0x488] sm:$0xff] }
  0xe9   : > { %2957 = vmatpush1.bf16.msra.mxu0 %v2956_v21  ;;  %2575 = vmatprep.subr.bf16.mxu1 %v2574_v22  ;;  %v448_v21 = vld [vmem:[%s3705_s22 + $0x498] sm:$0xff]  ;;  %v830_v22 = vld [vmem:[%s3705_s22 + $0x1088] sm:$0xff] }
  0xea   : > { %2959 = vmatprep.subr.bf16.mxu0 %v2958_v27  ;;  %v2594_v27 = vpack.c.bf16 %v448_v21, %v446_v20  ;;  %v2978_v34 = vpack.c.bf16 %v832_v23, %v830_v22  ;;  %v847_v21 = vld [vmem:[%s3705_s22 + $0x1110] sm:$0xff]  ;;  %v466_v22 = vld [vmem:[%s3705_s22 + $0x528] sm:$0xff]  ;;  %v468_v23 = vld [vmem:[%s3705_s22 + $0x538] sm:$0xff] }
  0xeb   : > { %v2996_v29 = vpack.c.bf16 %v847_v21, %v845_v19  ;;  %v2614_v31 = vpack.c.bf16 %v468_v23, %v466_v22  ;;  %v481_v19 = vld [vmem:[%s3705_s22 + $0x5a0] sm:$0xff]  ;;  %v867_v23 = vld [vmem:[%s3705_s22 + $0x11b0] sm:$0xff] }
  0xec   : > { %2577 = vmatpush1.bf16.msra.mxu1 %v2576_v36  ;;  %v450_v36 = vld [vmem:[%s3705_s22 + $0x4a8] sm:$0xff]  ;;  %v865_v21 = vld [vmem:[%s3705_s22 + $0x11a0] sm:$0xff] }
  0xed   : > { %2961 = vmatpush1.bf16.msra.mxu0 %v2960_v37  ;;  %2579 = vmatprep.subr.bf16.mxu1 %v2578_v38  ;;  %v452_v37 = vld [vmem:[%s3705_s22 + $0x4b8] sm:$0xff]  ;;  %v834_v38 = vld [vmem:[%s3705_s22 + $0x10a8] sm:$0xff] }
  0xee   : > { %2963 = vmatprep.subr.bf16.mxu0 %v2962_v42  ;;  %v2598_v42 = vpack.c.bf16 %v452_v37, %v450_v36  ;;  %v2982_v46 = vpack.c.bf16 %v836_v39, %v834_v38  ;;  %v851_v37 = vld [vmem:[%s3705_s22 + $0x1130] sm:$0xff]  ;;  %v470_v38 = vld [vmem:[%s3705_s22 + $0x548] sm:$0xff]  ;;  %v472_v39 = vld [vmem:[%s3705_s22 + $0x558] sm:$0xff] }
  0xef   : > { %1390 = vmatmul.mubr.f32.vlgmr.msra.gmra.mrb[0].mxu1 %v3889_v30  ;;  %v2968_v30 = vpack.c.bf16 %v819_v28, %v817_v53  ;;  %v2984_v53 = vpack.c.bf16 %v835_v47, %v833_v45  ;;  %v453_v28 = vld [vmem:[%s3705_s22 + $0x4c0] sm:$0xff]  ;;  %v3000_v43 = vpack.c.bf16 %v851_v37, %v849_v35  ;;  %v2618_v44 = vpack.c.bf16 %v472_v39, %v470_v38  ;;  %v871_v39 = vld [vmem:[%s3705_s22 + $0x11d0] sm:$0xff] }
  0xf0   : > { %2581 = vmatpush1.bf16.msra.mxu1 %v2580_v48  ;;  %1816 = vmatmul.mubr.f32.vlgmr.msra.gmra.mrb[0].mxu0 %v3894_v33  ;;  %v442_v33 = vld [vmem:[%s3705_s22 + $0x468] sm:$0xff]  ;;  %v469_v45 = vld [vmem:[%s3705_s22 + $0x540] sm:$0xff] }
  0xf1   : > { %2965 = vmatpush1.bf16.msra.mxu0 %v2964_v51  ;;  %2583 = vmatprep.subr.bf16.mxu1 %v2582_v25  ;;  %v2590_v14 = vpack.c.bf16 %v444_v8, %v442_v33  ;;  %v454_v48 = vld [vmem:[%s3705_s22 + $0x4c8] sm:$0xff]  ;;  %v840_v25 = vld [vmem:[%s3705_s22 + $0x10d8] sm:$0xff]  ;;  %v843_v8 = vld [vmem:[%s3705_s22 + $0x10f0] sm:$0xff] }
  0xf2   : > { %2967 = vmatprep.subr.bf16.mxu0 %v2966_v56  ;;  %1460 = vmatprep.mubr.f32.mxu1 %v1152_v63  ;;  %v838_v51 = vld [vmem:[%s3705_s22 + $0x10c8] sm:$0xff]  ;;  %v2602_v56 = vpack.c.bf16 %v456_v49, %v454_v48  ;;  %v2992_v15 = vpack.c.bf16 %v843_v8, %v841_v7  ;;  %v853_v47 = vld [vmem:[%s3705_s22 + $0x1140] sm:$0xff]  ;;  %v855_v49 = vld [vmem:[%s3705_s22 + $0x1150] sm:$0xff] }
  0xf3   : > { %1886 = vmatprep.mubr.f32.mxu0 %v1203_v1  ;;  %v2986_v60 = vpack.c.bf16 %v840_v25, %v838_v51  ;;  %v458_v63 = vld [vmem:[%s3705_s22 + $0x4e8] sm:$0xff]  ;;  %v476_v25 = vld [vmem:[%s3705_s22 + $0x578] sm:$0xff]  ;;  %v477_v7 = vld [vmem:[%s3705_s22 + $0x580] sm:$0xff] }
  0xf4   : > { %2585 = vmatpush1.bf16.msra.mxu1 %v2584_v0  ;;  %v460_v0 = vld [vmem:[%s3705_s22 + $0x4f8] sm:$0xff]  ;;  %v842_v1 = vld [vmem:[%s3705_s22 + $0x10e8] sm:$0xff]  ;;  %v861_v8 = vld [vmem:[%s3705_s22 + $0x1180] sm:$0xff] }
  0xf5   : > { %2969 = vmatpush1.bf16.msra.mxu0 %v2968_v30  ;;  %2587 = vmatprep.subr.bf16.mxu1 %v2586_v2  ;;  %v844_v30 = vld [vmem:[%s3705_s22 + $0x10f8] sm:$0xff]  ;;  %v2604_v2 = vpack.c.bf16 %v455_v57, %v453_v28  ;;  %v2606_v4 = vpack.c.bf16 %v460_v0, %v458_v63  ;;  %v474_v51 = vld [vmem:[%s3705_s22 + $0x568] sm:$0xff]  ;;  %v3004_v28 = vpack.c.bf16 %v855_v49, %v853_v47  ;;  %v859_v0 = vld [vmem:[%s3705_s22 + $0x1170] sm:$0xff] }
  0xf6   : > { %2971 = vmatprep.subr.bf16.mxu0 %v2970_v6  ;;  %v459_v6 = vld [vmem:[%s3705_s22 + $0x4f0] sm:$0xff]  ;;  %v2990_v33 = vpack.c.bf16 %v844_v30, %v842_v1  ;;  %v2622_v57 = vpack.c.bf16 %v476_v25, %v474_v51  ;;  %v478_v1 = vld [vmem:[%s3705_s22 + $0x588] sm:$0xff]  ;;  %v480_v30 = vld [vmem:[%s3705_s22 + $0x598] sm:$0xff] }
  0xf7   : > { %v485_v35 = vld [vmem:[%s3705_s22 + $0x5c0] sm:$0xff]  ;;  %v875_v25 = vld [vmem:[%s3705_s22 + $0x11f0] sm:$0xff] }
  0xf8   : > { %2589 = vmatpush1.bf16.msra.mxu1 %v2588_v12  ;;  %v846_v12 = vld [vmem:[%s3705_s22 + $0x1108] sm:$0xff]  ;;  %v869_v37 = vld [vmem:[%s3705_s22 + $0x11c0] sm:$0xff] }
  0xf9   : > { %2973 = vmatpush1.bf16.msra.mxu0 %v2972_v13  ;;  %2591 = vmatprep.subr.bf16.mxu1 %v2590_v14  ;;  %v848_v13 = vld [vmem:[%s3705_s22 + $0x1118] sm:$0xff]  ;;  %v2608_v14 = vpack.c.bf16 %v459_v6, %v457_v5  ;;  %v3008_v5 = vpack.c.bf16 %v859_v0, %v857_v62  ;;  %v2626_v6 = vpack.c.bf16 %v480_v30, %v478_v1  ;;  %v489_v47 = vld [vmem:[%s3705_s22 + $0x5e0] sm:$0xff]  ;;  %v495_v1 = vld [vmem:[%s3705_s22 + $0x610] sm:$0xff] }
  0xfa   : > { %2975 = vmatprep.subr.bf16.mxu0 %v2974_v18  ;;  %v463_v18 = vld [vmem:[%s3705_s22 + $0x510] sm:$0xff]  ;;  %v2994_v20 = vpack.c.bf16 %v848_v13, %v846_v12  ;;  %v482_v12 = vld [vmem:[%s3705_s22 + $0x5a8] sm:$0xff]  ;;  %v484_v13 = vld [vmem:[%s3705_s22 + $0x5b8] sm:$0xff] }
  0xfb   : > { %v873_v49 = vld [vmem:[%s3705_s22 + $0x11e0] sm:$0xff] }
  0xfc   : > { %2593 = vmatpush1.bf16.msra.mxu1 %v2592_v24  ;;  %v850_v24 = vld [vmem:[%s3705_s22 + $0x1128] sm:$0xff]  ;;  %v3024_v62 = vpack.c.bf16 %v875_v25, %v873_v49  ;;  %v493_v0 = vld [vmem:[%s3705_s22 + $0x600] sm:$0xff] }
  0xfd   : > { %2977 = vmatpush1.bf16.msra.mxu0 %v2976_v26  ;;  %2595 = vmatprep.subr.bf16.mxu1 %v2594_v27  ;;  %v852_v26 = vld [vmem:[%s3705_s22 + $0x1138] sm:$0xff]  ;;  %v2612_v27 = vpack.c.bf16 %v463_v18, %v461_v17  ;;  %v3012_v17 = vpack.c.bf16 %v863_v10, %v861_v8  ;;  %v2630_v18 = vpack.c.bf16 %v484_v13, %v482_v12  ;;  %v877_v30 = vld [vmem:[%s3705_s22 + $0x1200] sm:$0xff]  ;;  %v499_v12 = vld [vmem:[%s3705_s22 + $0x630] sm:$0xff] }
  0xfe   : > { %2979 = vmatprep.subr.bf16.mxu0 %v2978_v34  ;;  %v467_v34 = vld [vmem:[%s3705_s22 + $0x530] sm:$0xff]  ;;  %v2998_v36 = vpack.c.bf16 %v852_v26, %v850_v24  ;;  %v486_v24 = vld [vmem:[%s3705_s22 + $0x5c8] sm:$0xff]  ;;  %v488_v26 = vld [vmem:[%s3705_s22 + $0x5d8] sm:$0xff] }
  0xff   : > { %v497_v10 = vld [vmem:[%s3705_s22 + $0x620] sm:$0xff] }
 0x100   : > { %2597 = vmatpush1.bf16.msra.mxu1 %v2596_v40  ;;  %v854_v40 = vld [vmem:[%s3705_s22 + $0x1148] sm:$0xff]  ;;  %v881_v13 = vld [vmem:[%s3705_s22 + $0x1220] sm:$0xff] }
 0x101   : > { %2981 = vmatpush1.bf16.msra.mxu0 %v2980_v41  ;;  %2599 = vmatprep.subr.bf16.mxu1 %v2598_v42  ;;  %v856_v41 = vld [vmem:[%s3705_s22 + $0x1158] sm:$0xff]  ;;  %v2616_v42 = vpack.c.bf16 %v467_v34, %v465_v32  ;;  %v3016_v32 = vpack.c.bf16 %v867_v23, %v865_v21  ;;  %v2634_v34 = vpack.c.bf16 %v488_v26, %v486_v24  ;;  %v501_v26 = vld [vmem:[%s3705_s22 + $0x640] sm:$0xff] }
 0x102   : > { %2983 = vmatprep.subr.bf16.mxu0 %v2982_v46  ;;  %v471_v46 = vld [vmem:[%s3705_s22 + $0x550] sm:$0xff]  ;;  %v3002_v48 = vpack.c.bf16 %v856_v41, %v854_v40  ;;  %v490_v40 = vld [vmem:[%s3705_s22 + $0x5e8] sm:$0xff]  ;;  %v492_v41 = vld [vmem:[%s3705_s22 + $0x5f8] sm:$0xff] }
 0x103   : > { %v509_v25 = vld [vmem:[%s3705_s22 + $0x680] sm:$0xff] }
 0x104   : > { %2601 = vmatpush1.bf16.msra.mxu1 %v2600_v52  ;;  %v858_v52 = vld [vmem:[%s3705_s22 + $0x1168] sm:$0xff] }
 0x105   : > { %2985 = vmatpush1.bf16.msra.mxu0 %v2984_v53  ;;  %2603 = vmatprep.subr.bf16.mxu1 %v2602_v56  ;;  %v860_v53 = vld [vmem:[%s3705_s22 + $0x1178] sm:$0xff]  ;;  %v2620_v56 = vpack.c.bf16 %v471_v46, %v469_v45  ;;  %v3020_v45 = vpack.c.bf16 %v871_v39, %v869_v37  ;;  %v2638_v46 = vpack.c.bf16 %v492_v41, %v490_v40  ;;  %v505_v39 = vld [vmem:[%s3705_s22 + $0x660] sm:$0xff]  ;;  %v507_v40 = vld [vmem:[%s3705_s22 + $0x670] sm:$0xff] }
 0x106   : > { %2987 = vmatprep.subr.bf16.mxu0 %v2986_v60  ;;  %v475_v60 = vld [vmem:[%s3705_s22 + $0x570] sm:$0xff]  ;;  %v3006_v63 = vpack.c.bf16 %v860_v53, %v858_v52  ;;  %v494_v52 = vld [vmem:[%s3705_s22 + $0x608] sm:$0xff]  ;;  %v496_v53 = vld [vmem:[%s3705_s22 + $0x618] sm:$0xff] }
 0x107   : > { %v889_v41 = vld [vmem:[%s3705_s22 + $0x1260] sm:$0xff] }
 0x108   : > { %2605 = vmatpush1.bf16.msra.mxu1 %v2604_v2  ;;  %v862_v2 = vld [vmem:[%s3705_s22 + $0x1188] sm:$0xff] }
 0x109   : > { %2989 = vmatpush1.bf16.msra.mxu0 %v2988_v3  ;;  %2607 = vmatprep.subr.bf16.mxu1 %v2606_v4  ;;  %v864_v3 = vld [vmem:[%s3705_s22 + $0x1198] sm:$0xff]  ;;  %v2624_v4 = vpack.c.bf16 %v475_v60, %v473_v58  ;;  %v1188_v58 = vcombine.high %v4045_v55, %v4045_v55 }
 0x10a   : > { %2991 = vmatprep.subr.bf16.mxu0 %v2990_v33  ;;  %v479_v33 = vld [vmem:[%s3705_s22 + $0x590] sm:$0xff]  ;;  %v3010_v9 = vpack.c.bf16 %v864_v3, %v862_v2  ;;  %v498_v3 = vld [vmem:[%s3705_s22 + $0x628] sm:$0xff] }
 0x10b   : > { %v879_v2 = vld [vmem:[%s3705_s22 + $0x1210] sm:$0xff] }
 0x10c   : > { %2609 = vmatpush1.bf16.msra.mxu1 %v2608_v14  ;;  %v866_v14 = vld [vmem:[%s3705_s22 + $0x11a8] sm:$0xff]  ;;  %v3028_v8 = vpack.c.bf16 %v879_v2, %v877_v30  ;;  %v513_v30 = vld [vmem:[%s3705_s22 + $0x6a0] sm:$0xff] }
 0x10d   : > { %2993 = vmatpush1.bf16.msra.mxu0 %v2992_v15  ;;  %2611 = vmatprep.subr.bf16.mxu1 %v2610_v16  ;;  %v868_v15 = vld [vmem:[%s3705_s22 + $0x11b8] sm:$0xff]  ;;  %v2628_v16 = vpack.c.bf16 %v479_v33, %v477_v7  ;;  %v4190_v7 = vrot.slane %v1188_v58, %v3814_v11  ;;  %v2644_v33 = vpack.c.bf16 %v495_v1, %v493_v0  ;;  %v897_v2 = vld [vmem:[%s3705_s22 + $0x12a0] sm:$0xff] }
 0x10e   : > { %2995 = vmatprep.subr.bf16.mxu0 %v2994_v20  ;;  %v483_v20 = vld [vmem:[%s3705_s22 + $0x5b0] sm:$0xff]  ;;  %v3014_v22 = vpack.c.bf16 %v868_v15, %v866_v14  ;;  %v516_v58 = vld [vmem:[%s3705_s22 + $0x6b8] sm:$0xff] }
 0x10f   : > { %v883_v15 = vld [vmem:[%s3705_s22 + $0x1230] sm:$0xff]  ;;  %v1204_v21 = vcombine.high %v4190_v7, %v4190_v7 }
 0x110   : > { %2613 = vmatpush1.bf16.msra.mxu1 %v2612_v27  ;;  %v870_v27 = vld [vmem:[%s3705_s22 + $0x11c8] sm:$0xff]  ;;  %v3032_v23 = vpack.c.bf16 %v883_v15, %v881_v13  ;;  %v517_v13 = vld [vmem:[%s3705_s22 + $0x6c0] sm:$0xff] }
 0x111   : > { %2997 = vmatpush1.bf16.msra.mxu0 %v2996_v29  ;;  %2615 = vmatprep.subr.bf16.mxu1 %v2614_v31  ;;  %v872_v29 = vld [vmem:[%s3705_s22 + $0x11d8] sm:$0xff]  ;;  %v2632_v31 = vpack.c.bf16 %v483_v20, %v481_v19  ;;  %v886_v19 = vld [vmem:[%s3705_s22 + $0x1248] sm:$0xff]  ;;  %v901_v15 = vld [vmem:[%s3705_s22 + $0x12c0] sm:$0xff] }
 0x112   : > { %2999 = vmatprep.subr.bf16.mxu0 %v2998_v36  ;;  %v487_v36 = vld [vmem:[%s3705_s22 + $0x5d0] sm:$0xff]  ;;  %v3018_v38 = vpack.c.bf16 %v872_v29, %v870_v27  ;;  %v888_v20 = vld [vmem:[%s3705_s22 + $0x1258] sm:$0xff]  ;;  %v885_v27 = vld [vmem:[%s3705_s22 + $0x1240] sm:$0xff] }
 0x113   : > { %v3034_v29 = vpack.c.bf16 %v888_v20, %v886_v19  ;;  %v524_v19 = vld [vmem:[%s3705_s22 + $0x6f8] sm:$0xff]  ;;  %v906_v20 = vld [vmem:[%s3705_s22 + $0x12e8] sm:$0xff] }
 0x114   : > { %2617 = vmatpush1.bf16.msra.mxu1 %v2616_v42  ;;  %v874_v42 = vld [vmem:[%s3705_s22 + $0x11e8] sm:$0xff] }
 0x115   : > { %3001 = vmatpush1.bf16.msra.mxu0 %v3000_v43  ;;  %2619 = vmatprep.subr.bf16.mxu1 %v2618_v44  ;;  %v876_v43 = vld [vmem:[%s3705_s22 + $0x11f8] sm:$0xff]  ;;  %v2636_v44 = vpack.c.bf16 %v487_v36, %v485_v35 }
 0x116   : > { %3003 = vmatprep.subr.bf16.mxu0 %v3002_v48  ;;  %v491_v48 = vld [vmem:[%s3705_s22 + $0x5f0] sm:$0xff]  ;;  %v3022_v51 = vpack.c.bf16 %v876_v43, %v874_v42  ;;  %v892_v35 = vld [vmem:[%s3705_s22 + $0x1278] sm:$0xff] }
 0x117   : > { %v2640_v60 = vpack.c.bf16 %v491_v48, %v489_v47  ;;  %v891_v43 = vld [vmem:[%s3705_s22 + $0x1270] sm:$0xff]  ;;  %v896_v47 = vld [vmem:[%s3705_s22 + $0x1298] sm:$0xff]  ;;  %v2656_v48 = vpack.c.bf16 %v507_v40, %v505_v39  ;;  %v525_v39 = vld [vmem:[%s3705_s22 + $0x700] sm:$0xff] }
 0x118   : > { %2621 = vmatpush1.bf16.msra.mxu1 %v2620_v56  ;;  %v1137_v56 = vcombine.high %v4034_v50, %v4034_v50  ;;  %v3040_v49 = vpack.c.bf16 %v891_v43, %v889_v41  ;;  %v527_v40 = vld [vmem:[%s3705_s22 + $0x710] sm:$0xff]  ;;  %v909_v41 = vld [vmem:[%s3705_s22 + $0x1300] sm:$0xff] }
 0x119   : > { %3005 = vmatpush1.bf16.msra.mxu0 %v3004_v28  ;;  %2623 = vmatprep.subr.bf16.mxu1 %v2622_v57  ;;  %v878_v28 = vld [vmem:[%s3705_s22 + $0x1208] sm:$0xff]  ;;  %v880_v57 = vld [vmem:[%s3705_s22 + $0x1218] sm:$0xff]  ;;  %v911_v43 = vld [vmem:[%s3705_s22 + $0x1310] sm:$0xff] }
 0x11a   : > { %3007 = vmatprep.subr.bf16.mxu0 %v3006_v63  ;;  %v2642_v63 = vpack.c.bf16 %v496_v53, %v494_v52  ;;  %v3026_v50 = vpack.c.bf16 %v880_v57, %v878_v28  ;;  %v4185_v55 = vrot.slane %v1137_v56, %v3814_v11  ;;  %v511_v52 = vld [vmem:[%s3705_s22 + $0x690] sm:$0xff]  ;;  %v893_v53 = vld [vmem:[%s3705_s22 + $0x1280] sm:$0xff]  ;;  %v514_v57 = vld [vmem:[%s3705_s22 + $0x6a8] sm:$0xff] }
 0x11b   : > { %v895_v28 = vld [vmem:[%s3705_s22 + $0x1290] sm:$0xff]  ;;  %v2662_v1 = vpack.c.bf16 %v516_v58, %v514_v57  ;;  %v534_v57 = vld [vmem:[%s3705_s22 + $0x748] sm:$0xff]  ;;  %v536_v58 = vld [vmem:[%s3705_s22 + $0x758] sm:$0xff] }
 0x11c   : > { %2625 = vmatpush1.bf16.msra.mxu1 %v2624_v4  ;;  %v500_v4 = vld [vmem:[%s3705_s22 + $0x638] sm:$0xff]  ;;  %v3044_v0 = vpack.c.bf16 %v895_v28, %v893_v53  ;;  %v913_v53 = vld [vmem:[%s3705_s22 + $0x1320] sm:$0xff]  ;;  %v915_v28 = vld [vmem:[%s3705_s22 + $0x1330] sm:$0xff] }
 0x11d   : > { %3009 = vmatpush1.bf16.msra.mxu0 %v3008_v5  ;;  %2627 = vmatprep.subr.bf16.mxu1 %v2626_v6  ;;  %v882_v5 = vld [vmem:[%s3705_s22 + $0x1228] sm:$0xff]  ;;  %v884_v6 = vld [vmem:[%s3705_s22 + $0x1238] sm:$0xff] }
 0x11e   : > { %3011 = vmatprep.subr.bf16.mxu0 %v3010_v9  ;;  %v2646_v9 = vpack.c.bf16 %v500_v4, %v498_v3  ;;  %v3030_v14 = vpack.c.bf16 %v884_v6, %v882_v5  ;;  %v899_v4 = vld [vmem:[%s3705_s22 + $0x12b0] sm:$0xff]  ;;  %v518_v5 = vld [vmem:[%s3705_s22 + $0x6c8] sm:$0xff]  ;;  %v520_v6 = vld [vmem:[%s3705_s22 + $0x6d8] sm:$0xff] }
 0x120   : > { %2629 = vmatpush1.bf16.msra.mxu1 %v2628_v16  ;;  %v502_v16 = vld [vmem:[%s3705_s22 + $0x648] sm:$0xff] }
 0x121   : > { %3013 = vmatpush1.bf16.msra.mxu0 %v3012_v17  ;;  %2631 = vmatprep.subr.bf16.mxu1 %v2630_v18  ;;  %v504_v17 = vld [vmem:[%s3705_s22 + $0x658] sm:$0xff]  ;;  %v1153_v18 = vcombine.high %v4185_v55, %v4185_v55 }
 0x122   : > { %3015 = vmatprep.subr.bf16.mxu0 %v3014_v22  ;;  %v2648_v22 = vpack.c.bf16 %v499_v12, %v497_v10  ;;  %v2650_v24 = vpack.c.bf16 %v504_v17, %v502_v16  ;;  %v3048_v10 = vpack.c.bf16 %v899_v4, %v897_v2  ;;  %v2666_v12 = vpack.c.bf16 %v520_v6, %v518_v5  ;;  %v903_v17 = vld [vmem:[%s3705_s22 + $0x12d0] sm:$0xff]  ;;  %v917_v2 = vld [vmem:[%s3705_s22 + $0x1340] sm:$0xff]  ;;  %v538_v5 = vld [vmem:[%s3705_s22 + $0x768] sm:$0xff] }
 0x123   : > { %v919_v4 = vld [vmem:[%s3705_s22 + $0x1350] sm:$0xff]  ;;  %v540_v6 = vld [vmem:[%s3705_s22 + $0x778] sm:$0xff] }
 0x124   : > { %2633 = vmatpush1.bf16.msra.mxu1 %v2632_v31  ;;  %v887_v31 = vld [vmem:[%s3705_s22 + $0x1250] sm:$0xff] }
 0x125   : > { %3017 = vmatpush1.bf16.msra.mxu0 %v3016_v32  ;;  %2635 = vmatprep.subr.bf16.mxu1 %v2634_v34  ;;  %v506_v32 = vld [vmem:[%s3705_s22 + $0x668] sm:$0xff]  ;;  %v508_v34 = vld [vmem:[%s3705_s22 + $0x678] sm:$0xff]  ;;  %v3036_v37 = vpack.c.bf16 %v887_v31, %v885_v27  ;;  %v905_v27 = vld [vmem:[%s3705_s22 + $0x12e0] sm:$0xff] }
 0x126   : > { %3019 = vmatprep.subr.bf16.mxu0 %v3018_v38  ;;  %v2654_v38 = vpack.c.bf16 %v508_v34, %v506_v32  ;;  %v907_v31 = vld [vmem:[%s3705_s22 + $0x12f0] sm:$0xff]  ;;  %v526_v32 = vld [vmem:[%s3705_s22 + $0x708] sm:$0xff]  ;;  %v528_v34 = vld [vmem:[%s3705_s22 + $0x718] sm:$0xff] }
 0x128   : > { %2637 = vmatpush1.bf16.msra.mxu1 %v2636_v44  ;;  %v510_v44 = vld [vmem:[%s3705_s22 + $0x688] sm:$0xff] }
 0x129   : > { %3021 = vmatpush1.bf16.msra.mxu0 %v3020_v45  ;;  %2639 = vmatprep.subr.bf16.mxu1 %v2638_v46  ;;  %v512_v45 = vld [vmem:[%s3705_s22 + $0x698] sm:$0xff]  ;;  %v894_v46 = vld [vmem:[%s3705_s22 + $0x1288] sm:$0xff] }
 0x12a   : > { %3023 = vmatprep.subr.bf16.mxu0 %v3022_v51  ;;  %v2658_v51 = vpack.c.bf16 %v512_v45, %v510_v44  ;;  %v3042_v56 = vpack.c.bf16 %v896_v47, %v894_v46  ;;  %v530_v44 = vld [vmem:[%s3705_s22 + $0x728] sm:$0xff]  ;;  %v532_v45 = vld [vmem:[%s3705_s22 + $0x738] sm:$0xff] }
 0x12b   : > { %v914_v46 = vld [vmem:[%s3705_s22 + $0x1328] sm:$0xff]  ;;  %v916_v47 = vld [vmem:[%s3705_s22 + $0x1338] sm:$0xff] }
 0x12c   : > { %2641 = vmatpush1.bf16.msra.mxu1 %v2640_v60  ;;  %v898_v60 = vld [vmem:[%s3705_s22 + $0x12a8] sm:$0xff] }
 0x12d   : > { %3025 = vmatpush1.bf16.msra.mxu0 %v3024_v62  ;;  %2643 = vmatprep.subr.bf16.mxu1 %v2642_v63  ;;  %v900_v62 = vld [vmem:[%s3705_s22 + $0x12b8] sm:$0xff]  ;;  %v2660_v63 = vpack.c.bf16 %v511_v52, %v509_v25  ;;  %v529_v25 = vld [vmem:[%s3705_s22 + $0x720] sm:$0xff]  ;;  %v531_v52 = vld [vmem:[%s3705_s22 + $0x730] sm:$0xff] }
 0x12e   : > { %3027 = vmatprep.subr.bf16.mxu0 %v3026_v50  ;;  %v515_v50 = vld [vmem:[%s3705_s22 + $0x6b0] sm:$0xff]  ;;  %v3046_v3 = vpack.c.bf16 %v900_v62, %v898_v60  ;;  %v918_v60 = vld [vmem:[%s3705_s22 + $0x1348] sm:$0xff]  ;;  %v920_v62 = vld [vmem:[%s3705_s22 + $0x1358] sm:$0xff] }
 0x12f   : > { %1461 = vmatmul.mubr.f32.vlgmr.msra.gmra.mrb[0].mxu1 %v4040_v54  ;;  %v503_v54 = vld [vmem:[%s3705_s22 + $0x650] sm:$0xff] }
 0x130   : > { %2645 = vmatpush1.bf16.msra.mxu1 %v2644_v33  ;;  %1887 = vmatmul.mubr.f32.vlgmr.msra.gmra.mrb[0].mxu0 %v4052_v59  ;;  %v890_v59 = vld [vmem:[%s3705_s22 + $0x1268] sm:$0xff]  ;;  %v2652_v36 = vpack.c.bf16 %v503_v54, %v501_v26  ;;  %v521_v26 = vld [vmem:[%s3705_s22 + $0x6e0] sm:$0xff]  ;;  %v523_v54 = vld [vmem:[%s3705_s22 + $0x6f0] sm:$0xff] }
 0x131   : > { %3029 = vmatpush1.bf16.msra.mxu0 %v3028_v8  ;;  %2647 = vmatprep.subr.bf16.mxu1 %v2646_v9  ;;  %v3038_v42 = vpack.c.bf16 %v892_v35, %v890_v59  ;;  %v902_v33 = vld [vmem:[%s3705_s22 + $0x12c8] sm:$0xff]  ;;  %v904_v8 = vld [vmem:[%s3705_s22 + $0x12d8] sm:$0xff]  ;;  %v2664_v9 = vpack.c.bf16 %v515_v50, %v513_v30  ;;  %v533_v30 = vld [vmem:[%s3705_s22 + $0x740] sm:$0xff] }
 0x132   : > { %3031 = vmatprep.subr.bf16.mxu0 %v3030_v14  ;;  %1531 = vmatprep.mubr.f32.mxu1 %v1153_v18  ;;  %v519_v14 = vld [vmem:[%s3705_s22 + $0x6d0] sm:$0xff]  ;;  %v3050_v16 = vpack.c.bf16 %v904_v8, %v902_v33  ;;  %v522_v18 = vld [vmem:[%s3705_s22 + $0x6e8] sm:$0xff]  ;;  %v912_v35 = vld [vmem:[%s3705_s22 + $0x1318] sm:$0xff] }
 0x133   : > { %1957 = vmatprep.mubr.f32.mxu0 %v1204_v21  ;;  %v908_v21 = vld [vmem:[%s3705_s22 + $0x12f8] sm:$0xff]  ;;  %v910_v59 = vld [vmem:[%s3705_s22 + $0x1308] sm:$0xff]  ;;  %v535_v50 = vld [vmem:[%s3705_s22 + $0x750] sm:$0xff] }
 0x134   : > { %2649 = vmatpush1.bf16.msra.mxu1 %v2648_v22  ;;  %v2668_v22 = vpack.c.bf16 %v519_v14, %v517_v13  ;;  %v922_v33 = vld [vmem:[%s3705_s22 + $0x1368] sm:$0xff]  ;;  %v924_v8 = vld [vmem:[%s3705_s22 + $0x1378] sm:$0xff]  ;;  %v537_v13 = vld [vmem:[%s3705_s22 + $0x760] sm:$0xff] }
 0x135   : > { %3033 = vmatpush1.bf16.msra.mxu0 %v3032_v23  ;;  %2651 = vmatprep.subr.bf16.mxu1 %v2650_v24  ;;  %v3052_v23 = vpack.c.bf16 %v903_v17, %v901_v15  ;;  %v2670_v24 = vpack.c.bf16 %v524_v19, %v522_v18  ;;  %v539_v14 = vld [vmem:[%s3705_s22 + $0x770] sm:$0xff]  ;;  %v921_v15 = vld [vmem:[%s3705_s22 + $0x1360] sm:$0xff]  ;;  %v542_v18 = vld [vmem:[%s3705_s22 + $0x788] sm:$0xff] }
 0x136   : > { %3035 = vmatprep.subr.bf16.mxu0 %v3034_v29  ;;  %v3054_v29 = vpack.c.bf16 %v908_v21, %v906_v20  ;;  %v923_v17 = vld [vmem:[%s3705_s22 + $0x1370] sm:$0xff]  ;;  %v544_v19 = vld [vmem:[%s3705_s22 + $0x798] sm:$0xff]  ;;  %v926_v20 = vld [vmem:[%s3705_s22 + $0x1388] sm:$0xff] }
 0x137   : > { %v928_v21 = vld [vmem:[%s3705_s22 + $0x1398] sm:$0xff] }
 0x138   : > { %2653 = vmatpush1.bf16.msra.mxu1 %v2652_v36  ;;  %v2672_v36 = vpack.c.bf16 %v523_v54, %v521_v26  ;;  %v541_v26 = vld [vmem:[%s3705_s22 + $0x780] sm:$0xff]  ;;  %v543_v54 = vld [vmem:[%s3705_s22 + $0x790] sm:$0xff] }
 0x139   : > { %3037 = vmatpush1.bf16.msra.mxu0 %v3036_v37  ;;  %2655 = vmatprep.subr.bf16.mxu1 %v2654_v38  ;;  %v3056_v37 = vpack.c.bf16 %v907_v31, %v905_v27  ;;  %v2674_v38 = vpack.c.bf16 %v528_v34, %v526_v32  ;;  %v925_v27 = vld [vmem:[%s3705_s22 + $0x1380] sm:$0xff]  ;;  %v927_v31 = vld [vmem:[%s3705_s22 + $0x1390] sm:$0xff]  ;;  %v546_v32 = vld [vmem:[%s3705_s22 + $0x7a8] sm:$0xff] }
 0x13a   : > { %3039 = vmatprep.subr.bf16.mxu0 %v3038_v42  ;;  %v3058_v42 = vpack.c.bf16 %v912_v35, %v910_v59  ;;  %v548_v34 = vld [vmem:[%s3705_s22 + $0x7b8] sm:$0xff]  ;;  %v930_v59 = vld [vmem:[%s3705_s22 + $0x13a8] sm:$0xff] }
 0x13b   : > { %v932_v35 = vld [vmem:[%s3705_s22 + $0x13b8] sm:$0xff] }
 0x13c   : > { %2657 = vmatpush1.bf16.msra.mxu1 %v2656_v48  ;;  %v2676_v48 = vpack.c.bf16 %v527_v40, %v525_v39  ;;  %v545_v39 = vld [vmem:[%s3705_s22 + $0x7a0] sm:$0xff]  ;;  %v547_v40 = vld [vmem:[%s3705_s22 + $0x7b0] sm:$0xff] }
 0x13d   : > { %3041 = vmatpush1.bf16.msra.mxu0 %v3040_v49  ;;  %2659 = vmatprep.subr.bf16.mxu1 %v2658_v51  ;;  %v3060_v49 = vpack.c.bf16 %v911_v43, %v909_v41  ;;  %v2678_v51 = vpack.c.bf16 %v532_v45, %v530_v44  ;;  %v929_v41 = vld [vmem:[%s3705_s22 + $0x13a0] sm:$0xff]  ;;  %v931_v43 = vld [vmem:[%s3705_s22 + $0x13b0] sm:$0xff]  ;;  %v550_v44 = vld [vmem:[%s3705_s22 + $0x7c8] sm:$0xff] }
 0x13e   : > { %3043 = vmatprep.subr.bf16.mxu0 %v3042_v56  ;;  %v3062_v56 = vpack.c.bf16 %v916_v47, %v914_v46  ;;  %v552_v45 = vld [vmem:[%s3705_s22 + $0x7d8] sm:$0xff]  ;;  %v934_v46 = vld [vmem:[%s3705_s22 + $0x13c8] sm:$0xff] }
 0x13f   : > { %v936_v47 = vld [vmem:[%s3705_s22 + $0x13d8] sm:$0xff] }
 0x140   : > { %2661 = vmatpush1.bf16.msra.mxu1 %v2660_v63  ;;  %v2680_v63 = vpack.c.bf16 %v531_v52, %v529_v25  ;;  %v549_v25 = vld [vmem:[%s3705_s22 + $0x7c0] sm:$0xff]  ;;  %v551_v52 = vld [vmem:[%s3705_s22 + $0x7d0] sm:$0xff] }
 0x141   : > { %3045 = vmatpush1.bf16.msra.mxu0 %v3044_v0  ;;  %2663 = vmatprep.subr.bf16.mxu1 %v2662_v1  ;;  %v3064_v0 = vpack.c.bf16 %v915_v28, %v913_v53  ;;  %v2682_v1 = vpack.c.bf16 %v536_v58, %v534_v57  ;;  %v933_v53 = vld [vmem:[%s3705_s22 + $0x13c0] sm:$0xff]  ;;  %v935_v28 = vld [vmem:[%s3705_s22 + $0x13d0] sm:$0xff]  ;;  %v554_v57 = vld [vmem:[%s3705_s22 + $0x7e8] sm:$0xff] }
 0x142   : > { %3047 = vmatprep.subr.bf16.mxu0 %v3046_v3  ;;  %v3066_v3 = vpack.c.bf16 %v920_v62, %v918_v60  ;;  %v556_v58 = vld [vmem:[%s3705_s22 + $0x7f8] sm:$0xff]  ;;  %v938_v60 = vld [vmem:[%s3705_s22 + $0x13e8] sm:$0xff] }
 0x143   : > { %v940_v62 = vld [vmem:[%s3705_s22 + $0x13f8] sm:$0xff] }
 0x144   : > { %2665 = vmatpush1.bf16.msra.mxu1 %v2664_v9  ;;  %v2684_v9 = vpack.c.bf16 %v535_v50, %v533_v30  ;;  %v553_v30 = vld [vmem:[%s3705_s22 + $0x7e0] sm:$0xff]  ;;  %v555_v50 = vld [vmem:[%s3705_s22 + $0x7f0] sm:$0xff] }
 0x145   : > { %3049 = vmatpush1.bf16.msra.mxu0 %v3048_v10  ;;  %2667 = vmatprep.subr.bf16.mxu1 %v2666_v12  ;;  %v3068_v10 = vpack.c.bf16 %v919_v4, %v917_v2  ;;  %v2686_v12 = vpack.c.bf16 %v540_v6, %v538_v5  ;;  %v937_v2 = vld [vmem:[%s3705_s22 + $0x13e0] sm:$0xff]  ;;  %v939_v4 = vld [vmem:[%s3705_s22 + $0x13f0] sm:$0xff]  ;;  %v558_v5 = vld [vmem:[%s3705_s22 + $0x808] sm:$0xff] }
 0x146   : > { %3051 = vmatprep.subr.bf16.mxu0 %v3050_v16  ;;  %v3070_v16 = vpack.c.bf16 %v924_v8, %v922_v33  ;;  %v560_v6 = vld [vmem:[%s3705_s22 + $0x818] sm:$0xff]  ;;  %v942_v33 = vld [vmem:[%s3705_s22 + $0x1408] sm:$0xff] }
 0x147   : > { %v944_v8 = vld [vmem:[%s3705_s22 + $0x1418] sm:$0xff] }
 0x148   : > { %2669 = vmatpush1.bf16.msra.mxu1 %v2668_v22  ;;  %v2688_v22 = vpack.c.bf16 %v539_v14, %v537_v13  ;;  %v3088_v13 = vpack.c.bf16 %v939_v4, %v937_v2  ;;  %v2706_v14 = vpack.c.bf16 %v560_v6, %v558_v5  ;;  %v573_v4 = vld [vmem:[%s3705_s22 + $0x880] sm:$0xff]  ;;  %v575_v5 = vld [vmem:[%s3705_s22 + $0x890] sm:$0xff] }
 0x149   : > { %3053 = vmatpush1.bf16.msra.mxu0 %v3052_v23  ;;  %2671 = vmatprep.subr.bf16.mxu1 %v2670_v24  ;;  %v3072_v23 = vpack.c.bf16 %v923_v17, %v921_v15  ;;  %v2690_v24 = vpack.c.bf16 %v544_v19, %v542_v18  ;;  %v557_v15 = vld [vmem:[%s3705_s22 + $0x800] sm:$0xff]  ;;  %v3090_v18 = vpack.c.bf16 %v944_v8, %v942_v33  ;;  %v943_v19 = vld [vmem:[%s3705_s22 + $0x1410] sm:$0xff] }
 0x14a   : > { %3055 = vmatprep.subr.bf16.mxu0 %v3054_v29  ;;  %v3074_v29 = vpack.c.bf16 %v928_v21, %v926_v20  ;;  %v941_v17 = vld [vmem:[%s3705_s22 + $0x1400] sm:$0xff]  ;;  %v562_v20 = vld [vmem:[%s3705_s22 + $0x828] sm:$0xff]  ;;  %v564_v21 = vld [vmem:[%s3705_s22 + $0x838] sm:$0xff] }
 0x14b   : > { %v957_v6 = vld [vmem:[%s3705_s22 + $0x1480] sm:$0xff]  ;;  %v959_v8 = vld [vmem:[%s3705_s22 + $0x1490] sm:$0xff] }
 0x14c   : > { %2673 = vmatpush1.bf16.msra.mxu1 %v2672_v36  ;;  %v2692_v36 = vpack.c.bf16 %v543_v54, %v541_v26 }
 0x14d   : > { %3057 = vmatpush1.bf16.msra.mxu0 %v3056_v37  ;;  %2675 = vmatprep.subr.bf16.mxu1 %v2674_v38  ;;  %v3076_v37 = vpack.c.bf16 %v927_v31, %v925_v27  ;;  %v2694_v38 = vpack.c.bf16 %v548_v34, %v546_v32  ;;  %v3092_v27 = vpack.c.bf16 %v943_v19, %v941_v17  ;;  %v561_v31 = vld [vmem:[%s3705_s22 + $0x820] sm:$0xff]  ;;  %v563_v32 = vld [vmem:[%s3705_s22 + $0x830] sm:$0xff] }
 0x14e   : > { %3059 = vmatprep.subr.bf16.mxu0 %v3058_v42  ;;  %v3078_v42 = vpack.c.bf16 %v932_v35, %v930_v59  ;;  %v945_v34 = vld [vmem:[%s3705_s22 + $0x1420] sm:$0xff]  ;;  %v947_v35 = vld [vmem:[%s3705_s22 + $0x1430] sm:$0xff]  ;;  %v3108_v17 = vpack.c.bf16 %v959_v8, %v957_v6 }
 0x14f   : > { %v577_v19 = vld [vmem:[%s3705_s22 + $0x8a0] sm:$0xff] }
 0x150   : > { %2677 = vmatpush1.bf16.msra.mxu1 %v2676_v48  ;;  %v2696_v48 = vpack.c.bf16 %v547_v40, %v545_v39  ;;  %v950_v39 = vld [vmem:[%s3705_s22 + $0x1448] sm:$0xff]  ;;  %v952_v40 = vld [vmem:[%s3705_s22 + $0x1458] sm:$0xff]  ;;  %v593_v6 = vld [vmem:[%s3705_s22 + $0x920] sm:$0xff] }
 0x151   : > { %3061 = vmatpush1.bf16.msra.mxu0 %v3060_v49  ;;  %2679 = vmatprep.subr.bf16.mxu1 %v2678_v51  ;;  %v3080_v49 = vpack.c.bf16 %v931_v43, %v929_v41  ;;  %v2698_v51 = vpack.c.bf16 %v552_v45, %v550_v44  ;;  %v3096_v43 = vpack.c.bf16 %v947_v35, %v945_v34  ;;  %v565_v45 = vld [vmem:[%s3705_s22 + $0x840] sm:$0xff] }
 0x152   : > { %3063 = vmatprep.subr.bf16.mxu0 %v3062_v56  ;;  %v3082_v56 = vpack.c.bf16 %v936_v47, %v934_v46  ;;  %v949_v46 = vld [vmem:[%s3705_s22 + $0x1440] sm:$0xff]  ;;  %v3098_v47 = vpack.c.bf16 %v952_v40, %v950_v39  ;;  %v967_v39 = vld [vmem:[%s3705_s22 + $0x14d0] sm:$0xff]  ;;  %v586_v40 = vld [vmem:[%s3705_s22 + $0x8e8] sm:$0xff] }
 0x153   : > { %v581_v35 = vld [vmem:[%s3705_s22 + $0x8c0] sm:$0xff] }
 0x154   : > { %2681 = vmatpush1.bf16.msra.mxu1 %v2680_v63  ;;  %v2700_v63 = vpack.c.bf16 %v551_v52, %v549_v25  ;;  %v956_v25 = vld [vmem:[%s3705_s22 + $0x1478] sm:$0xff]  ;;  %v977_v8 = vld [vmem:[%s3705_s22 + $0x1520] sm:$0xff] }
 0x155   : > { %3065 = vmatpush1.bf16.msra.mxu0 %v3064_v0  ;;  %2683 = vmatprep.subr.bf16.mxu1 %v2682_v1  ;;  %v3084_v0 = vpack.c.bf16 %v935_v28, %v933_v53  ;;  %v2702_v1 = vpack.c.bf16 %v556_v58, %v554_v57  ;;  %v569_v28 = vld [vmem:[%s3705_s22 + $0x860] sm:$0xff]  ;;  %v571_v57 = vld [vmem:[%s3705_s22 + $0x870] sm:$0xff] }
 0x156   : > { %3067 = vmatprep.subr.bf16.mxu0 %v3066_v3  ;;  %v3086_v3 = vpack.c.bf16 %v940_v62, %v938_v60  ;;  %v953_v58 = vld [vmem:[%s3705_s22 + $0x1460] sm:$0xff]  ;;  %v955_v62 = vld [vmem:[%s3705_s22 + $0x1470] sm:$0xff] }
 0x157   : > { %v3104_v2 = vpack.c.bf16 %v955_v62, %v953_v58  ;;  %v589_v58 = vld [vmem:[%s3705_s22 + $0x900] sm:$0xff] }
 0x158   : > { %2685 = vmatpush1.bf16.msra.mxu1 %v2684_v9  ;;  %v4321_v9 = vld [vmem:[%s4703_s0 + $0x10] sm:$0xff]  ;;  %v973_v62 = vld [vmem:[%s3705_s22 + $0x1500] sm:$0xff] }
 0x159   : > { %3069 = vmatpush1.bf16.msra.mxu0 %v3068_v10  ;;  %2687 = vmatprep.subr.bf16.mxu1 %v2686_v12  ;;  %v2704_v10 = vpack.c.bf16 %v555_v50, %v553_v30  ;;  %v4326_v12 = vld [vmem:[%s4703_s0 + $0x28] sm:$0xff]  ;;  %v960_v30 = vld [vmem:[%s3705_s22 + $0x1498] sm:$0xff]  ;;  %v2720_v50 = vpack.c.bf16 %v571_v57, %v569_v28 }
 0x15a   : > { %3071 = vmatprep.subr.bf16.mxu0 %v3070_v16  ;;  %v559_v16 = vld [vmem:[%s3705_s22 + $0x810] sm:$0xff]  ;;  %v4342_v26 = vrot.slane %v4326_v12, %v3814_v11 }
 0x15b   : > { %v2708_v54 = vpack.c.bf16 %v559_v16, %v557_v15  ;;  %v964_v15 = vld [vmem:[%s3705_s22 + $0x14b8] sm:$0xff]  ;;  %v2724_v16 = vpack.c.bf16 %v575_v5, %v573_v4 }
 0x15c   : > { %2689 = vmatpush1.bf16.msra.mxu1 %v2688_v22  ;;  %v4336_v22 = vrot.slane %v4321_v9, %v3814_v11  ;;  %v1220_v41 = vcombine.high %v4342_v26, %v4342_v26 }
 0x15d   : > { %3073 = vmatpush1.bf16.msra.mxu0 %v3072_v23  ;;  %2691 = vmatprep.subr.bf16.mxu1 %v2690_v24  ;;  %v946_v23 = vld [vmem:[%s3705_s22 + $0x1428] sm:$0xff]  ;;  %v948_v24 = vld [vmem:[%s3705_s22 + $0x1438] sm:$0xff] }
 0x15e   : > { %3075 = vmatprep.subr.bf16.mxu0 %v3074_v29  ;;  %v2710_v29 = vpack.c.bf16 %v564_v21, %v562_v20  ;;  %v3094_v59 = vpack.c.bf16 %v948_v24, %v946_v23  ;;  %v579_v20 = vld [vmem:[%s3705_s22 + $0x8b0] sm:$0xff]  ;;  %v961_v21 = vld [vmem:[%s3705_s22 + $0x14a0] sm:$0xff] }
 0x15f   : > { %v963_v24 = vld [vmem:[%s3705_s22 + $0x14b0] sm:$0xff] }
 0x160   : > { %2693 = vmatpush1.bf16.msra.mxu1 %v2692_v36  ;;  %v566_v36 = vld [vmem:[%s3705_s22 + $0x848] sm:$0xff]  ;;  %v3112_v34 = vpack.c.bf16 %v963_v24, %v961_v21  ;;  %v597_v21 = vld [vmem:[%s3705_s22 + $0x940] sm:$0xff] }
 0x161   : > { %3077 = vmatpush1.bf16.msra.mxu0 %v3076_v37  ;;  %2695 = vmatprep.subr.bf16.mxu1 %v2694_v38  ;;  %v568_v37 = vld [vmem:[%s3705_s22 + $0x858] sm:$0xff]  ;;  %v1169_v38 = vcombine.high %v4336_v22, %v4336_v22  ;;  %v981_v24 = vld [vmem:[%s3705_s22 + $0x1540] sm:$0xff] }
 0x162   : > { %3079 = vmatprep.subr.bf16.mxu0 %v3078_v42  ;;  %v2712_v42 = vpack.c.bf16 %v563_v32, %v561_v31  ;;  %v2714_v44 = vpack.c.bf16 %v568_v37, %v566_v36  ;;  %v968_v31 = vld [vmem:[%s3705_s22 + $0x14d8] sm:$0xff]  ;;  %v2728_v32 = vpack.c.bf16 %v579_v20, %v577_v19  ;;  %v583_v36 = vld [vmem:[%s3705_s22 + $0x8d0] sm:$0xff]  ;;  %v965_v37 = vld [vmem:[%s3705_s22 + $0x14c0] sm:$0xff] }
 0x164   : > { %2697 = vmatpush1.bf16.msra.mxu1 %v2696_v48  ;;  %v951_v48 = vld [vmem:[%s3705_s22 + $0x1450] sm:$0xff] }
 0x165   : > { %3081 = vmatpush1.bf16.msra.mxu0 %v3080_v49  ;;  %2699 = vmatprep.subr.bf16.mxu1 %v2698_v51  ;;  %v570_v49 = vld [vmem:[%s3705_s22 + $0x868] sm:$0xff]  ;;  %v572_v51 = vld [vmem:[%s3705_s22 + $0x878] sm:$0xff]  ;;  %v3100_v53 = vpack.c.bf16 %v951_v48, %v949_v46  ;;  %v585_v46 = vld [vmem:[%s3705_s22 + $0x8e0] sm:$0xff] }
 0x166   : > { %3083 = vmatprep.subr.bf16.mxu0 %v3082_v56  ;;  %v2718_v56 = vpack.c.bf16 %v572_v51, %v570_v49  ;;  %v969_v48 = vld [vmem:[%s3705_s22 + $0x14e0] sm:$0xff]  ;;  %v971_v51 = vld [vmem:[%s3705_s22 + $0x14f0] sm:$0xff] }
 0x167   : > { %v3120_v28 = vpack.c.bf16 %v971_v51, %v969_v48  ;;  %v605_v48 = vld [vmem:[%s3705_s22 + $0x980] sm:$0xff] }
 0x168   : > { %2701 = vmatpush1.bf16.msra.mxu1 %v2700_v63  ;;  %v574_v63 = vld [vmem:[%s3705_s22 + $0x888] sm:$0xff]  ;;  %v989_v51 = vld [vmem:[%s3705_s22 + $0x1580] sm:$0xff] }
 0x169   : > { %3085 = vmatpush1.bf16.msra.mxu0 %v3084_v0  ;;  %2703 = vmatprep.subr.bf16.mxu1 %v2702_v1  ;;  %v576_v0 = vld [vmem:[%s3705_s22 + $0x898] sm:$0xff]  ;;  %v958_v1 = vld [vmem:[%s3705_s22 + $0x1488] sm:$0xff] }
 0x16a   : > { %3087 = vmatprep.subr.bf16.mxu0 %v3086_v3  ;;  %v2722_v3 = vpack.c.bf16 %v576_v0, %v574_v63  ;;  %v3106_v33 = vpack.c.bf16 %v960_v30, %v958_v1  ;;  %v975_v0 = vld [vmem:[%s3705_s22 + $0x1510] sm:$0xff]  ;;  %v594_v1 = vld [vmem:[%s3705_s22 + $0x928] sm:$0xff]  ;;  %v596_v30 = vld [vmem:[%s3705_s22 + $0x938] sm:$0xff] }
 0x16b   : > { %v3124_v4 = vpack.c.bf16 %v975_v0, %v973_v62  ;;  %v2742_v5 = vpack.c.bf16 %v596_v30, %v594_v1  ;;  %v609_v62 = vld [vmem:[%s3705_s22 + $0x9a0] sm:$0xff]  ;;  %v995_v30 = vld [vmem:[%s3705_s22 + $0x15b0] sm:$0xff] }
 0x16c   : > { %2705 = vmatpush1.bf16.msra.mxu1 %v2704_v10  ;;  %v578_v10 = vld [vmem:[%s3705_s22 + $0x8a8] sm:$0xff]  ;;  %v993_v0 = vld [vmem:[%s3705_s22 + $0x15a0] sm:$0xff] }
 0x16d   : > { %3089 = vmatpush1.bf16.msra.mxu0 %v3088_v13  ;;  %2707 = vmatprep.subr.bf16.mxu1 %v2706_v14  ;;  %v580_v13 = vld [vmem:[%s3705_s22 + $0x8b8] sm:$0xff]  ;;  %v962_v14 = vld [vmem:[%s3705_s22 + $0x14a8] sm:$0xff] }
 0x16e   : > { %3091 = vmatprep.subr.bf16.mxu0 %v3090_v18  ;;  %v2726_v18 = vpack.c.bf16 %v580_v13, %v578_v10  ;;  %v3110_v23 = vpack.c.bf16 %v964_v15, %v962_v14  ;;  %v979_v13 = vld [vmem:[%s3705_s22 + $0x1530] sm:$0xff]  ;;  %v598_v14 = vld [vmem:[%s3705_s22 + $0x948] sm:$0xff]  ;;  %v600_v15 = vld [vmem:[%s3705_s22 + $0x958] sm:$0xff] }
 0x16f   : > { %1532 = vmatmul.mubr.f32.vlgmr.msra.gmra.mrb[0].mxu1 %v4185_v55  ;;  %v567_v55 = vld [vmem:[%s3705_s22 + $0x850] sm:$0xff]  ;;  %v3128_v19 = vpack.c.bf16 %v979_v13, %v977_v8  ;;  %v2746_v20 = vpack.c.bf16 %v600_v15, %v598_v14  ;;  %v613_v8 = vld [vmem:[%s3705_s22 + $0x9c0] sm:$0xff] }
 0x170   : > { %2709 = vmatpush1.bf16.msra.mxu1 %v2708_v54  ;;  %1958 = vmatmul.mubr.f32.vlgmr.msra.gmra.mrb[0].mxu0 %v4190_v7  ;;  %v954_v7 = vld [vmem:[%s3705_s22 + $0x1468] sm:$0xff]  ;;  %v2716_v52 = vpack.c.bf16 %v567_v55, %v565_v45  ;;  %v3116_v45 = vpack.c.bf16 %v967_v39, %v965_v37  ;;  %v601_v37 = vld [vmem:[%s3705_s22 + $0x960] sm:$0xff]  ;;  %v999_v15 = vld [vmem:[%s3705_s22 + $0x15d0] sm:$0xff] }
 0x171   : > { %3093 = vmatpush1.bf16.msra.mxu0 %v3092_v27  ;;  %2711 = vmatprep.subr.bf16.mxu1 %v2710_v29  ;;  %v3102_v60 = vpack.c.bf16 %v956_v25, %v954_v7  ;;  %v582_v54 = vld [vmem:[%s3705_s22 + $0x8c8] sm:$0xff]  ;;  %v584_v27 = vld [vmem:[%s3705_s22 + $0x8d8] sm:$0xff]  ;;  %v985_v39 = vld [vmem:[%s3705_s22 + $0x1560] sm:$0xff] }
 0x172   : > { %3095 = vmatprep.subr.bf16.mxu0 %v3094_v59  ;;  %1602 = vmatprep.mubr.f32.mxu1 %v1169_v38  ;;  %v966_v29 = vld [vmem:[%s3705_s22 + $0x14c8] sm:$0xff]  ;;  %v2730_v59 = vpack.c.bf16 %v584_v27, %v582_v54  ;;  %v592_v25 = vld [vmem:[%s3705_s22 + $0x918] sm:$0xff]  ;;  %v983_v27 = vld [vmem:[%s3705_s22 + $0x1550] sm:$0xff] }
 0x173   : > { %2028 = vmatprep.mubr.f32.mxu0 %v1220_v41  ;;  %v3114_v38 = vpack.c.bf16 %v968_v31, %v966_v29  ;;  %v588_v41 = vld [vmem:[%s3705_s22 + $0x8f8] sm:$0xff]  ;;  %v590_v7 = vld [vmem:[%s3705_s22 + $0x908] sm:$0xff]  ;;  %v997_v13 = vld [vmem:[%s3705_s22 + $0x15c0] sm:$0xff] }
 0x174   : > { %2713 = vmatpush1.bf16.msra.mxu1 %v2712_v42  ;;  %v970_v42 = vld [vmem:[%s3705_s22 + $0x14e8] sm:$0xff]  ;;  %v2734_v55 = vpack.c.bf16 %v588_v41, %v586_v40  ;;  %v2738_v57 = vpack.c.bf16 %v592_v25, %v590_v7  ;;  %v604_v31 = vld [vmem:[%s3705_s22 + $0x978] sm:$0xff]  ;;  %v987_v41 = vld [vmem:[%s3705_s22 + $0x1570] sm:$0xff] }
 0x175   : > { %3097 = vmatpush1.bf16.msra.mxu0 %v3096_v43  ;;  %2715 = vmatprep.subr.bf16.mxu1 %v2714_v44  ;;  %v972_v43 = vld [vmem:[%s3705_s22 + $0x14f8] sm:$0xff]  ;;  %v2732_v44 = vpack.c.bf16 %v583_v36, %v581_v35  ;;  %v602_v29 = vld [vmem:[%s3705_s22 + $0x968] sm:$0xff]  ;;  %v3132_v35 = vpack.c.bf16 %v983_v27, %v981_v24  ;;  %v991_v25 = vld [vmem:[%s3705_s22 + $0x1590] sm:$0xff] }
 0x176   : > { %3099 = vmatprep.subr.bf16.mxu0 %v3098_v47  ;;  %v587_v47 = vld [vmem:[%s3705_s22 + $0x8f0] sm:$0xff]  ;;  %v3118_v49 = vpack.c.bf16 %v972_v43, %v970_v42  ;;  %v2750_v36 = vpack.c.bf16 %v604_v31, %v602_v29  ;;  %v606_v42 = vld [vmem:[%s3705_s22 + $0x988] sm:$0xff]  ;;  %v608_v43 = vld [vmem:[%s3705_s22 + $0x998] sm:$0xff] }
 0x177   : > { %v617_v24 = vld [vmem:[%s3705_s22 + $0x9e0] sm:$0xff]  ;;  %v1003_v31 = vld [vmem:[%s3705_s22 + $0x15f0] sm:$0xff] }
 0x178   : > { %2717 = vmatpush1.bf16.msra.mxu1 %v2716_v52  ;;  %v974_v52 = vld [vmem:[%s3705_s22 + $0x1508] sm:$0xff]  ;;  %v1001_v27 = vld [vmem:[%s3705_s22 + $0x15e0] sm:$0xff] }
 0x179   : > { %3101 = vmatpush1.bf16.msra.mxu0 %v3100_v53  ;;  %2719 = vmatprep.subr.bf16.mxu1 %v2718_v56  ;;  %v976_v53 = vld [vmem:[%s3705_s22 + $0x1518] sm:$0xff]  ;;  %v2736_v56 = vpack.c.bf16 %v587_v47, %v585_v46  ;;  %v3136_v46 = vpack.c.bf16 %v987_v41, %v985_v39  ;;  %v2754_v47 = vpack.c.bf16 %v608_v43, %v606_v42  ;;  %v621_v41 = vld [vmem:[%s3705_s22 + $0xa00] sm:$0xff]  ;;  %v623_v42 = vld [vmem:[%s3705_s22 + $0xa10] sm:$0xff] }
 0x17a   : > { %3103 = vmatprep.subr.bf16.mxu0 %v3102_v60  ;;  %v591_v60 = vld [vmem:[%s3705_s22 + $0x910] sm:$0xff]  ;;  %v3122_v63 = vpack.c.bf16 %v976_v53, %v974_v52  ;;  %v610_v52 = vld [vmem:[%s3705_s22 + $0x9a8] sm:$0xff]  ;;  %v612_v53 = vld [vmem:[%s3705_s22 + $0x9b8] sm:$0xff]  ;;  %v3152_v39 = vpack.c.bf16 %v1003_v31, %v1001_v27 }
 0x17b   : > { %v1005_v43 = vld [vmem:[%s3705_s22 + $0x1600] sm:$0xff]  ;;  %v639_v31 = vld [vmem:[%s3705_s22 + $0xa90] sm:$0xff] }
 0x17c   : > { %2721 = vmatpush1.bf16.msra.mxu1 %v2720_v50  ;;  %v978_v50 = vld [vmem:[%s3705_s22 + $0x1528] sm:$0xff] }
 0x17d   : > { %3105 = vmatpush1.bf16.msra.mxu0 %v3104_v2  ;;  %2723 = vmatprep.subr.bf16.mxu1 %v2722_v3  ;;  %v980_v2 = vld [vmem:[%s3705_s22 + $0x1538] sm:$0xff]  ;;  %v2740_v3 = vpack.c.bf16 %v591_v60, %v589_v58  ;;  %v3140_v58 = vpack.c.bf16 %v991_v25, %v989_v51  ;;  %v2758_v60 = vpack.c.bf16 %v612_v53, %v610_v52  ;;  %v625_v25 = vld [vmem:[%s3705_s22 + $0xa20] sm:$0xff]  ;;  %v627_v52 = vld [vmem:[%s3705_s22 + $0xa30] sm:$0xff] }
 0x17e   : > { %3107 = vmatprep.subr.bf16.mxu0 %v3106_v33  ;;  %v595_v33 = vld [vmem:[%s3705_s22 + $0x930] sm:$0xff]  ;;  %v3126_v10 = vpack.c.bf16 %v980_v2, %v978_v50  ;;  %v614_v50 = vld [vmem:[%s3705_s22 + $0x9c8] sm:$0xff]  ;;  %v616_v2 = vld [vmem:[%s3705_s22 + $0x9d8] sm:$0xff] }
 0x17f   : > { %v1009_v53 = vld [vmem:[%s3705_s22 + $0x1620] sm:$0xff] }
 0x180   : > { %2725 = vmatpush1.bf16.msra.mxu1 %v2724_v16  ;;  %v982_v16 = vld [vmem:[%s3705_s22 + $0x1548] sm:$0xff] }
 0x181   : > { %3109 = vmatpush1.bf16.msra.mxu0 %v3108_v17  ;;  %2727 = vmatprep.subr.bf16.mxu1 %v2726_v18  ;;  %v984_v17 = vld [vmem:[%s3705_s22 + $0x1558] sm:$0xff]  ;;  %v2744_v18 = vpack.c.bf16 %v595_v33, %v593_v6  ;;  %v3144_v6 = vpack.c.bf16 %v995_v30, %v993_v0  ;;  %v2762_v33 = vpack.c.bf16 %v616_v2, %v614_v50  ;;  %v629_v50 = vld [vmem:[%s3705_s22 + $0xa40] sm:$0xff] }
 0x182   : > { %3111 = vmatprep.subr.bf16.mxu0 %v3110_v23  ;;  %v599_v23 = vld [vmem:[%s3705_s22 + $0x950] sm:$0xff]  ;;  %v3130_v54 = vpack.c.bf16 %v984_v17, %v982_v16  ;;  %v618_v16 = vld [vmem:[%s3705_s22 + $0x9e8] sm:$0xff]  ;;  %v620_v17 = vld [vmem:[%s3705_s22 + $0x9f8] sm:$0xff]  ;;  %v2776_v0 = vpack.c.bf16 %v627_v52, %v625_v25 }
 0x183   : > { %v1013_v2 = vld [vmem:[%s3705_s22 + $0x1640] sm:$0xff] }
 0x184   : > { %2729 = vmatpush1.bf16.msra.mxu1 %v2728_v32  ;;  %v986_v32 = vld [vmem:[%s3705_s22 + $0x1568] sm:$0xff]  ;;  %v645_v52 = vld [vmem:[%s3705_s22 + $0xac0] sm:$0xff] }
 0x185   : > { %3113 = vmatpush1.bf16.msra.mxu0 %v3112_v34  ;;  %2731 = vmatprep.subr.bf16.mxu1 %v2730_v59  ;;  %v988_v34 = vld [vmem:[%s3705_s22 + $0x1578] sm:$0xff]  ;;  %v2748_v59 = vpack.c.bf16 %v599_v23, %v597_v21  ;;  %v3148_v21 = vpack.c.bf16 %v999_v15, %v997_v13  ;;  %v2766_v23 = vpack.c.bf16 %v620_v17, %v618_v16  ;;  %v635_v15 = vld [vmem:[%s3705_s22 + $0xa70] sm:$0xff]  ;;  %v1017_v16 = vld [vmem:[%s3705_s22 + $0x1660] sm:$0xff] }
 0x186   : > { %3115 = vmatprep.subr.bf16.mxu0 %v3114_v38  ;;  %v603_v38 = vld [vmem:[%s3705_s22 + $0x970] sm:$0xff]  ;;  %v3134_v40 = vpack.c.bf16 %v988_v34, %v986_v32  ;;  %v622_v32 = vld [vmem:[%s3705_s22 + $0xa08] sm:$0xff]  ;;  %v624_v34 = vld [vmem:[%s3705_s22 + $0xa18] sm:$0xff] }
 0x188   : > { %2733 = vmatpush1.bf16.msra.mxu1 %v2732_v44  ;;  %v990_v44 = vld [vmem:[%s3705_s22 + $0x1588] sm:$0xff] }
 0x189   : > { %3117 = vmatpush1.bf16.msra.mxu0 %v3116_v45  ;;  %2735 = vmatprep.subr.bf16.mxu1 %v2734_v55  ;;  %v992_v45 = vld [vmem:[%s3705_s22 + $0x1598] sm:$0xff]  ;;  %v2752_v55 = vpack.c.bf16 %v603_v38, %v601_v37  ;;  %v1205_v37 = vcombine.high %v4326_v12, %v4326_v12 }
 0x18a   : > { %3119 = vmatprep.subr.bf16.mxu0 %v3118_v49  ;;  %v607_v49 = vld [vmem:[%s3705_s22 + $0x990] sm:$0xff]  ;;  %v3138_v7 = vpack.c.bf16 %v992_v45, %v990_v44  ;;  %v626_v45 = vld [vmem:[%s3705_s22 + $0xa28] sm:$0xff] }
 0x18b   : > { %v1007_v44 = vld [vmem:[%s3705_s22 + $0x1610] sm:$0xff] }
 0x18c   : > { %2737 = vmatpush1.bf16.msra.mxu1 %v2736_v56  ;;  %v994_v56 = vld [vmem:[%s3705_s22 + $0x15a8] sm:$0xff]  ;;  %v3156_v51 = vpack.c.bf16 %v1007_v44, %v1005_v43  ;;  %v643_v43 = vld [vmem:[%s3705_s22 + $0xab0] sm:$0xff] }
 0x18d   : > { %3121 = vmatpush1.bf16.msra.mxu0 %v3120_v28  ;;  %2739 = vmatprep.subr.bf16.mxu1 %v2738_v57  ;;  %v996_v28 = vld [vmem:[%s3705_s22 + $0x15b8] sm:$0xff]  ;;  %v2756_v57 = vpack.c.bf16 %v607_v49, %v605_v48  ;;  %v4486_v48 = vrot.slane %v1205_v37, %v3814_v11  ;;  %v2772_v49 = vpack.c.bf16 %v623_v42, %v621_v41  ;;  %v1026_v37 = vld [vmem:[%s3705_s22 + $0x16a8] sm:$0xff]  ;;  %v641_v42 = vld [vmem:[%s3705_s22 + $0xaa0] sm:$0xff] }
 0x18e   : > { %3123 = vmatprep.subr.bf16.mxu0 %v3122_v63  ;;  %v611_v63 = vld [vmem:[%s3705_s22 + $0x9b0] sm:$0xff]  ;;  %v3142_v1 = vpack.c.bf16 %v996_v28, %v994_v56 }
 0x18f   : > { %v1011_v28 = vld [vmem:[%s3705_s22 + $0x1630] sm:$0xff] }
 0x190   : > { %2741 = vmatpush1.bf16.msra.mxu1 %v2740_v3  ;;  %v998_v3 = vld [vmem:[%s3705_s22 + $0x15c8] sm:$0xff] }
 0x191   : > { %3125 = vmatpush1.bf16.msra.mxu0 %v3124_v4  ;;  %2743 = vmatprep.subr.bf16.mxu1 %v2742_v5  ;;  %v1000_v4 = vld [vmem:[%s3705_s22 + $0x15d8] sm:$0xff]  ;;  %v2760_v5 = vpack.c.bf16 %v611_v63, %v609_v62  ;;  %v1221_v63 = vcombine.high %v4486_v48, %v4486_v48 }
 0x192   : > { %3127 = vmatprep.subr.bf16.mxu0 %v3126_v10  ;;  %v615_v10 = vld [vmem:[%s3705_s22 + $0x9d0] sm:$0xff]  ;;  %v3146_v14 = vpack.c.bf16 %v1000_v4, %v998_v3  ;;  %v1016_v62 = vld [vmem:[%s3705_s22 + $0x1658] sm:$0xff] }
 0x193   : > { %v1015_v4 = vld [vmem:[%s3705_s22 + $0x1650] sm:$0xff] }
 0x194   : > { %2745 = vmatpush1.bf16.msra.mxu1 %v2744_v18  ;;  %v1002_v18 = vld [vmem:[%s3705_s22 + $0x15e8] sm:$0xff] }
 0x195   : > { %3129 = vmatpush1.bf16.msra.mxu0 %v3128_v19  ;;  %2747 = vmatprep.subr.bf16.mxu1 %v2746_v20  ;;  %v1004_v19 = vld [vmem:[%s3705_s22 + $0x15f8] sm:$0xff]  ;;  %v2764_v20 = vpack.c.bf16 %v615_v10, %v613_v8  ;;  %v3164_v10 = vpack.c.bf16 %v1015_v4, %v1013_v2  ;;  %v654_v4 = vld [vmem:[%s3705_s22 + $0xb08] sm:$0xff] }
 0x196   : > { %3131 = vmatprep.subr.bf16.mxu0 %v3130_v54  ;;  %v619_v54 = vld [vmem:[%s3705_s22 + $0x9f0] sm:$0xff]  ;;  %v3150_v29 = vpack.c.bf16 %v1004_v19, %v1002_v18  ;;  %v638_v19 = vld [vmem:[%s3705_s22 + $0xa88] sm:$0xff] }
 0x197   : > { %v2768_v38 = vpack.c.bf16 %v619_v54, %v617_v24  ;;  %v1019_v18 = vld [vmem:[%s3705_s22 + $0x1670] sm:$0xff] }
 0x198   : > { %2749 = vmatpush1.bf16.msra.mxu1 %v2748_v59  ;;  %v1154_v59 = vcombine.high %v4321_v9, %v4321_v9  ;;  %v3168_v54 = vpack.c.bf16 %v1019_v18, %v1017_v16  ;;  %v658_v18 = vld [vmem:[%s3705_s22 + $0xb28] sm:$0xff] }
 0x199   : > { %3133 = vmatpush1.bf16.msra.mxu0 %v3132_v35  ;;  %2751 = vmatprep.subr.bf16.mxu1 %v2750_v36  ;;  %v1006_v35 = vld [vmem:[%s3705_s22 + $0x1608] sm:$0xff]  ;;  %v1008_v36 = vld [vmem:[%s3705_s22 + $0x1618] sm:$0xff] }
 0x19a   : > { %3135 = vmatprep.subr.bf16.mxu0 %v3134_v40  ;;  %v2770_v40 = vpack.c.bf16 %v624_v34, %v622_v32  ;;  %v3154_v9 = vpack.c.bf16 %v1008_v36, %v1006_v35  ;;  %v4481_v12 = vrot.slane %v1154_v59, %v3814_v11  ;;  %v632_v11 = vld [vmem:[%s3705_s22 + $0xa58] sm:$0xff]  ;;  %v1021_v32 = vld [vmem:[%s3705_s22 + $0x1680] sm:$0xff]  ;;  %v1023_v59 = vld [vmem:[%s3705_s22 + $0x1690] sm:$0xff] }
 0x19b   : > { %v642_v35 = vld [vmem:[%s3705_s22 + $0xaa8] sm:$0xff]  ;;  %v644_v36 = vld [vmem:[%s3705_s22 + $0xab8] sm:$0xff] }
 0x19c   : > { %2753 = vmatpush1.bf16.msra.mxu1 %v2752_v55  ;;  %v628_v55 = vld [vmem:[%s3705_s22 + $0xa38] sm:$0xff]  ;;  %v2790_v41 = vpack.c.bf16 %v644_v36, %v642_v35  ;;  %v1046_v36 = vld [vmem:[%s3705_s22 + $0x1748] sm:$0xff] }
 0x19d   : > { %3137 = vmatpush1.bf16.msra.mxu0 %v3136_v46  ;;  %2755 = vmatprep.subr.bf16.mxu1 %v2754_v47  ;;  %v1010_v46 = vld [vmem:[%s3705_s22 + $0x1628] sm:$0xff]  ;;  %v1012_v47 = vld [vmem:[%s3705_s22 + $0x1638] sm:$0xff] }
 0x19e   : > { %3139 = vmatprep.subr.bf16.mxu0 %v3138_v7  ;;  %v2774_v7 = vpack.c.bf16 %v628_v55, %v626_v45  ;;  %v3158_v56 = vpack.c.bf16 %v1012_v47, %v1010_v46  ;;  %v1027_v45 = vld [vmem:[%s3705_s22 + $0x16b0] sm:$0xff]  ;;  %v646_v55 = vld [vmem:[%s3705_s22 + $0xac8] sm:$0xff]  ;;  %v648_v46 = vld [vmem:[%s3705_s22 + $0xad8] sm:$0xff] }
 0x19f   : > { %v1030_v47 = vld [vmem:[%s3705_s22 + $0x16c8] sm:$0xff]  ;;  %v2794_v25 = vpack.c.bf16 %v648_v46, %v646_v55  ;;  %v664_v35 = vld [vmem:[%s3705_s22 + $0xb58] sm:$0xff] }
 0x1a0   : > { %2757 = vmatpush1.bf16.msra.mxu1 %v2756_v57  ;;  %v630_v57 = vld [vmem:[%s3705_s22 + $0xa48] sm:$0xff]  ;;  %v668_v55 = vld [vmem:[%s3705_s22 + $0xb78] sm:$0xff] }
 0x1a1   : > { %3141 = vmatpush1.bf16.msra.mxu0 %v3140_v58  ;;  %2759 = vmatprep.subr.bf16.mxu1 %v2758_v60  ;;  %v1170_v58 = vcombine.high %v4481_v12, %v4481_v12  ;;  %v1014_v60 = vld [vmem:[%s3705_s22 + $0x1648] sm:$0xff]  ;;  %v2778_v30 = vpack.c.bf16 %v632_v11, %v630_v57  ;;  %v1031_v57 = vld [vmem:[%s3705_s22 + $0x16d0] sm:$0xff] }
 0x1a2   : > { %3143 = vmatprep.subr.bf16.mxu0 %v3142_v1  ;;  %v3160_v1 = vpack.c.bf16 %v1011_v28, %v1009_v53  ;;  %v3162_v3 = vpack.c.bf16 %v1016_v62, %v1014_v60  ;;  %v647_v53 = vld [vmem:[%s3705_s22 + $0xad0] sm:$0xff]  ;;  %v650_v11 = vld [vmem:[%s3705_s22 + $0xae8] sm:$0xff]  ;;  %v1036_v62 = vld [vmem:[%s3705_s22 + $0x16f8] sm:$0xff] }
 0x1a3   : > { %v1034_v60 = vld [vmem:[%s3705_s22 + $0x16e8] sm:$0xff] }
 0x1a4   : > { %2761 = vmatpush1.bf16.msra.mxu1 %v2760_v5  ;;  %v634_v5 = vld [vmem:[%s3705_s22 + $0xa68] sm:$0xff]  ;;  %v3182_v2 = vpack.c.bf16 %v1036_v62, %v1034_v60  ;;  %v1056_v60 = vld [vmem:[%s3705_s22 + $0x1798] sm:$0xff] }
 0x1a5   : > { %3145 = vmatpush1.bf16.msra.mxu0 %v3144_v6  ;;  %2763 = vmatprep.subr.bf16.mxu1 %v2762_v33  ;;  %v636_v6 = vld [vmem:[%s3705_s22 + $0xa78] sm:$0xff]  ;;  %v1050_v46 = vld [vmem:[%s3705_s22 + $0x1768] sm:$0xff] }
 0x1a6   : > { %3147 = vmatprep.subr.bf16.mxu0 %v3146_v14  ;;  %v1020_v33 = vld [vmem:[%s3705_s22 + $0x1678] sm:$0xff]  ;;  %v2782_v13 = vpack.c.bf16 %v636_v6, %v634_v5  ;;  %v633_v14 = vld [vmem:[%s3705_s22 + $0xa60] sm:$0xff]  ;;  %v1038_v6 = vld [vmem:[%s3705_s22 + $0x1708] sm:$0xff] }
 0x1a7   : > { %v2784_v24 = vpack.c.bf16 %v635_v15, %v633_v14  ;;  %v656_v5 = vld [vmem:[%s3705_s22 + $0xb18] sm:$0xff]  ;;  %v655_v14 = vld [vmem:[%s3705_s22 + $0xb10] sm:$0xff]  ;;  %v1037_v15 = vld [vmem:[%s3705_s22 + $0x1700] sm:$0xff] }
 0x1a8   : > { %2765 = vmatpush1.bf16.msra.mxu1 %v2764_v20  ;;  %v640_v20 = vld [vmem:[%s3705_s22 + $0xa98] sm:$0xff] }
 0x1a9   : > { %3149 = vmatpush1.bf16.msra.mxu0 %v3148_v21  ;;  %2767 = vmatprep.subr.bf16.mxu1 %v2766_v23  ;;  %v1022_v21 = vld [vmem:[%s3705_s22 + $0x1688] sm:$0xff]  ;;  %v1024_v23 = vld [vmem:[%s3705_s22 + $0x1698] sm:$0xff]  ;;  %v2786_v27 = vpack.c.bf16 %v640_v20, %v638_v19 }
 0x1aa   : > { %3151 = vmatprep.subr.bf16.mxu0 %v3150_v29  ;;  %v637_v29 = vld [vmem:[%s3705_s22 + $0xa80] sm:$0xff]  ;;  %v3170_v34 = vpack.c.bf16 %v1024_v23, %v1022_v21  ;;  %v660_v19 = vld [vmem:[%s3705_s22 + $0xb38] sm:$0xff]  ;;  %v1042_v20 = vld [vmem:[%s3705_s22 + $0x1728] sm:$0xff] }
 0x1ab   : > { %v1044_v21 = vld [vmem:[%s3705_s22 + $0x1738] sm:$0xff] }
 0x1ac   : > { %2769 = vmatpush1.bf16.msra.mxu1 %v2768_v38  ;;  %v1028_v38 = vld [vmem:[%s3705_s22 + $0x16b8] sm:$0xff] }
 0x1ad   : > { %3153 = vmatpush1.bf16.msra.mxu0 %v3152_v39  ;;  %2771 = vmatprep.subr.bf16.mxu1 %v2770_v40  ;;  %v2788_v39 = vpack.c.bf16 %v639_v31, %v637_v29  ;;  %v3172_v40 = vpack.c.bf16 %v1023_v59, %v1021_v32  ;;  %v3174_v44 = vpack.c.bf16 %v1028_v38, %v1026_v37  ;;  %v659_v29 = vld [vmem:[%s3705_s22 + $0xb30] sm:$0xff]  ;;  %v1041_v31 = vld [vmem:[%s3705_s22 + $0x1720] sm:$0xff]  ;;  %v662_v59 = vld [vmem:[%s3705_s22 + $0xb48] sm:$0xff] }
 0x1ae   : > { %3155 = vmatprep.subr.bf16.mxu0 %v3154_v9  ;;  %v1025_v9 = vld [vmem:[%s3705_s22 + $0x16a0] sm:$0xff]  ;;  %v3190_v32 = vpack.c.bf16 %v1044_v21, %v1042_v20  ;;  %v1048_v37 = vld [vmem:[%s3705_s22 + $0x1758] sm:$0xff] }
 0x1af   : > { %1603 = vmatmul.mubr.f32.vlgmr.msra.gmra.mrb[0].mxu1 %v4336_v22  ;;  %v631_v22 = vld [vmem:[%s3705_s22 + $0xa50] sm:$0xff]  ;;  %v1064_v20 = vld [vmem:[%s3705_s22 + $0x17d8] sm:$0xff] }
 0x1b0   : > { %2773 = vmatpush1.bf16.msra.mxu1 %v2772_v49  ;;  %2029 = vmatmul.mubr.f32.vlgmr.msra.gmra.mrb[0].mxu0 %v4342_v26  ;;  %v1018_v26 = vld [vmem:[%s3705_s22 + $0x1668] sm:$0xff]  ;;  %v2780_v8 = vpack.c.bf16 %v631_v22, %v629_v50  ;;  %v1032_v49 = vld [vmem:[%s3705_s22 + $0x16d8] sm:$0xff]  ;;  %v651_v50 = vld [vmem:[%s3705_s22 + $0xaf0] sm:$0xff] }
 0x1b1   : > { %3157 = vmatpush1.bf16.msra.mxu0 %v3156_v51  ;;  %2775 = vmatprep.subr.bf16.mxu1 %v2774_v7  ;;  %v3166_v17 = vpack.c.bf16 %v1020_v33, %v1018_v26  ;;  %v2792_v51 = vpack.c.bf16 %v643_v43, %v641_v42  ;;  %v3176_v7 = vpack.c.bf16 %v1027_v45, %v1025_v9  ;;  %v1033_v22 = vld [vmem:[%s3705_s22 + $0x16e0] sm:$0xff]  ;;  %v1040_v26 = vld [vmem:[%s3705_s22 + $0x1718] sm:$0xff]  ;;  %v663_v42 = vld [vmem:[%s3705_s22 + $0xb50] sm:$0xff] }
 0x1b2   : > { %3159 = vmatprep.subr.bf16.mxu0 %v3158_v56  ;;  %1673 = vmatprep.mubr.f32.mxu1 %v1170_v58  ;;  %v1029_v56 = vld [vmem:[%s3705_s22 + $0x16c0] sm:$0xff]  ;;  %v3178_v28 = vpack.c.bf16 %v1032_v49, %v1030_v47  ;;  %v652_v58 = vld [vmem:[%s3705_s22 + $0xaf8] sm:$0xff]  ;;  %v3186_v16 = vpack.c.bf16 %v1040_v26, %v1038_v6  ;;  %v3194_v9 = vpack.c.bf16 %v1048_v37, %v1046_v36  ;;  %v666_v45 = vld [vmem:[%s3705_s22 + $0xb68] sm:$0xff] }
 0x1b3   : > { %2099 = vmatprep.mubr.f32.mxu0 %v1221_v63  ;;  %v2796_v63 = vpack.c.bf16 %v647_v53, %v645_v52  ;;  %v1045_v43 = vld [vmem:[%s3705_s22 + $0x1740] sm:$0xff]  ;;  %v1052_v47 = vld [vmem:[%s3705_s22 + $0x1778] sm:$0xff]  ;;  %v667_v52 = vld [vmem:[%s3705_s22 + $0xb70] sm:$0xff] }
 0x1b4   : > { %2777 = vmatpush1.bf16.msra.mxu1 %v2776_v0  ;;  %v3180_v0 = vpack.c.bf16 %v1031_v57, %v1029_v56  ;;  %v1049_v53 = vld [vmem:[%s3705_s22 + $0x1760] sm:$0xff]  ;;  %v3198_v56 = vpack.c.bf16 %v1052_v47, %v1050_v46  ;;  %v670_v57 = vld [vmem:[%s3705_s22 + $0xb88] sm:$0xff]  ;;  %v1060_v6 = vld [vmem:[%s3705_s22 + $0x17b8] sm:$0xff] }
 0x1b5   : > { %3161 = vmatpush1.bf16.msra.mxu0 %v3160_v1  ;;  %2779 = vmatprep.subr.bf16.mxu1 %v2778_v30  ;;  %v2798_v1 = vpack.c.bf16 %v652_v58, %v650_v11  ;;  %v649_v30 = vld [vmem:[%s3705_s22 + $0xae0] sm:$0xff]  ;;  %v672_v11 = vld [vmem:[%s3705_s22 + $0xb98] sm:$0xff]  ;;  %v1054_v58 = vld [vmem:[%s3705_s22 + $0x1788] sm:$0xff] }
 0x1b6   : > { %3163 = vmatprep.subr.bf16.mxu0 %v3162_v3  ;;  %v1035_v3 = vld [vmem:[%s3705_s22 + $0x16f0] sm:$0xff]  ;;  %v2800_v33 = vpack.c.bf16 %v651_v50, %v649_v30  ;;  %v1053_v50 = vld [vmem:[%s3705_s22 + $0x1780] sm:$0xff]  ;;  %v1068_v36 = vld [vmem:[%s3705_s22 + $0x17f8] sm:$0xff] }
 0x1b7   : > { %v671_v30 = vld [vmem:[%s3705_s22 + $0xb90] sm:$0xff] }
 0x1b8   : > { %2781 = vmatpush1.bf16.msra.mxu1 %v2780_v8  ;;  %v3184_v8 = vpack.c.bf16 %v1035_v3, %v1033_v22  ;;  %v3202_v22 = vpack.c.bf16 %v1056_v60, %v1054_v58  ;;  %v674_v3 = vld [vmem:[%s3705_s22 + $0xba8] sm:$0xff]  ;;  %v3511_v60 = vmov 0.0  }
 0x1b9   : > { %3165 = vmatpush1.bf16.msra.mxu0 %v3164_v10  ;;  %2783 = vmatprep.subr.bf16.mxu1 %v2782_v13  ;;  %v2802_v10 = vpack.c.bf16 %v656_v5, %v654_v4  ;;  %v653_v13 = vld [vmem:[%s3705_s22 + $0xb00] sm:$0xff]  ;;  %v676_v4 = vld [vmem:[%s3705_s22 + $0xbb8] sm:$0xff]  ;;  %v1058_v5 = vld [vmem:[%s3705_s22 + $0x17a8] sm:$0xff] }
 0x1ba   : > { %3167 = vmatprep.subr.bf16.mxu0 %v3166_v17  ;;  %v1039_v17 = vld [vmem:[%s3705_s22 + $0x1710] sm:$0xff]  ;;  %v2804_v23 = vpack.c.bf16 %v655_v14, %v653_v13  ;;  %v1057_v14 = vld [vmem:[%s3705_s22 + $0x17a0] sm:$0xff] }
 0x1bb   : > { %v675_v13 = vld [vmem:[%s3705_s22 + $0xbb0] sm:$0xff] }
 0x1bc   : > { %2785 = vmatpush1.bf16.msra.mxu1 %v2784_v24  ;;  %v3188_v24 = vpack.c.bf16 %v1039_v17, %v1037_v15  ;;  %v3206_v15 = vpack.c.bf16 %v1060_v6, %v1058_v5  ;;  %v678_v17 = vld [vmem:[%s3705_s22 + $0xbc8] sm:$0xff]  ;;  %v1085_v6 = vld [vmem:[%s3705_s22 + $0x1880] sm:$0xff] }
 0x1bd   : > { %3169 = vmatpush1.bf16.msra.mxu0 %v3168_v54  ;;  %2787 = vmatprep.subr.bf16.mxu1 %v2786_v27  ;;  %v2806_v54 = vpack.c.bf16 %v660_v19, %v658_v18  ;;  %v657_v27 = vld [vmem:[%s3705_s22 + $0xb20] sm:$0xff]  ;;  %v680_v18 = vld [vmem:[%s3705_s22 + $0xbd8] sm:$0xff]  ;;  %v1062_v19 = vld [vmem:[%s3705_s22 + $0x17c8] sm:$0xff] }
 0x1be   : > { %3171 = vmatprep.subr.bf16.mxu0 %v3170_v34  ;;  %v1043_v34 = vld [vmem:[%s3705_s22 + $0x1730] sm:$0xff]  ;;  %v2808_v38 = vpack.c.bf16 %v659_v29, %v657_v27  ;;  %v1061_v29 = vld [vmem:[%s3705_s22 + $0x17c0] sm:$0xff] }
 0x1bf   : > { %v679_v27 = vld [vmem:[%s3705_s22 + $0xbd0] sm:$0xff] }
 0x1c0   : > { %2789 = vmatpush1.bf16.msra.mxu1 %v2788_v39  ;;  %v3192_v39 = vpack.c.bf16 %v1043_v34, %v1041_v31  ;;  %v3210_v31 = vpack.c.bf16 %v1064_v20, %v1062_v19  ;;  %v682_v34 = vld [vmem:[%s3705_s22 + $0xbe8] sm:$0xff]  ;;  %v1093_v20 = vld [vmem:[%s3705_s22 + $0x18c0] sm:$0xff] }
 0x1c1   : > { %3173 = vmatpush1.bf16.msra.mxu0 %v3172_v40  ;;  %2791 = vmatprep.subr.bf16.mxu1 %v2790_v41  ;;  %v2810_v40 = vpack.c.bf16 %v664_v35, %v662_v59  ;;  %v661_v41 = vld [vmem:[%s3705_s22 + $0xb40] sm:$0xff]  ;;  %v684_v59 = vld [vmem:[%s3705_s22 + $0xbf8] sm:$0xff]  ;;  %v1066_v35 = vld [vmem:[%s3705_s22 + $0x17e8] sm:$0xff] }
 0x1c2   : > { %3175 = vmatprep.subr.bf16.mxu0 %v3174_v44  ;;  %v1047_v44 = vld [vmem:[%s3705_s22 + $0x1750] sm:$0xff]  ;;  %v2812_v49 = vpack.c.bf16 %v663_v42, %v661_v41  ;;  %v3214_v42 = vpack.c.bf16 %v1068_v36, %v1066_v35  ;;  %v2183_v36 = vld [vmem:[%s4648_s27] sm:$0xff] }
 0x1c3   : > { %v683_v41 = vld [vmem:[%s3705_s22 + $0xbf0] sm:$0xff] }
 0x1c4   : > { %2793 = vmatpush1.bf16.msra.mxu1 %v2792_v51  ;;  %v3196_v51 = vpack.c.bf16 %v1047_v44, %v1045_v43  ;;  %v1065_v43 = vld [vmem:[%s3705_s22 + $0x17e0] sm:$0xff]  ;;  %v1070_v44 = vld [vmem:[%s3705_s22 + $0x1808] sm:$0xff] }
 0x1c5   : > { %3177 = vmatpush1.bf16.msra.mxu0 %v3176_v7  ;;  %2795 = vmatprep.subr.bf16.mxu1 %v2794_v25  ;;  %v2814_v7 = vpack.c.bf16 %v668_v55, %v666_v45  ;;  %v665_v25 = vld [vmem:[%s3705_s22 + $0xb60] sm:$0xff]  ;;  %v1072_v45 = vld [vmem:[%s3705_s22 + $0x1818] sm:$0xff]  ;;  %v2200_v35 = vld [vmem:[%s4648_s27 + $0x88] sm:$0xff] }
 0x1c6   : > { %3179 = vmatprep.subr.bf16.mxu0 %v3178_v28  ;;  %v1051_v28 = vld [vmem:[%s3705_s22 + $0x1770] sm:$0xff]  ;;  %v2816_v62 = vpack.c.bf16 %v667_v52, %v665_v25  ;;  %v3218_v47 = vpack.c.bf16 %v1072_v45, %v1070_v44  ;;  %v1076_v25 = vld [vmem:[%s3705_s22 + $0x1838] sm:$0xff]  ;;  %v2203_v44 = vld [vmem:[%s4648_s27 + $0xa0] sm:$0xff] }
 0x1c7   : > { %v2204_v45 = vld [vmem:[%s4648_s27 + $0xa8] sm:$0xff] }
 0x1c8   : > { %2797 = vmatpush1.bf16.msra.mxu1 %v2796_v63  ;;  %v3200_v63 = vpack.c.bf16 %v1051_v28, %v1049_v53  ;;  %v1075_v28 = vld [vmem:[%s3705_s22 + $0x1830] sm:$0xff] }
 0x1c9   : > { %3181 = vmatpush1.bf16.msra.mxu0 %v3180_v0  ;;  %2799 = vmatprep.subr.bf16.mxu1 %v2798_v1  ;;  %v2818_v0 = vpack.c.bf16 %v672_v11, %v670_v57  ;;  %v669_v1 = vld [vmem:[%s3705_s22 + $0xb80] sm:$0xff]  ;;  %v1078_v57 = vld [vmem:[%s3705_s22 + $0x1848] sm:$0xff]  ;;  %v1080_v11 = vld [vmem:[%s3705_s22 + $0x1858] sm:$0xff] }
 0x1ca   : > { %3183 = vmatprep.subr.bf16.mxu0 %v3182_v2  ;;  %v1055_v2 = vld [vmem:[%s3705_s22 + $0x1790] sm:$0xff]  ;;  %v2820_v26 = vpack.c.bf16 %v671_v30, %v669_v1  ;;  %v1082_v1 = vld [vmem:[%s3705_s22 + $0x1868] sm:$0xff] }
 0x1cc   : > { %2801 = vmatpush1.bf16.msra.mxu1 %v2800_v33  ;;  %v3204_v33 = vpack.c.bf16 %v1055_v2, %v1053_v50  ;;  %v1081_v50 = vld [vmem:[%s3705_s22 + $0x1860] sm:$0xff]  ;;  %v1086_v2 = vld [vmem:[%s3705_s22 + $0x1888] sm:$0xff] }
 0x1cd   : > { %3185 = vmatpush1.bf16.msra.mxu0 %v3184_v8  ;;  %2803 = vmatprep.subr.bf16.mxu1 %v2802_v10  ;;  %v2822_v8 = vpack.c.bf16 %v676_v4, %v674_v3  ;;  %v673_v10 = vld [vmem:[%s3705_s22 + $0xba0] sm:$0xff]  ;;  %v1088_v3 = vld [vmem:[%s3705_s22 + $0x1898] sm:$0xff] }
 0x1ce   : > { %3187 = vmatprep.subr.bf16.mxu0 %v3186_v16  ;;  %v1059_v16 = vld [vmem:[%s3705_s22 + $0x17b0] sm:$0xff]  ;;  %v2824_v21 = vpack.c.bf16 %v675_v13, %v673_v10  ;;  %v3234_v5 = vpack.c.bf16 %v1088_v3, %v1086_v2 }
 0x1cf   : > { %v2212_v2 = vld [vmem:[%s4648_s27 + $0xe8] sm:$0xff] }
 0x1d0   : > { %2805 = vmatpush1.bf16.msra.mxu1 %v2804_v23  ;;  %v3208_v23 = vpack.c.bf16 %v1059_v16, %v1057_v14  ;;  %v1089_v14 = vld [vmem:[%s3705_s22 + $0x18a0] sm:$0xff]  ;;  %v1094_v16 = vld [vmem:[%s3705_s22 + $0x18c8] sm:$0xff] }
 0x1d1   : > { %3189 = vmatpush1.bf16.msra.mxu0 %v3188_v24  ;;  %2807 = vmatprep.subr.bf16.mxu1 %v2806_v54  ;;  %v2826_v24 = vpack.c.bf16 %v680_v18, %v678_v17  ;;  %v677_v54 = vld [vmem:[%s3705_s22 + $0xbc0] sm:$0xff]  ;;  %v1096_v17 = vld [vmem:[%s3705_s22 + $0x18d8] sm:$0xff] }
 0x1d2   : > { %3191 = vmatprep.subr.bf16.mxu0 %v3190_v32  ;;  %v1063_v32 = vld [vmem:[%s3705_s22 + $0x17d0] sm:$0xff]  ;;  %v2828_v37 = vpack.c.bf16 %v679_v27, %v677_v54  ;;  %v3242_v19 = vpack.c.bf16 %v1096_v17, %v1094_v16  ;;  %v1105_v17 = vsub.s32 0, %v3803_v61 }
 0x1d4   : > { %2809 = vmatpush1.bf16.msra.mxu1 %v2808_v38  ;;  %v3212_v38 = vpack.c.bf16 %v1063_v32, %v1061_v29  ;;  %v1097_v29 = vld [vmem:[%s3705_s22 + $0x18e0] sm:$0xff] }
 0x1d5   : > { %3193 = vmatpush1.bf16.msra.mxu0 %v3192_v39  ;;  %2811 = vmatprep.subr.bf16.mxu1 %v2810_v40  ;;  %v2830_v39 = vpack.c.bf16 %v684_v59, %v682_v34  ;;  %v681_v40 = vld [vmem:[%s3705_s22 + $0xbe0] sm:$0xff]  ;;  %v2409_v34 = vld.sshfl [vmem:[%s4703_s0 + $0x30] sm:$0x3 pattern:$0x76325410] }
 0x1d6   : > { %3195 = vmatprep.subr.bf16.mxu0 %v3194_v9  ;;  %v1067_v9 = vld [vmem:[%s3705_s22 + $0x17f0] sm:$0xff]  ;;  %v2832_v55 = vpack.c.bf16 %v683_v41, %v681_v40  ;;  %v2199_v59 = vld [vmem:[%s4648_s27 + $0x80] sm:$0xff]  ;;  %v2202_v40 = vld [vmem:[%s4648_s27 + $0x98] sm:$0xff] }
 0x1d7   : > { %v3216_v46 = vpack.c.bf16 %v1067_v9, %v1065_v43  ;;  %v2185_v43 = vld [vmem:[%s4648_s27 + $0x10] sm:$0xff]  ;;  %v2186_v9 = vld [vmem:[%s4648_s27 + $0x18] sm:$0xff] }
 0x1d8   : > { %2813 = vmatpush1.bf16.msra.mxu1 %v2812_v49  ;;  %v1069_v49 = vld [vmem:[%s3705_s22 + $0x1800] sm:$0xff] }
 0x1d9   : > { %3197 = vmatpush1.bf16.msra.mxu0 %v3196_v51  ;;  %2815 = vmatprep.subr.bf16.mxu1 %v2814_v7  ;;  %v1071_v51 = vld [vmem:[%s3705_s22 + $0x1810] sm:$0xff]  ;;  %v1074_v7 = vld [vmem:[%s3705_s22 + $0x1828] sm:$0xff] }
 0x1da   : > { %3199 = vmatprep.subr.bf16.mxu0 %v3198_v56  ;;  %v3220_v52 = vpack.c.bf16 %v1071_v51, %v1069_v49  ;;  %v3222_v53 = vpack.c.bf16 %v1076_v25, %v1074_v7  ;;  %v1073_v56 = vld [vmem:[%s3705_s22 + $0x1820] sm:$0xff]  ;;  %v2188_v49 = vld [vmem:[%s4648_s27 + $0x28] sm:$0xff]  ;;  %v2205_v51 = vld [vmem:[%s4648_s27 + $0xb0] sm:$0xff] }
 0x1db   : > { %v3224_v58 = vpack.c.bf16 %v1075_v28, %v1073_v56  ;;  %v2206_v7 = vld [vmem:[%s4648_s27 + $0xb8] sm:$0xff]  ;;  %v2207_v28 = vld [vmem:[%s4648_s27 + $0xc0] sm:$0xff] }
 0x1dc   : > { %2817 = vmatpush1.bf16.msra.mxu1 %v2816_v62  ;;  %v3226_v62 = vpack.c.bf16 %v1080_v11, %v1078_v57  ;;  %v2190_v56 = vld [vmem:[%s4648_s27 + $0x38] sm:$0xff]  ;;  %v2208_v57 = vld [vmem:[%s4648_s27 + $0xc8] sm:$0xff] }
 0x1dd   : > { %3201 = vmatpush1.bf16.msra.mxu0 %v3200_v63  ;;  %2819 = vmatprep.subr.bf16.mxu1 %v2818_v0  ;;  %v1077_v63 = vld [vmem:[%s3705_s22 + $0x1840] sm:$0xff]  ;;  %v1079_v0 = vld [vmem:[%s3705_s22 + $0x1850] sm:$0xff] }
 0x1de   : > { %3203 = vmatprep.subr.bf16.mxu0 %v3202_v22  ;;  %v3228_v30 = vpack.c.bf16 %v1079_v0, %v1077_v63  ;;  %v1083_v22 = vld [vmem:[%s3705_s22 + $0x1870] sm:$0xff]  ;;  %v2210_v0 = vld [vmem:[%s4648_s27 + $0xd8] sm:$0xff] }
 0x1df   : > { %v3232_v4 = vpack.c.bf16 %v1083_v22, %v1081_v50  ;;  %v2209_v63 = vld [vmem:[%s4648_s27 + $0xd0] sm:$0xff]  ;;  %v2211_v22 = vld [vmem:[%s4648_s27 + $0xe0] sm:$0xff] }
 0x1e0   : > { %2821 = vmatpush1.bf16.msra.mxu1 %v2820_v26  ;;  %v1087_v26 = vld [vmem:[%s3705_s22 + $0x1890] sm:$0xff]  ;;  %v3274_v3 = vpack.c.bf16 %v2212_v2, %v2211_v22 }
 0x1e1   : > { %3205 = vmatpush1.bf16.msra.mxu0 %v3204_v33  ;;  %2823 = vmatprep.subr.bf16.mxu1 %v2822_v8  ;;  %v1090_v33 = vld [vmem:[%s3705_s22 + $0x18a8] sm:$0xff]  ;;  %v1092_v8 = vld [vmem:[%s3705_s22 + $0x18b8] sm:$0xff]  ;;  %v3236_v10 = vpack.c.bf16 %v1087_v26, %v1085_v6 }
 0x1e2   : > { %3207 = vmatprep.subr.bf16.mxu0 %v3206_v15  ;;  %v3238_v13 = vpack.c.bf16 %v1092_v8, %v1090_v33  ;;  %v1091_v15 = vld [vmem:[%s3705_s22 + $0x18b0] sm:$0xff]  ;;  %v2214_v33 = vld [vmem:[%s4648_s27 + $0xf8] sm:$0xff] }
 0x1e3   : > { %v3240_v18 = vpack.c.bf16 %v1091_v15, %v1089_v14  ;;  %v2213_v26 = vld [vmem:[%s4648_s27 + $0xf0] sm:$0xff] }
 0x1e4   : > { %2825 = vmatpush1.bf16.msra.mxu1 %v2824_v21  ;;  %v1095_v21 = vld [vmem:[%s3705_s22 + $0x18d0] sm:$0xff]  ;;  %v3278_v8 = vpack.c.bf16 %v2214_v33, %v2213_v26 }
 0x1e5   : > { %3209 = vmatpush1.bf16.msra.mxu0 %v3208_v23  ;;  %2827 = vmatprep.subr.bf16.mxu1 %v2826_v24  ;;  %v1098_v23 = vld [vmem:[%s3705_s22 + $0x18e8] sm:$0xff]  ;;  %v1100_v24 = vld [vmem:[%s3705_s22 + $0x18f8] sm:$0xff]  ;;  %v3244_v54 = vpack.c.bf16 %v1095_v21, %v1093_v20 }
 0x1e6   : > { %3211 = vmatprep.subr.bf16.mxu0 %v3210_v31  ;;  %v3246_v27 = vpack.c.bf16 %v1100_v24, %v1098_v23  ;;  %v1099_v31 = vld [vmem:[%s3705_s22 + $0x18f0] sm:$0xff] }
 0x1e7   : > { %v3248_v32 = vpack.c.bf16 %v1099_v31, %v1097_v29 }
 0x1e8   : > { %2829 = vmatpush1.bf16.msra.mxu1 %v2828_v37  ;;  %v3250_v37 = vpack.c.bf16 %v2200_v35, %v2199_v59 }
 0x1e9   : > { %3213 = vmatpush1.bf16.msra.mxu0 %v3212_v38  ;;  %2831 = vmatprep.subr.bf16.mxu1 %v2830_v39  ;;  %v2184_v38 = vld [vmem:[%s4648_s27 + $0x8] sm:$0xff]  ;;  %v2201_v39 = vld [vmem:[%s4648_s27 + $0x90] sm:$0xff] }
 0x1ea   : > { %3215 = vmatprep.subr.bf16.mxu0 %v3214_v42  ;;  %v3252_v41 = vpack.c.bf16 %v2184_v38, %v2183_v36  ;;  %v3254_v42 = vpack.c.bf16 %v2202_v40, %v2201_v39 }
 0x1ec   : > { %2833 = vmatpush1.bf16.msra.mxu1 %v2832_v55  ;;  %v3256_v55 = vpack.c.bf16 %v2186_v9, %v2185_v43 }
 0x1ed   : > { %3217 = vmatpush1.bf16.msra.mxu0 %v3216_v46  ;;  %3251 = vmatprep.subr.bf16.mxu1 %v3250_v37  ;;  %v3258_v46 = vpack.c.bf16 %v2204_v45, %v2203_v44 }
 0x1ee   : > { %3219 = vmatprep.subr.bf16.mxu0 %v3218_v47  ;;  %v2187_v47 = vld [vmem:[%s4648_s27 + $0x20] sm:$0xff] }
 0x1ef   : > { %1674 = vmatmul.mubr.f32.vlgmr.msra.gmra.mrb[0].mxu1 %v4481_v12  ;;  %v1084_v12 = vld [vmem:[%s3705_s22 + $0x1878] sm:$0xff]  ;;  %v3260_v25 = vpack.c.bf16 %v2188_v49, %v2187_v47 }
 0x1f0   : > { %2100 = vmatmul.mubr.f32.vlgmr.msra.gmra.mrb[0].mxu0 %v4486_v48  ;;  %v3230_v48 = vpack.c.bf16 %v1084_v12, %v1082_v1  ;;  %3253 = vmatpush3.bf16.msra.mxu1 %v3252_v41  ;;  %v3270_v12 = vpack.c.bf16 %v2210_v0, %v2209_v63 }
 0x1f1   : > { %3221 = vmatpush1.bf16.msra.mxu0 %v3220_v52  ;;  %2170 = vmatprep.mubr.f32.mxu0 %v3511_v60  ;;  %v3262_v52 = vpack.c.bf16 %v2206_v7, %v2205_v51  ;;  %v2191_v60 = vld [vmem:[%s4648_s27 + $0x40] sm:$0xff] }
 0x1f2   : > { %3223 = vmatprep.subr.bf16.mxu0 %v3222_v53  ;;  %3255 = vmatprep.subr.bf16.mxu1 %v3254_v42  ;;  %v2189_v53 = vld [vmem:[%s4648_s27 + $0x30] sm:$0xff] }
 0x1f3   : > { %v3264_v11 = vpack.c.bf16 %v2190_v56, %v2189_v53 }
 0x1f4   : > { %3257 = vmatpush3.bf16.msra.mxu1 %v3256_v55 }
 0x1f5   : > { %3225 = vmatpush1.bf16.msra.mxu0 %v3224_v58  ;;  %3259 = vmatprep.subr.bf16.mxu1 %v3258_v46  ;;  %v3266_v58 = vpack.c.bf16 %v2208_v57, %v2207_v28 }
 0x1f6   : > { %3227 = vmatprep.subr.bf16.mxu0 %v3226_v62  ;;  %v2192_v62 = vld [vmem:[%s4648_s27 + $0x48] sm:$0xff] }
 0x1f7   : > { %v3268_v1 = vpack.c.bf16 %v2192_v62, %v2191_v60 }
 0x1f8   : > { %3261 = vmatpush3.bf16.msra.mxu1 %v3260_v25 }
 0x1f9   : > { %3229 = vmatpush1.bf16.msra.mxu0 %v3228_v30  ;;  %3263 = vmatprep.subr.bf16.mxu1 %v3262_v52  ;;  %v2193_v30 = vld [vmem:[%s4648_s27 + $0x50] sm:$0xff] }
 0x1fa   : > { %3231 = vmatprep.subr.bf16.mxu0 %v3230_v48  ;;  %v2194_v48 = vld [vmem:[%s4648_s27 + $0x58] sm:$0xff] }
 0x1fb   : > { %v3272_v50 = vpack.c.bf16 %v2194_v48, %v2193_v30 }
 0x1fc   : > { %3265 = vmatpush3.bf16.msra.mxu1 %v3264_v11 }
 0x1fd   : > { %3233 = vmatpush1.bf16.msra.mxu0 %v3232_v4  ;;  %3267 = vmatprep.subr.bf16.mxu1 %v3266_v58  ;;  %v2195_v4 = vld [vmem:[%s4648_s27 + $0x60] sm:$0xff] }
 0x1fe   : > { %3235 = vmatprep.subr.bf16.mxu0 %v3234_v5  ;;  %v2196_v5 = vld [vmem:[%s4648_s27 + $0x68] sm:$0xff] }
 0x1ff   : > { %v3276_v6 = vpack.c.bf16 %v2196_v5, %v2195_v4 }
 0x200   : > { %3269 = vmatpush3.bf16.msra.mxu1 %v3268_v1 }
 0x201   : > { %3237 = vmatpush1.bf16.msra.mxu0 %v3236_v10  ;;  %3271 = vmatprep.subr.bf16.mxu1 %v3270_v12  ;;  %v2197_v10 = vld [vmem:[%s4648_s27 + $0x70] sm:$0xff] }
 0x202   : > { %3239 = vmatprep.subr.bf16.mxu0 %v3238_v13  ;;  %v2198_v13 = vld [vmem:[%s4648_s27 + $0x78] sm:$0xff] }
 0x203   : > { %v3280_v14 = vpack.c.bf16 %v2198_v13, %v2197_v10 }
 0x204   : > { %3273 = vmatpush3.bf16.msra.mxu1 %v3272_v50 }
 0x205   : > { %3241 = vmatpush1.bf16.msra.mxu0 %v3240_v18  ;;  %3275 = vmatprep.subr.bf16.mxu1 %v3274_v3  ;;  %v1101_v18 = vld [vmem:[%s3713_s26] sm:$0x3] }
 0x206   : > { %3243 = vmatprep.subr.bf16.mxu0 %v3242_v19  ;;  %v1109_v19 = vsub.s32 1, %v3803_v61  ;;  %v1106_v20 = vrot.slane %v1101_v18, %v1105_v17 }
 0x208   : > { %3277 = vmatpush3.bf16.msra.mxu1 %v3276_v6  ;;  %v1110_v21 = vrot.slane %v1101_v18, %v1109_v19 }
 0x209   : > { %3245 = vmatpush1.bf16.msra.mxu0 %v3244_v54  ;;  %3279 = vmatprep.subr.bf16.mxu1 %v3278_v8 }
 0x20a   : > { %3247 = vmatprep.subr.bf16.mxu0 %v3246_v27 }
 0x20c   : > { %3281 = vmatpush3.bf16.msra.mxu1 %v3280_v14 }
 0x20d   : > { %3249 = vmatpush1.bf16.msra.mxu0 %v3248_v32 }
 0x210   : > { %2171 = vmatmul.mubr.f32.vlgmr.msra.gmra.mrb[0].mxu0 %v2409_v34 }
 0x2c2   : > { %v1675_v15 = vpop.f32.mrb[0].mxu1 }
 0x2c3   : > { %v1677_v16 = vpop.f32.mrb[1].mxu1  ;;  %v3282_v23 = vadd.f32 %v1675_v15, %v1106_v20 }
 0x2c4   : > { %v3284_v24 = vadd.f32 %v1677_v16, %v1110_v21 }
 0x2e3   : > { %v2172_v54 = vpop.f32.mrb[0].mxu0 }
 0x2e4   : > { %v3283_v27 = vadd.f32 %v3282_v23, %v2172_v54  ;;  %v2174_v29 = vpop.f32.mrb[1].mxu0 }
 0x2e5   : > { %v3285_v31 = vadd.f32 %v3284_v24, %v2174_v29 }
 0x2e6   : > { %v2179_v32 = vmul.f32 0.2, %v3283_v27  ;;  %vm2177_vm0 = vcmp.ge.f32.partialorder %v3283_v27, 0.0 }
 0x2e7   : > { %v2180_v34 = vmul.f32 0.2, %v3285_v31  ;;  %vm2178_vm1 = vcmp.ge.f32.partialorder %v3285_v31, 0.0 }
 0x2e8   : > { %v2181_v35 = vsel %vm2177_vm0, %v3283_v27, %v2179_v32 }
 0x2e9   : > { %v2182_v59 = vsel %vm2178_vm1, %v3285_v31, %v2180_v34 }
 0x2ea   : > { %2279 = vmatprep.mubr.f32.mxu1 %v2182_v59 }
 0x2eb   : > { %2280 = vmatmul.mubr.f32.vlgmr.msra.gmra.mrb[2].mxu1 %v2181_v35 }
 0x3be   : > { %v2447_v61 = vpop.f32.mrb[2].mxu1 }
 0x3bf   : > { %v2448_v36 = vpop.f32.mrb[3].mxu1 }
 0x3c0   : > { %v2449_v37 = vadd.f32 %v2448_v36, %v2447_v61 }
 0x3c2   : > { %2285 = vst [vmem:[%s293_s8] sm:$0x3] %v2449_v37 }
 0x3c3 PF: > { %p17_p0 = scmp.ge.s32.totalorder %s3559_s20, 6   ;;  %s4715_s15 = smov %s3492_s16 }
 0x3c4   : > { %s4716_s16 = smov %s3496_s17  ;;  %s4717_s17 = smov %s3569_s23 }
 0x3c5   : > { %s4718_s18 = smov %s3559_s20  ;;  %19 = sbr.rel (!%p17_p0) target bundleno = 5 (0x5), region = 100 }
 0x3cc   :  { %2305 = vsyncpa [#allocation3], 1 }
 0x3cd   :  { %2307 = vsyncpa [#allocation3 + $0x1], 1 }
 0x3ce   :  { %2308 = vsyncpa [#allocation5], 1 }
 0x3cf   :  { %2310 = vsyncpa [#allocation5 + $0x1], 1 }

</bundles_post_ra>
